<compile_context>
chip_gen: v5e
topology: v5e:2x2
jax: 0.10.0
libtpu: 0.0.40
codegen_flags: <defaults>
</compile_context>

<pallas_src>
import jax
import jax.numpy as jnp
import numpy as np
from jax.experimental import pallas as pl
from jax.experimental.pallas import tpu as pltpu

# ----------------------------------------------------------------------------
# Static module configuration (deterministic, synthetic).
# ----------------------------------------------------------------------------
X_DIM = 5
D_DIM = 32
D_L = 2                      # number of hidden (ReLU + Linear(d_dim, d_dim)) layers
NUM_ENC_FUNCS = 4            # num_encoding_functions
INCLUDE_INPUT = True
LOG_SAMPLING = True
# (start, length, pe) per block, in key order: E, X, Y, Z, t
BLOCKS = (
    (0, 1, False),   # E
    (1, 1, True),    # X
    (2, 1, True),    # Y
    (3, 1, True),    # Z
    (4, 1, False),   # t
)
if LOG_SAMPLING:
    FREQS = tuple(2.0 ** i for i in range(NUM_ENC_FUNCS))
else:
    FREQS = tuple(np.linspace(1.0, 2.0 ** (NUM_ENC_FUNCS - 1), NUM_ENC_FUNCS).tolist())

# The in-kernel double-angle recursion requires doubling freqs starting at 1.
assert FREQS[0] == 1.0 and all(
    FREQS[i + 1] == 2.0 * FREQS[i] for i in range(len(FREQS) - 1)
), "double-angle recursion in the kernel assumes freqs = 1,2,4,..."


def _pe_dim():
    d = 0
    for _, length, pe in BLOCKS:
        if pe:
            d += length * NUM_ENC_FUNCS * 2
            if INCLUDE_INPUT:
                d += length
        else:
            d += length
    return d


PE_DIM = _pe_dim()           # = 1 + 3*(1 + 4*2) + 1 = 29

# ---- fused-first-layer staging layout (8-sublane-aligned feature blocks) ----
X_PAD = 8                                     # x padded to 8 rows (one sublane tile)
N_STAGE_BLOCKS = 1 + 2 * NUM_ENC_FUNCS + 1    # identity + (sin,cos)*F + ones (bias)
K_FUSED = X_PAD * N_STAGE_BLOCKS              # 80
ONES_OFF = X_PAD * (1 + 2 * NUM_ENC_FUNCS)    # 72


def _sin_off(fi):
    return X_PAD * (1 + 2 * fi)


def _cos_off(fi):
    return X_PAD * (2 + 2 * fi)


# ---- parameter slab layout (lane offsets; no slice crosses a 128-lane tile) -
WH_OFF = 128                        # hidden weights start at lane-tile 1
BH_OFF = WH_OFF + D_L * D_DIM       # 192
WL_OFF = BH_OFF + D_L               # 194
BL_OFF = WL_OFF + 1                 # 195
SLAB_W = 256                        # two lane tiles


# ----------------------------------------------------------------------------
# Pallas kernel: one batch tile (batch on the lane dimension).
# ----------------------------------------------------------------------------
def disc_kernel(xT_ref, p_ref, out_ref, staged_ref):
    xT = xT_ref[...]                                      # (8, tb) f32, rows 5..7 zero

    # --- stage [x | sin(2^f x) | cos(2^f x) | 1] into VMEM (8-row aligned) ---
    staged_ref[0:X_PAD, :] = xT
    s = jnp.sin(xT)
    c = jnp.cos(xT)
    staged_ref[_sin_off(0):_sin_off(0) + X_PAD, :] = s
    staged_ref[_cos_off(0):_cos_off(0) + X_PAD, :] = c
    for fi in range(1, NUM_ENC_FUNCS):                    # static unroll (3 doublings)
        s, c = 2.0 * s * c, 2.0 * c * c - 1.0             # double-angle recursion
        staged_ref[_sin_off(fi):_sin_off(fi) + X_PAD, :] = s
        staged_ref[_cos_off(fi):_cos_off(fi) + X_PAD, :] = c
    staged_ref[ONES_OFF:ONES_OFF + X_PAD, :] = jnp.ones_like(xT)

    # --- fused first layer (PE + Linear + bias) as a single MXU matmul -------
    h = jnp.dot(p_ref[:, 0:K_FUSED], staged_ref[...],
                preferred_element_type=jnp.float32)       # (D_DIM, tb)

    # --- hidden layers --------------------------------------------------------
    for i in range(D_L):                                  # static unroll
        h = jnp.maximum(h, 0.0)                           # ReLU
        w = p_ref[:, WH_OFF + i * D_DIM: WH_OFF + (i + 1) * D_DIM]
        b = p_ref[:, BH_OFF + i: BH_OFF + i + 1]
        h = jnp.dot(w, h, preferred_element_type=jnp.float32) + b

    # --- final 32 -> 1 layer: VPU multiply + sublane reduce (no N=1 matmul) --
    h = jnp.maximum(h, 0.0)
    wl = p_ref[:, WL_OFF:WL_OFF + 1]                      # (D_DIM, 1)
    bl = p_ref[0:1, BL_OFF:BL_OFF + 1]                    # (1, 1)
    out = jnp.sum(h * wl, axis=0, keepdims=True) + bl     # (1, tb)
    out_ref[0] = out.astype(out_ref.dtype)                # lane-dense store


# ----------------------------------------------------------------------------
# Wrapper-side layout plumbing (done once; not on the hot path).
# ----------------------------------------------------------------------------
def _split_w0(w0):
    """Split w0 (PE_DIM, D_DIM) into identity / per-frequency sin / cos pieces
    keyed by raw feature column (zero rows for non-PE features). Exact."""
    w0 = np.asarray(w0, dtype=np.float32)
    w_id = np.zeros((X_DIM, D_DIM), np.float32)
    w_sin = np.zeros((NUM_ENC_FUNCS, X_DIM, D_DIM), np.float32)
    w_cos = np.zeros((NUM_ENC_FUNCS, X_DIM, D_DIM), np.float32)
    r = 0
    for start, length, pe in BLOCKS:
        if pe:
            if INCLUDE_INPUT:
                w_id[start:start + length] = w0[r:r + length]
                r += length
            for fi in range(NUM_ENC_FUNCS):
                w_sin[fi, start:start + length] = w0[r:r + length]
                r += length
                w_cos[fi, start:start + length] = w0[r:r + length]
                r += length
        else:
            w_id[start:start + length] = w0[r:r + length]
            r += length
    assert r == PE_DIM
    return w_id, w_sin, w_cos


def _build_param_slab(w0, b0, wh, bh, wl, bl):
    """Pack every constant operand into one (D_DIM, SLAB_W) slab -> one DMA."""
    b0 = np.asarray(b0, np.float32).reshape(-1)
    wh = np.asarray(wh, np.float32)
    bh = np.asarray(bh, np.float32)
    wl = np.asarray(wl, np.float32).reshape(-1)
    bl = float(np.asarray(bl, np.float32).reshape(()))

    w_id, w_sin, w_cos = _split_w0(w0)

    slab = np.zeros((D_DIM, SLAB_W), np.float32)
    # fused first-layer weight, aligned to the staging-block layout
    slab[:, 0:X_DIM] = w_id.T
    for fi in range(NUM_ENC_FUNCS):
        slab[:, _sin_off(fi):_sin_off(fi) + X_DIM] = w_sin[fi].T
        slab[:, _cos_off(fi):_cos_off(fi) + X_DIM] = w_cos[fi].T
    slab[:, ONES_OFF] = b0                        # bias folded via the ones block
    # hidden layers
    for i in range(D_L):
        slab[:, WH_OFF + i * D_DIM: WH_OFF + (i + 1) * D_DIM] = wh[i].T
        slab[:, BH_OFF + i] = bh[i].reshape(-1)
    # final layer
    slab[:, WL_OFF] = wl
    slab[0, BL_OFF] = bl
    return jnp.asarray(slab)


def discriminator_pos_encoding(x, w0, b0, wh, bh, wl, bl, *, tb=2048):
    """x: (B, X_DIM). Linear weights stored (in, out) (transposed torch layout)."""
    B = x.shape[0]
    tb = min(tb, B)
    # Keep grid_len >= 2 when the batch allows it so the 'parallel' axis can
    # shard across v7x's two TensorCores (grid of 1 is fine on v5e/v6e).
    if B // tb < 2 and B % 2 == 0 and (B // 2) % 128 == 0:
        tb = B // 2
    assert B % tb == 0, "batch must be divisible by the batch tile"
    assert tb == B or tb % 128 == 0, "batch tile must be lane-dense"
    grid_len = B // tb

    slab = _build_param_slab(w0, b0, wh, bh, wl, bl)

    # TODO(synk): at very large B, have the producer emit x feature-major
    # (X_DIM, B) so this wrapper-side transpose/pad pass over HBM disappears.
    xT = jnp.pad(jnp.asarray(x, jnp.float32).T, ((0, X_PAD - X_DIM), (0, 0)))

    flops = 2 * B * (K_FUSED * D_DIM + D_L * D_DIM * D_DIM + D_DIM)
    cost = pl.CostEstimate(
        flops=flops,
        transcendentals=2 * B * X_DIM,
        bytes_accessed=B * X_PAD * 4 + B * 4 + int(slab.size) * 4,
    )

    out = pl.pallas_call(
        disc_kernel,
        out_shape=jax.ShapeDtypeStruct((grid_len, 1, tb), jnp.float32),
        grid_spec=pltpu.PrefetchScalarGridSpec(
            num_scalar_prefetch=0,
            grid=(grid_len,),
            in_specs=[
                pl.BlockSpec((X_PAD, tb), lambda i: (0, i)),     # batch tile on lanes
                pl.BlockSpec((D_DIM, SLAB_W), lambda i: (0, 0)),  # resident param slab
            ],
            out_specs=pl.BlockSpec((1, 1, tb), lambda i: (i, 0, 0)),
            scratch_shapes=[pltpu.VMEM((K_FUSED, tb), jnp.float32)],
        ),
        compiler_params=pltpu.CompilerParams(
            dimension_semantics=("parallel",)),
        cost_estimate=cost,
    )(xT, slab)

    return out.reshape(B, 1)


# ----------------------------------------------------------------------------
# Pure-JAX reference (mirrors the PyTorch forward exactly: explicit concat PE).
# ----------------------------------------------------------------------------
def reference_forward(x, w0, b0, wh, bh, wl, bl):
    cols = []
    for start, length, pe in BLOCKS:
        blk = x[:, start:start + length]
        if pe:
            parts = [blk] if INCLUDE_INPUT else []
            for f in FREQS:
                parts.append(jnp.sin(blk * f))
                parts.append(jnp.cos(blk * f))
            blk = jnp.concatenate(parts, axis=-1)
        cols.append(blk)
    enc = jnp.concatenate(cols, axis=-1)                  # (B, PE_DIM)
    h = enc @ w0 + b0
    for i in range(D_L):
        h = jnp.maximum(h, 0.0)
        h = h @ wh[i] + bh[i]
    h = jnp.maximum(h, 0.0)
    return h @ wl + bl


if __name__ == "__main__":
    key = jax.random.PRNGKey(0)
    kx, k0, k1, k2, k3 = jax.random.split(key, 5)

    B = 2048
    x = jax.random.normal(kx, (B, X_DIM), dtype=jnp.float32)

    # Deterministic synthetic parameters (Linear weights stored as (in, out)).
    w0 = jax.random.normal(k0, (PE_DIM, D_DIM), dtype=jnp.float32) * 0.1
    b0 = jax.random.normal(k1, (1, D_DIM), dtype=jnp.float32) * 0.1
    wh = jax.random.normal(k2, (D_L, D_DIM, D_DIM), dtype=jnp.float32) * 0.1
    bh = jax.random.normal(k3, (D_L, 1, D_DIM), dtype=jnp.float32) * 0.1
    wl = jax.random.normal(jax.random.PRNGKey(42), (D_DIM, 1), dtype=jnp.float32) * 0.1
    bl = jnp.full((1, 1), 0.05, dtype=jnp.float32)

    out = discriminator_pos_encoding(x, w0, b0, wh, bh, wl, bl, tb=2048)
    out = jax.block_until_ready(out)

    ref = jax.block_until_ready(reference_forward(x, w0, b0, wh, bh, wl, bl))
    # Tolerance covers (a) fused-matmul accumulation-order differences and
    # (b) few-ULP drift from the double-angle sin/cos recursion.
    np.testing.assert_allclose(np.asarray(out), np.asarray(ref), rtol=2e-4, atol=2e-4)

    print("KERNEL_OK")
</pallas_src>

<mosaic_0001>
module attributes {stable_mosaic.version = 11 : i64} {
  func.func @disc_kernel(%arg0: i32, %arg1: memref<8x1024xf32, #tpu.memory_space<vmem>>, %arg2: memref<32x256xf32, #tpu.memory_space<vmem>>, %arg3: memref<1x1x1024xf32, #tpu.memory_space<vmem>>, %arg4: memref<80x1024xf32, #tpu.memory_space<vmem>>) attributes {dimension_semantics = [#tpu.dimension_semantics<parallel>], iteration_bounds = array<i64: 2>, scalar_prefetch = 0 : i64, scratch_operands = 1 : i64, tpu.core_type = #tpu.core_type<tc>, window_params = [{transform_indices = @transform_0, window_bounds = array<i64: 8, 1024>}, {pipeline_mode = #tpu.pipeline_mode<synchronous>, transform_indices = @transform_1, window_bounds = array<i64: 32, 256>}, {transform_indices = @transform_2, window_bounds = array<i64: 1, 1, 1024>}]} {
    %c0 = arith.constant 0 : index
    %c0_0 = arith.constant 0 : index
    %0 = vector.load %arg1[%c0, %c0_0] : memref<8x1024xf32, #tpu.memory_space<vmem>>, vector<8x1024xf32>
    %c0_1 = arith.constant 0 : index
    %c0_2 = arith.constant 0 : index
    %1 = vector.load %arg4[%c0_1, %c0_2] : memref<80x1024xf32, #tpu.memory_space<vmem>>, vector<8x1024xf32>
    tpu.vector_store %arg4[%c0_1, %c0_2], %0 {strides = array<i32>} : memref<80x1024xf32, #tpu.memory_space<vmem>>, vector<8x1024xf32>,
    %2 = math.sin %0 : vector<8x1024xf32>
    %3 = math.cos %0 : vector<8x1024xf32>
    %c8 = arith.constant 8 : index
    %c0_3 = arith.constant 0 : index
    %4 = vector.load %arg4[%c8, %c0_3] : memref<80x1024xf32, #tpu.memory_space<vmem>>, vector<8x1024xf32>
    tpu.vector_store %arg4[%c8, %c0_3], %2 {strides = array<i32>} : memref<80x1024xf32, #tpu.memory_space<vmem>>, vector<8x1024xf32>,
    %c16 = arith.constant 16 : index
    %c0_4 = arith.constant 0 : index
    %5 = vector.load %arg4[%c16, %c0_4] : memref<80x1024xf32, #tpu.memory_space<vmem>>, vector<8x1024xf32>
    tpu.vector_store %arg4[%c16, %c0_4], %3 {strides = array<i32>} : memref<80x1024xf32, #tpu.memory_space<vmem>>, vector<8x1024xf32>,
    %cst = arith.constant 2.000000e+00 : f32
    %6 = vector.broadcast %cst : f32 to vector<8x1024xf32>
    %7 = arith.mulf %6, %2 : vector<8x1024xf32>
    %8 = arith.mulf %7, %3 : vector<8x1024xf32>
    %cst_5 = arith.constant 2.000000e+00 : f32
    %9 = vector.broadcast %cst_5 : f32 to vector<8x1024xf32>
    %10 = arith.mulf %9, %3 : vector<8x1024xf32>
    %11 = arith.mulf %10, %3 : vector<8x1024xf32>
    %cst_6 = arith.constant 1.000000e+00 : f32
    %12 = vector.broadcast %cst_6 : f32 to vector<8x1024xf32>
    %13 = arith.subf %11, %12 : vector<8x1024xf32>
    %c24 = arith.constant 24 : index
    %c0_7 = arith.constant 0 : index
    %14 = vector.load %arg4[%c24, %c0_7] : memref<80x1024xf32, #tpu.memory_space<vmem>>, vector<8x1024xf32>
    tpu.vector_store %arg4[%c24, %c0_7], %8 {strides = array<i32>} : memref<80x1024xf32, #tpu.memory_space<vmem>>, vector<8x1024xf32>,
    %c32 = arith.constant 32 : index
    %c0_8 = arith.constant 0 : index
    %15 = vector.load %arg4[%c32, %c0_8] : memref<80x1024xf32, #tpu.memory_space<vmem>>, vector<8x1024xf32>
    tpu.vector_store %arg4[%c32, %c0_8], %13 {strides = array<i32>} : memref<80x1024xf32, #tpu.memory_space<vmem>>, vector<8x1024xf32>,
    %cst_9 = arith.constant 2.000000e+00 : f32
    %16 = vector.broadcast %cst_9 : f32 to vector<8x1024xf32>
    %17 = arith.mulf %16, %8 : vector<8x1024xf32>
    %18 = arith.mulf %17, %13 : vector<8x1024xf32>
    %cst_10 = arith.constant 2.000000e+00 : f32
    %19 = vector.broadcast %cst_10 : f32 to vector<8x1024xf32>
    %20 = arith.mulf %19, %13 : vector<8x1024xf32>
    %21 = arith.mulf %20, %13 : vector<8x1024xf32>
    %cst_11 = arith.constant 1.000000e+00 : f32
    %22 = vector.broadcast %cst_11 : f32 to vector<8x1024xf32>
    %23 = arith.subf %21, %22 : vector<8x1024xf32>
    %c40 = arith.constant 40 : index
    %c0_12 = arith.constant 0 : index
    %24 = vector.load %arg4[%c40, %c0_12] : memref<80x1024xf32, #tpu.memory_space<vmem>>, vector<8x1024xf32>
    tpu.vector_store %arg4[%c40, %c0_12], %18 {strides = array<i32>} : memref<80x1024xf32, #tpu.memory_space<vmem>>, vector<8x1024xf32>,
    %c48 = arith.constant 48 : index
    %c0_13 = arith.constant 0 : index
    %25 = vector.load %arg4[%c48, %c0_13] : memref<80x1024xf32, #tpu.memory_space<vmem>>, vector<8x1024xf32>
    tpu.vector_store %arg4[%c48, %c0_13], %23 {strides = array<i32>} : memref<80x1024xf32, #tpu.memory_space<vmem>>, vector<8x1024xf32>,
    %cst_14 = arith.constant 2.000000e+00 : f32
    %26 = vector.broadcast %cst_14 : f32 to vector<8x1024xf32>
    %27 = arith.mulf %26, %18 : vector<8x1024xf32>
    %28 = arith.mulf %27, %23 : vector<8x1024xf32>
    %cst_15 = arith.constant 2.000000e+00 : f32
    %29 = vector.broadcast %cst_15 : f32 to vector<8x1024xf32>
    %30 = arith.mulf %29, %23 : vector<8x1024xf32>
    %31 = arith.mulf %30, %23 : vector<8x1024xf32>
    %cst_16 = arith.constant 1.000000e+00 : f32
    %32 = vector.broadcast %cst_16 : f32 to vector<8x1024xf32>
    %33 = arith.subf %31, %32 : vector<8x1024xf32>
    %c56 = arith.constant 56 : index
    %c0_17 = arith.constant 0 : index
    %34 = vector.load %arg4[%c56, %c0_17] : memref<80x1024xf32, #tpu.memory_space<vmem>>, vector<8x1024xf32>
    tpu.vector_store %arg4[%c56, %c0_17], %28 {strides = array<i32>} : memref<80x1024xf32, #tpu.memory_space<vmem>>, vector<8x1024xf32>,
    %c64 = arith.constant 64 : index
    %c0_18 = arith.constant 0 : index
    %35 = vector.load %arg4[%c64, %c0_18] : memref<80x1024xf32, #tpu.memory_space<vmem>>, vector<8x1024xf32>
    tpu.vector_store %arg4[%c64, %c0_18], %33 {strides = array<i32>} : memref<80x1024xf32, #tpu.memory_space<vmem>>, vector<8x1024xf32>,
    %cst_19 = arith.constant 1.000000e+00 : f32
    %36 = vector.broadcast %cst_19 : f32 to vector<8x1024xf32>
    %c72 = arith.constant 72 : index
    %c0_20 = arith.constant 0 : index
    %37 = vector.load %arg4[%c72, %c0_20] : memref<80x1024xf32, #tpu.memory_space<vmem>>, vector<8x1024xf32>
    tpu.vector_store %arg4[%c72, %c0_20], %36 {strides = array<i32>} : memref<80x1024xf32, #tpu.memory_space<vmem>>, vector<8x1024xf32>,
    %c0_21 = arith.constant 0 : index
    %c0_22 = arith.constant 0 : index
    %38 = vector.load %arg2[%c0_21, %c0_22] : memref<32x256xf32, #tpu.memory_space<vmem>>, vector<32x80xf32>
    %c0_23 = arith.constant 0 : index
    %c0_24 = arith.constant 0 : index
    %39 = vector.load %arg4[%c0_23, %c0_24] : memref<80x1024xf32, #tpu.memory_space<vmem>>, vector<80x1024xf32>
    %cst_25 = arith.constant dense<0.000000e+00> : vector<32x1024xf32>
    %40 = tpu.matmul %38, %39, %cst_25 {dimension_numbers = #tpu.dot_dimension_numbers<[1], [0], [0], [1], [0, 0, 1, 1], [], []>} : vector<32x80xf32>, vector<80x1024xf32>, vector<32x1024xf32> -> vector<32x1024xf32>
    %cst_26 = arith.constant 0.000000e+00 : f32
    %41 = vector.broadcast %cst_26 : f32 to vector<32x1024xf32>
    %42 = arith.maximumf %40, %41 : vector<32x1024xf32>
    %c0_27 = arith.constant 0 : index
    %c128 = arith.constant 128 : index
    %43 = vector.load %arg2[%c0_27, %c128] : memref<32x256xf32, #tpu.memory_space<vmem>>, vector<32x32xf32>
    %c0_28 = arith.constant 0 : index
    %c192 = arith.constant 192 : index
    %44 = vector.load %arg2[%c0_28, %c192] : memref<32x256xf32, #tpu.memory_space<vmem>>, vector<32x1xf32>
    %cst_29 = arith.constant dense<0.000000e+00> : vector<32x1024xf32>
    %45 = tpu.matmul %43, %42, %cst_29 {dimension_numbers = #tpu.dot_dimension_numbers<[1], [0], [0], [1], [0, 0, 1, 1], [], []>} : vector<32x32xf32>, vector<32x1024xf32>, vector<32x1024xf32> -> vector<32x1024xf32>
    %46 = vector.broadcast %44 : vector<32x1xf32> to vector<32x1024xf32>
    %47 = arith.addf %45, %46 : vector<32x1024xf32>
    %cst_30 = arith.constant 0.000000e+00 : f32
    %48 = vector.broadcast %cst_30 : f32 to vector<32x1024xf32>
    %49 = arith.maximumf %47, %48 : vector<32x1024xf32>
    %c0_31 = arith.constant 0 : index
    %c160 = arith.constant 160 : index
    %50 = vector.load %arg2[%c0_31, %c160] : memref<32x256xf32, #tpu.memory_space<vmem>>, vector<32x32xf32>
    %c0_32 = arith.constant 0 : index
    %c193 = arith.constant 193 : index
    %51 = vector.load %arg2[%c0_32, %c193] : memref<32x256xf32, #tpu.memory_space<vmem>>, vector<32x1xf32>
    %cst_33 = arith.constant dense<0.000000e+00> : vector<32x1024xf32>
    %52 = tpu.matmul %50, %49, %cst_33 {dimension_numbers = #tpu.dot_dimension_numbers<[1], [0], [0], [1], [0, 0, 1, 1], [], []>} : vector<32x32xf32>, vector<32x1024xf32>, vector<32x1024xf32> -> vector<32x1024xf32>
    %53 = vector.broadcast %51 : vector<32x1xf32> to vector<32x1024xf32>
    %54 = arith.addf %52, %53 : vector<32x1024xf32>
    %cst_34 = arith.constant 0.000000e+00 : f32
    %55 = vector.broadcast %cst_34 : f32 to vector<32x1024xf32>
    %56 = arith.maximumf %54, %55 : vector<32x1024xf32>
    %c0_35 = arith.constant 0 : index
    %c194 = arith.constant 194 : index
    %57 = vector.load %arg2[%c0_35, %c194] : memref<32x256xf32, #tpu.memory_space<vmem>>, vector<32x1xf32>
    %c0_36 = arith.constant 0 : index
    %c195 = arith.constant 195 : index
    %58 = vector.load %arg2[%c0_36, %c195] : memref<32x256xf32, #tpu.memory_space<vmem>>, vector<1x1xf32>
    %59 = vector.broadcast %57 : vector<32x1xf32> to vector<32x1024xf32>
    %60 = arith.mulf %56, %59 : vector<32x1024xf32>
    %cst_37 = arith.constant dense<0.000000e+00> : vector<1024xf32>
    %61 = vector.multi_reduction <add>, %60, %cst_37 [0] : vector<32x1024xf32> to vector<1024xf32>
    %62 = vector.shape_cast %61 : vector<1024xf32> to vector<1x1024xf32>
    %63 = vector.broadcast %58 : vector<1x1xf32> to vector<1x1024xf32>
    %64 = arith.addf %62, %63 : vector<1x1024xf32>
    %c0_38 = arith.constant 0 : index
    %c0_39 = arith.constant 0 : index
    %c0_40 = arith.constant 0 : index
    %65 = vector.load %arg3[%c0_38, %c0_39, %c0_40] : memref<1x1x1024xf32, #tpu.memory_space<vmem>>, vector<1x1x1024xf32>
    %66 = vector.shape_cast %65 : vector<1x1x1024xf32> to vector<1x1024xf32>
    %67 = vector.shape_cast %64 : vector<1x1024xf32> to vector<1x1x1024xf32>
    tpu.vector_store %arg3[%c0_38, %c0_39, %c0_40], %67 {strides = array<i32>} : memref<1x1x1024xf32, #tpu.memory_space<vmem>>, vector<1x1x1024xf32>,
    return
  }
  func.func @transform_0(%arg0: i32) -> (i32, i32) {
    %c0_i32 = arith.constant 0 : i32
    %c0_i32_0 = arith.constant 0 : i32
    return %c0_i32, %arg0 : i32, i32
  }
  func.func @transform_1(%arg0: i32) -> (i32, i32) {
    %c0_i32 = arith.constant 0 : i32
    %c0_i32_0 = arith.constant 0 : i32
    %c0_i32_1 = arith.constant 0 : i32
    return %c0_i32, %c0_i32_0 : i32, i32
  }
  func.func @transform_2(%arg0: i32) -> (i32, i32, i32) {
    %c0_i32 = arith.constant 0 : i32
    %c0_i32_0 = arith.constant 0 : i32
    %c0_i32_1 = arith.constant 0 : i32
    return %arg0, %c0_i32, %c0_i32_0 : i32, i32, i32
  }
}

</mosaic_0001>

<bundles_post_ra>
// kernel: tpu_custom_call.1
= control target key start
LH: loop header
LB: loop body
LE: loop exit
PB: predicated region body
PF: predicated region fallthrough
CT: control target
= control target key end

     0   :  { %7 = vsyncpa [#allocation4], 0  ;;  %s6331_s0 = inlined_call_operand.hbm [shape: f32[8,2048], index: 0, kind: input, shape index: {}]   ;;  %s6332_s1 = inlined_call_operand.hbm [shape: f32[32,256], index: 1, kind: input, shape index: {}]   ;;  %s6333_s2 = inlined_call_operand.hbm [shape: f32[2,1,1024], index: 2, kind: output, shape index: {}]  }
   0x1   :  { %9 = vsyncpa [#allocation4 + $0x1], 0 }
   0x2   :  { %10 = vsyncpa [#allocation7], 0 }
   0x3   :  { %11 = vsyncpa [#allocation5], 0 }
   0x4   :  { %13 = vsyncpa [#allocation5 + $0x1], 0  ;;  %s4514_s9 = smov 0   ;;  %s4516_s10 = smov 0  }
   0x5   :  { %s4518_s11 = smov 0   ;;  %s4520_s12 = smov 0  }
   0x6 LB: > { %s108_s15 = sshll.u32 %s6332_s1, 4  ;;  %s4538_s16 = sadd.s32 4294967295, %s4481_s12   ;;  %s4481_s12 = sphi %s4520_s12, %s6370_s12   ;;  %s4477_s11 = sphi %s4518_s11, %s6369_s11   ;;  %s4473_s10 = sphi %s4516_s10, %s6368_s10   ;;  %s4469_s9 = sphi %s4514_s9, %s6367_s9   ;;  %s109_s15 = int_to_ptr.hbm [resolvable:$true] %s108_s15 }
   0x7   : > { %p4076_p0 = scmp.ge.s32.totalorder %s4481_s12, 1  ;;  %p40_p1 = scmp.eq.s32.totalorder %s4538_s16, 0 }
   0x8   : > { %p97_p2 = scmp.lt.s32.totalorder %s4481_s12, 3  ;;  %s4483_s18 = smov [#allocation6]  }
   0x9   : > { %s110_s19 = sshll.u32 %s4483_s18, 4  ;;  %s4484_s20 = smov 256   ;;  %s111_s19 = int_to_ptr.vmem [resolvable:$true] %s110_s19 }
   0xa   : > { %p4543_p3 = pnand %p4076_p0, %p97_p2  ;;  %s4485_s21 = smov 16  }
   0xb   : > { %s4075_s22 = sadd.s32 4294967294, %s4481_s12   ;;  %s4554_s23 = sadd.s32 1, %s4481_s12  }
   0xc   : > { %p4267_p4 = pneg %p4543_p3  ;;  %s26_s24 = sadd.s32 1, %s4477_s11 }
   0xd   : > { %s23_s25 = ssub.s32 %s4481_s12, %s4554_s23  ;;  %p33_p7 = scmp.ne.s32.totalorder %s4477_s11, %s4473_s10 }
   0xe   : > { %p4268_p6 = pnand %p4267_p4, %p40_p1  ;;  %p24_p8 = scmp.eq.s32.totalorder %s23_s25, 0 }
   0xf   : > { %p34_p9 = scmp.eq.s32.totalorder %s4481_s12, 0  ;;  %p39_p10 = scmp.ne.s32.totalorder %s4473_s10, %s4469_s9 }
  0x10   : > { %4270 = dma.hbm_to_vmem [thread:$0]  (!%p4268_p6), %s109_s15, 1024, %s111_s19, [#allocation7], %s4484_s20, %s4484_s20, %s4485_s21  }
  0x11   : > { %p84_p11 = scmp.eq.s32.totalorder %s4538_s16, 1  ;;  %p4570_p12 = por %p40_p1, %p39_p10 }
  0x12   : > { %s4566_s26 = scalar_select %p24_p8, %s4477_s11, %s26_s24  }
  0x13   : > { %p4574_p13 = por %p84_p11, %p33_p7  ;;  %p90_p0 = scmp.eq.s32.totalorder %s4075_s22, 1 }
  0x14   : > { %p35_p2 = por %p34_p9, %p33_p7  ;;  %s124_s29 = sand.u32 1, %s4477_s11  }
  0x15   : > { %p4579_p4 = por %p90_p0, %p39_p10  ;;  %p4280_p6 = scmp.lt.s32.totalorder %s4481_s12, 2 }
  0x16   : > { %s4079_s3 = sshll.u32 %s124_s29, 6  ;;  %s4258_s4 = sshll.u32 %s4481_s12, 6 }
  0x17   : > { %s133_s7 = scalar_lea.hbm %s6331_s0, %s4258_s4  ;;  %s128_s13 = scalar_lea.vmem [#allocation3], %s4079_s3 }
  0x18   : > { %s135_s8 = sshll.u32 %s133_s7, 4  ;;  %s137_s14 = sshll.u32 %s128_s13, 4  ;;  %s136_s8 = int_to_ptr.hbm [resolvable:$true] %s135_s8  ;;  %s138_s14 = int_to_ptr.vmem [resolvable:$true] %s137_s14 }
  0x19   : > { %p4588_p8 = pnand %p4280_p6, %p35_p2  ;;  %s125_s18 = scalar_lea.sflag [#allocation4], %s124_s29 }
  0x1a   : > { %s4381_s19 = sshra.s32 %s136_s8, 4  ;;  %s4388_s24 = scalar_lea.hbm %s6331_s0, 128  ;;  %s4382_s19 = int_to_ptr.hbm [resolvable:$true] %s4381_s19 }
  0x1b   : > { %s4383_s20 = scalar_lea.hbm %s4382_s19, 64  ;;  %p4385_p9 = pneg %p4588_p8 }
  0x1c   : > { %p4384_p7 = scmp.ne.s32.totalorder %s4382_s19, %s4383_s20  ;;  %p4389_p0 = scmp.lt.s32.totalorder %s4382_s19, %s6331_s0 }
  0x1d   : > { %p4390_p2 = scmp.lt.s32.totalorder %s4388_s24, %s4383_s20 }
  0x1e   : > { %p4386_p10 = pnand %p4385_p9, %p4384_p7 }
  0x1f   : > { %p4391_p6 = por %p4390_p2, %p4389_p0 }
  0x20   : > { %p4387_p11 = pneg %p4386_p10 }
  0x22   : > { %p4392_p5 = pnand %p4391_p6, %p4387_p11 }
  0x24   : > { %4395 = shalt.err (!%p4392_p5)
}
  0x25   : > { %4274 = dma.hbm_to_vmem [thread:$0]  (!%p4588_p8), %s136_s8, 1024, %s138_s14, %s125_s18  }
  0x26   : > { %146 = sbr.rel (%p4543_p3) target bundleno = 967 (0x3c7), region = 28  ;;  %s4605_s29 = sand.u32 (!%p4543_p3), 1, %s4473_s10  }
  0x27   : > { %s4083_s4 = sshll.u32 (!%p4543_p3), %s4605_s29, 6  ;;  %s149_s5 = scalar_lea.sflag (!%p4543_p3), [#allocation4], %s4605_s29 }
  0x28   : > { %s4609_s6 = scalar_lea.vmem (!%p4543_p3), [#allocation3], %s4083_s4 }
  0x2b   : > { %4456 = dma.done.wait (%p4570_p12), %s149_s5, 1024  }
  0x2c   : > { %4458 = vsyncadd (%p4570_p12), %s149_s5, 4294966272 }
  0x2d   : > { %4460 = dma.done.wait (%p40_p1), [#allocation7], 1024  }
  0x2e   : > { %4462 = vsyncadd (%p40_p1), [#allocation7], 4294966272  ;;  %v6335_v0 = vmov 1.0   ;;  %v4624_v1 = vld [vmem:[%s4609_s6] sm:$0xff]  ;;  %v4627_v2 = vld [vmem:[%s4609_s6 + $0x8] sm:$0xff]  ;;  %s4494_s17 = smov 96  }
  0x2f   : > { %2963 = vmatpush.msra.mxu0 %v6335_v0  ;;  %2992 = vmatpush.msra.mxu1 %v6335_v0  ;;  %v4630_v3 = vld [vmem:[%s4609_s6 + $0x10] sm:$0xff]  ;;  %v196_v4 = vand.u32 2147483647, %v4624_v1  ;;  %v199_v5 = vand.u32 2139095040, %v4624_v1  ;;  %v351_v6 = vand.u32 2147483647, %v4627_v2 }
  0x30   : > { %3021 = vmatpush.msra.mxu2 %v6335_v0  ;;  %3050 = vmatpush.msra.mxu3 %v6335_v0  ;;  %v354_v7 = vand.u32 2139095040, %v4627_v2  ;;  %v509_v8 = vand.u32 2139095040, %v4630_v3  ;;  %v4487_v29 = vmov 683565275   ;;  %v4488_v31 = vmov 2475754826  }
  0x31   : > { %v200_v9 = vshrl.u32 %v199_v5, 23  ;;  %v203_v10 = vand.u32 8388607, %v196_v4  ;;  %v358_v12 = vand.u32 8388607, %v351_v6  ;;  %s4085_s27 = sshll.u32 %s4605_s29, 3 }
  0x32   : > { %v355_v11 = vshrl.u32 %v354_v7, 23  ;;  %v510_v16 = vshrl.u32 %v509_v8, 23  ;;  %v4489_v33 = vmov 2131351028   ;;  %v6337_v35 = vmov 2102212464  }
  0x33   : > { %v4086_v13 = vadd.s32 4294967169, %v200_v9  ;;  %v204_v14 = vor.u32 8388608, %v203_v10  ;;  %v359_v18 = vor.u32 8388608, %v358_v12  ;;  %v4491_v37 = vmov 920167782   ;;  %s4255_s7 = sshll.u32 %s4538_s16, 3 }
  0x34   : > { %v4089_v15 = vadd.s32 4294967169, %v355_v11  ;;  %v4092_v22 = vadd.s32 4294967169, %v510_v16  ;;  %v6339_v46 = vmov 1326507024   ;;  %s3990_s14 = scalar_lea.hbm %s6333_s2, %s4255_s7  ;;  %s178_s16 = scalar_lea.vmem [#allocation8], %s4085_s27 }
  0x35   : > { %v206_v17 = vadd.s32 1, %v4086_v13  ;;  %v4641_v21 = vshll.u32 %v204_v14, 8  ;;  %v4647_v27 = vshll.u32 %v359_v18, 8  ;;  %s3992_s15 = sshll.u32 %s178_s16, 4  ;;  %s3994_s18 = sshll.u32 %s3990_s14, 4  ;;  %s3993_s15 = int_to_ptr.vmem [resolvable:$true] %s3992_s15  ;;  %s3995_s18 = int_to_ptr.hbm [resolvable:$true] %s3994_s18 }
  0x36   : > { %v361_v19 = vadd.s32 1, %v4089_v15  ;;  %v4655_v40 = vadd.s32 1, %v4092_v22  ;;  %s3980_s19 = scalar_lea.sflag [#allocation5], %s4605_s29  ;;  %s4425_s20 = sshra.s32 %s3995_s18, 4  ;;  %s4426_s20 = int_to_ptr.hbm [resolvable:$true] %s4425_s20 }
  0x37   : > { %vm207_vm0 = vcmp.gt.s32.totalorder %v206_v17, 0  ;;  %v245_v39 = vand.u32 65535, %v4641_v21  ;;  %v246_v44 = vshrl.u32 %v4641_v21, 16  ;;  %s4427_s21 = scalar_lea.hbm %s4426_s20, 8  ;;  %s4431_s25 = scalar_lea.hbm %s6333_s2, 16 }
  0x38   : > { %v208_v20 = vsel %vm207_vm0, %v206_v17, 0  ;;  %vm362_vm1 = vcmp.gt.s32.totalorder %v361_v19, 0  ;;  %vm517_vm15 = vcmp.gt.s32.totalorder %v4655_v40, 0  ;;  %p4428_p1 = scmp.ne.s32.totalorder %s4426_s20, %s4427_s21  ;;  %p4432_p12 = scmp.lt.s32.totalorder %s4426_s20, %s6333_s2 }
  0x39   : > { %v210_v23 = vand.u32 31, %v208_v20  ;;  %v363_v24 = vsel %vm362_vm1, %v361_v19, 0  ;;  %v4643_v25 = vshrl.u32 %v208_v20, 5  ;;  %p4433_p8 = scmp.lt.s32.totalorder %s4431_s25, %s4427_s21 }
  0x3a   : > { %v4645_v26 = vand.u32 31, %v363_v24  ;;  %v4675_v57 = vshrl.u32 %v363_v24, 5  ;;  %p4429_p3 = pnand %p4428_p1, %p4574_p13 }
  0x3b   : > { %v211_v28 = vsub.s32 32, %v210_v23  ;;  %v213_v30 = vshll.u32 %v4487_v29, %v210_v23  ;;  %v216_v32 = vshll.u32 %v4488_v31, %v210_v23  ;;  %v219_v34 = vshll.u32 %v4489_v33, %v210_v23  ;;  %p4434_p7 = por %p4433_p8, %p4432_p12 }
  0x3c   : > { %v222_v36 = vshll.u32 %v6337_v35, %v210_v23  ;;  %v225_v38 = vshll.u32 %v4491_v37, %v210_v23  ;;  %vm228_vm2 = vcmp.lt.s32.totalorder %v4643_v25, 1  ;;  %vm231_vm3 = vcmp.lt.s32.totalorder %v4643_v25, 4  ;;  %p4430_p5 = pneg %p4429_p3 }
  0x3d   : > { %v214_v41 = vshrl.u32 %v4488_v31, %v211_v28  ;;  %v217_v42 = vshrl.u32 %v4489_v33, %v211_v28  ;;  %v220_v43 = vshrl.u32 %v6337_v35, %v211_v28  ;;  %v223_v45 = vshrl.u32 %v4491_v37, %v211_v28 }
  0x3e   : > { %v226_v47 = vshrl.u32 %v6339_v46, %v211_v28  ;;  %v4666_v51 = vsub.s32 32, %v4645_v26  ;;  %v212_v52 = vshrl.u32 %v4487_v29, %v211_v28  ;;  %vm230_vm4 = vcmp.lt.s32.totalorder %v4643_v25, 3  ;;  %p4435_p9 = pnand %p4434_p7, %p4430_p5 }
  0x3f   : > { %v215_v48 = vor.u32 %v214_v41, %v213_v30  ;;  %v218_v49 = vor.u32 %v217_v42, %v216_v32  ;;  %v221_v50 = vor.u32 %v220_v43, %v219_v34  ;;  %v224_v53 = vor.u32 %v223_v45, %v222_v36 }
  0x40   : > { %v227_v54 = vor.u32 %v226_v47, %v225_v38  ;;  %vm229_vm5 = vcmp.lt.s32.totalorder %v4643_v25, 2  ;;  %v368_v60 = vshll.u32 %v4487_v29, %v4645_v26  ;;  %v371_v61 = vshll.u32 %v4488_v31, %v4645_v26 }
  0x41   : > { %v236_v55 = vsel %vm228_vm2, %v215_v48, %v218_v49  ;;  %v240_v56 = vsel %vm228_vm2, %v218_v49, %v221_v50  ;;  %v237_v58 = vsel %vm231_vm3, %v224_v53, 920167782  ;;  %v233_v62 = vsel %vm231_vm3, %v221_v50, 2102212464 }
  0x42   : > { %v241_v59 = vsel %vm231_vm3, %v227_v54, 1326507024  ;;  %v238_v63 = vsel %vm230_vm4, %v221_v50, %v237_v58  ;;  %v369_v7 = vshrl.u32 %v4488_v31, %v4666_v51  ;;  %v232_v8 = vsel %vm228_vm2, %v212_v52, %v215_v48 }
  0x43   : > { %v242_v5 = vsel %vm230_vm4, %v224_v53, %v241_v59  ;;  %v239_v9 = vsel %vm229_vm5, %v236_v55, %v238_v63  ;;  %v372_v11 = vshrl.u32 %v4489_v33, %v4666_v51  ;;  %v234_v16 = vsel %vm230_vm4, %v218_v49, %v233_v62 }
  0x44   : > { %v243_v10 = vsel %vm229_vm5, %v240_v56, %v242_v5  ;;  %v269_v14 = vand.u32 65535, %v239_v9  ;;  %v270_v15 = vshrl.u32 %v239_v9, 16  ;;  %v4703_v17 = vor.u32 %v369_v7, %v368_v60 }
  0x45   : > { %v247_v12 = vand.u32 65535, %v243_v10  ;;  %v248_v13 = vshrl.u32 %v243_v10, 16  ;;  %v4705_v18 = vor.u32 %v372_v11, %v371_v61  ;;  %v374_v19 = vshll.u32 %v4489_v33, %v4645_v26 }
  0x46   : > { %v375_v24 = vshrl.u32 %v6337_v35, %v4666_v51  ;;  %v271_v30 = vmul.u32 %v269_v14, %v245_v39  ;;  %v272_v32 = vmul.u32 %v270_v15, %v245_v39  ;;  %v273_v34 = vmul.u32 %v269_v14, %v246_v44 }
  0x47   : > { %v249_v20 = vmul.u32 %v247_v12, %v245_v39  ;;  %v250_v22 = vmul.u32 %v248_v13, %v245_v39  ;;  %v251_v23 = vmul.u32 %v247_v12, %v246_v44  ;;  %v252_v28 = vmul.u32 %v248_v13, %v246_v44 }
  0x48   : > { %v274_v42 = vmul.u32 %v270_v15, %v246_v44  ;;  %v275_v45 = vshll.u32 %v272_v32, 16  ;;  %v276_v47 = vshrl.u32 %v272_v32, 16  ;;  %v277_v48 = vshll.u32 %v273_v34, 16 }
  0x49   : > { %v253_v36 = vshll.u32 %v250_v22, 16  ;;  %v254_v38 = vshrl.u32 %v250_v22, 16  ;;  %v255_v41 = vshll.u32 %v251_v23, 16  ;;  %v256_v43 = vshrl.u32 %v251_v23, 16 }
  0x4a   : > { %v278_v50 = vshrl.u32 %v273_v34, 16  ;;  %v377_v52 = vshll.u32 %v6337_v35, %v4645_v26  ;;  %v4493_v53 = vmov 0   ;;  %vm279_vm7 = vc.u32 %v271_v30, %v275_v45 }
  0x4b   : > { %vm257_vm6 = vc.u32 %v249_v20, %v253_v36  ;;  %v259_v49 = vadd.s32 %v253_v36, %v249_v20  ;;  %v281_v39 = vadd.s32 %v275_v45, %v271_v30  ;;  %v378_v55 = vshrl.u32 %v4491_v37, %v4666_v51 }
  0x4c   : > { %v258_v54 = vsel %vm257_vm6, 1, %v4493_v53  ;;  %v280_v44 = vsel %vm279_vm7, 1, %v4493_v53  ;;  %v380_v58 = vshll.u32 %v4491_v37, %v4645_v26  ;;  %v376_v61 = vor.u32 %v375_v24, %v374_v19 }
  0x4d   : > { %v260_v56 = vadd.s32 %v258_v54, %v252_v28  ;;  %vm261_vm8 = vc.u32 %v259_v49, %v255_v41  ;;  %v282_v60 = vadd.s32 %v280_v44, %v274_v42  ;;  %vm283_vm9 = vc.u32 %v281_v39, %v277_v48 }
  0x4e   : > { %v262_v59 = vsel %vm261_vm8, 1, %v4493_v53  ;;  %v284_v63 = vsel %vm283_vm9, 1, %v4493_v53  ;;  %v379_v5 = vor.u32 %v378_v55, %v377_v52  ;;  %v381_v7 = vshrl.u32 %v6339_v46, %v4666_v51 }
  0x4f   : > { %v264_v62 = vadd.s32 %v262_v59, %v260_v56  ;;  %v4723_v9 = vadd.s32 %v281_v39, %v277_v48  ;;  %v286_v10 = vadd.s32 %v284_v63, %v282_v60  ;;  %vm383_vm10 = vcmp.lt.s32.totalorder %v4675_v57, 1 }
  0x50   : > { %vm385_vm11 = vcmp.lt.s32.totalorder %v4675_v57, 3  ;;  %v382_v11 = vor.u32 %v381_v7, %v380_v58  ;;  %vm384_vm12 = vcmp.lt.s32.totalorder %v4675_v57, 2  ;;  %vm386_vm13 = vcmp.lt.s32.totalorder %v4675_v57, 4 }
  0x51   : > { %v265_v26 = vadd.s32 %v264_v62, %v254_v38  ;;  %v235_v12 = vsel %vm229_vm5, %v232_v8, %v234_v16  ;;  %v287_v13 = vadd.s32 %v286_v10, %v276_v47  ;;  %v391_v14 = vsel %vm383_vm10, %v4703_v17, %v4705_v18 }
  0x52   : > { %v392_v15 = vsel %vm386_vm13, %v379_v5, 920167782  ;;  %v395_v22 = vsel %vm383_vm10, %v4705_v18, %v376_v61  ;;  %v400_v25 = vand.u32 65535, %v4647_v27  ;;  %v396_v23 = vsel %vm386_vm13, %v382_v11, 1326507024 }
  0x53   : > { %v4737_v19 = vadd.s32 %v265_v26, %v256_v43  ;;  %v393_v20 = vsel %vm385_vm11, %v376_v61, %v392_v15  ;;  %v288_v8 = vadd.s32 %v287_v13, %v278_v50  ;;  %v401_v24 = vshrl.u32 %v4647_v27, 16 }
  0x54   : > { %v394_v16 = vsel %vm384_vm12, %v391_v14, %v393_v20  ;;  %v289_v28 = vmul.u32 %v4641_v21, %v235_v12  ;;  %v397_v30 = vsel %vm385_vm11, %v379_v5, %v396_v23  ;;  %v367_v41 = vshrl.u32 %v4487_v29, %v4666_v51 }
  0x55   : > { %vm291_vm14 = vc.u32 %v4737_v19, %v4723_v9  ;;  %v424_v32 = vand.u32 65535, %v394_v16  ;;  %v292_v34 = vadd.s32 1, %v288_v8  ;;  %v398_v36 = vsel %vm384_vm12, %v395_v22, %v397_v30 }
  0x56   : > { %v425_v38 = vshrl.u32 %v394_v16, 16  ;;  %v402_v42 = vand.u32 65535, %v398_v36  ;;  %v403_v43 = vshrl.u32 %v398_v36, 16  ;;  %v388_v45 = vsel %vm386_vm13, %v376_v61, 2102212464 }
  0x57   : > { %v293_v21 = vsel %vm291_vm14, %v292_v34, %v288_v8  ;;  %v428_v48 = vmul.u32 %v424_v32, %v401_v24  ;;  %v426_v54 = vmul.u32 %v424_v32, %v400_v25  ;;  %v506_v56 = vand.u32 2147483647, %v4630_v3 }
  0x58   : > { %v427_v47 = vmul.u32 %v425_v38, %v400_v25  ;;  %v294_v49 = vadd.s32 %v293_v21, %v289_v28  ;;  %v404_v50 = vmul.u32 %v402_v42, %v400_v25  ;;  %v405_v52 = vmul.u32 %v403_v43, %v400_v25 }
  0x59   : > { %v406_v39 = vmul.u32 %v402_v42, %v401_v24  ;;  %v518_v51 = vsel %vm517_vm15, %v4655_v40, 0  ;;  %v387_v58 = vsel %vm383_vm10, %v367_v41, %v4703_v17  ;;  %v407_v59 = vmul.u32 %v403_v43, %v401_v24 }
  0x5a   : > { %v430_v55 = vshll.u32 %v427_v47, 16  ;;  %v295_v44 = vadd.s32 536870912, %v294_v49  ;;  %v408_v60 = vshll.u32 %v405_v52, 16  ;;  %v389_v61 = vsel %vm385_vm11, %v4705_v18, %v388_v45 }
  0x5b   : > { %v410_v62 = vshll.u32 %v406_v39, 16  ;;  %v429_v63 = vmul.u32 %v425_v38, %v401_v24  ;;  %v432_v5 = vshll.u32 %v428_v48, 16  ;;  %v409_v40 = vshrl.u32 %v405_v52, 16 }
  0x5c   : > { %v4770_v7 = vshrl.u32 %v295_v44, 30  ;;  %vm412_vm0 = vc.u32 %v404_v50, %v408_v60  ;;  %v414_v10 = vadd.s32 %v408_v60, %v404_v50  ;;  %vm434_vm1 = vc.u32 %v426_v54, %v430_v55 }
  0x5d   : > { %v413_v26 = vsel %vm412_vm0, 1, %v4493_v53  ;;  %v435_v11 = vsel %vm434_vm1, 1, %v4493_v53  ;;  %v436_v17 = vadd.s32 %v430_v55, %v426_v54  ;;  %v520_v14 = vand.u32 31, %v518_v51 }
  0x5e   : > { %v297_v12 = vshll.u32 %v4770_v7, 30  ;;  %v415_v13 = vadd.s32 %v413_v26, %v407_v59  ;;  %vm416_vm2 = vc.u32 %v414_v10, %v410_v62  ;;  %v431_v15 = vshrl.u32 %v427_v47, 16 }
  0x5f   : > { %v417_v18 = vsel %vm416_vm2, 1, %v4493_v53  ;;  %v437_v20 = vadd.s32 %v435_v11, %v429_v63  ;;  %vm438_vm3 = vc.u32 %v436_v17, %v432_v5  ;;  %v411_v25 = vshrl.u32 %v406_v39, 16 }
  0x60   : > { %v298_v22 = vsub.s32 %v294_v49, %v297_v12  ;;  %v419_v8 = vadd.s32 %v417_v18, %v415_v13  ;;  %v439_v16 = vsel %vm438_vm3, 1, %v4493_v53  ;;  %v390_v23 = vsel %vm384_vm12, %v387_v58, %v389_v61 }
  0x61   : > { %v433_v24 = vshrl.u32 %v428_v48, 16  ;;  %v4779_v28 = vadd.s32 %v436_v17, %v432_v5  ;;  %v441_v30 = vadd.s32 %v439_v16, %v437_v20  ;;  %v521_v36 = vsub.s32 32, %v520_v14 }
  0x62   : > { %vm299_vm4 = vcmp.lt.s32.totalorder %v298_v22, 0  ;;  %v300_v32 = vsub.s32 0, %v298_v22  ;;  %v420_v34 = vadd.s32 %v419_v8, %v409_v40  ;;  %v513_v43 = vand.u32 8388607, %v506_v56 }
  0x63   : > { %v442_v38 = vadd.s32 %v441_v30, %v431_v15  ;;  %vm198_vm5 = vcmp.lt.s32.totalorder %v4624_v1, 0  ;;  %v290_v57 = vadd.s32 %v4723_v9, %v4737_v19  ;;  %v444_v47 = vmul.u32 %v4647_v27, %v390_v23 }
  0x64   : > { %v301_v41 = vsel %vm299_vm4, %v300_v32, %v298_v22  ;;  %v4781_v42 = vadd.s32 %v420_v34, %v411_v25  ;;  %v4791_v48 = vshrl.u32 %v518_v51, 5  ;;  %v523_v49 = vshll.u32 %v4487_v29, %v520_v14 }
  0x65   : > { %v302_v21 = vclz %v301_v41  ;;  %v443_v45 = vadd.s32 %v442_v38, %v433_v24  ;;  %v524_v50 = vshrl.u32 %v4488_v31, %v521_v36  ;;  %v532_v39 = vshll.u32 %v6337_v35, %v520_v14 }
  0x66   : > { %vm446_vm6 = vc.u32 %v4781_v42, %v4779_v28  ;;  %v533_v55 = vshrl.u32 %v4491_v37, %v521_v36  ;;  %v526_v9 = vshll.u32 %v4488_v31, %v520_v14  ;;  %v527_v19 = vshrl.u32 %v4489_v33, %v521_v36 }
  0x67   : > { %v4087_v52 = vadd.s32 4294967294, %v302_v21  ;;  %v447_v54 = vadd.s32 1, %v443_v45  ;;  %v529_v27 = vshll.u32 %v4489_v33, %v520_v14  ;;  %v530_v44 = vshrl.u32 %v6337_v35, %v521_v36 }
  0x68   : > { %v535_v58 = vshll.u32 %v4491_v37, %v520_v14  ;;  %v536_v59 = vshrl.u32 %v6339_v46, %v521_v36  ;;  %v320_v61 = vsub.s32 4, %v4770_v7  ;;  %v525_v63 = vor.u32 %v524_v50, %v523_v49 }
  0x69   : > { %vm4088_vm7 = vcmp.lt.s32.totalorder %v4087_v52, 0  ;;  %v448_v51 = vsel %vm446_vm6, %v447_v54, %v443_v45  ;;  %v534_v26 = vor.u32 %v533_v55, %v532_v39  ;;  %v528_v17 = vor.u32 %v527_v19, %v526_v9 }
  0x6a   : > { %v305_v60 = vsel %vm4088_vm7, 0, %v4087_v52  ;;  %v449_v62 = vadd.s32 %v448_v51, %v444_v47  ;;  %v531_v12 = vor.u32 %v530_v44, %v529_v27  ;;  %vm538_vm8 = vcmp.lt.s32.totalorder %v4791_v48, 1 }
  0x6b   : > { %v306_v5 = vsub.s32 32, %v305_v60  ;;  %v307_v10 = vshll.u32 %v298_v22, %v305_v60  ;;  %v310_v40 = vsub.s32 4294967266, %v305_v60  ;;  %v537_v15 = vor.u32 %v536_v59, %v535_v58 }
  0x6c   : > { %v450_v11 = vadd.s32 536870912, %v449_v62  ;;  %vm541_vm9 = vcmp.lt.s32.totalorder %v4791_v48, 4  ;;  %vm4808_vm10 = vcmp.le.f32.partialorder %v196_v4, 0.7853982  ;;  %v321_v20 = vsel %vm198_vm5, %v320_v61, %v4770_v7 }
  0x6d   : > { %v308_v13 = vshrl.u32 %v290_v57, %v306_v5  ;;  %v311_v18 = vadd.s32 127, %v310_v40  ;;  %v514_v25 = vor.u32 8388608, %v513_v43  ;;  %vm540_vm11 = vcmp.lt.s32.totalorder %v4791_v48, 3 }
  0x6e   : > { %v4815_v22 = vshrl.u32 %v450_v11, 30  ;;  %v547_v23 = vsel %vm541_vm9, %v534_v26, 920167782  ;;  %v522_v4 = vshrl.u32 %v4487_v29, %v521_v36  ;;  %vm539_vm12 = vcmp.lt.s32.totalorder %v4791_v48, 2 }
  0x6f   : > { %v309_v8 = vor.u32 %v308_v13, %v307_v10  ;;  %v312_v16 = vshll.u32 %v311_v18, 23  ;;  %v550_v30 = vsel %vm538_vm8, %v528_v17, %v531_v12  ;;  %v546_v34 = vsel %vm538_vm8, %v525_v63, %v528_v17  ;;  %v4876_v18 = vld [vmem:[%s4609_s6 + $0x18] sm:$0xff] }
  0x70   : > { %v452_v24 = vshll.u32 %v4815_v22, 30  ;;  %v551_v38 = vsel %vm541_vm9, %v537_v15, 1326507024  ;;  %v548_v43 = vsel %vm540_vm11, %v531_v12, %v547_v23  ;;  %v4835_v57 = vshll.u32 %v514_v25, 8 }
  0x71   : > { %v313_v7 = vor.u32 4788187, %v312_v16  ;;  %v316_v32 = vcvt.s32.f32 %v309_v8  ;;  %v552_v36 = vsel %vm540_vm11, %v534_v26, %v551_v38  ;;  %v4839_v45 = vsel %vm4808_vm10, 0, %v321_v20 }
  0x72   : > { %v4829_v41 = vsub.s32 %v449_v62, %v452_v24  ;;  %v543_v47 = vsel %vm541_vm9, %v531_v12, 2102212464  ;;  %v553_v49 = vsel %vm539_vm12, %v550_v30, %v552_v36  ;;  %v555_v52 = vand.u32 65535, %v4835_v57 }
  0x73   : > { %v314_v21 = vand.u32 2147483647, %v313_v7  ;;  %v556_v54 = vshrl.u32 %v4835_v57, 16  ;;  %v549_v55 = vsel %vm539_vm12, %v546_v34, %v548_v43  ;;  %v557_v9 = vand.u32 65535, %v553_v49 }
  0x74   : > { %vm454_vm13 = vcmp.lt.s32.totalorder %v4829_v41, 0  ;;  %v455_v50 = vsub.s32 0, %v4829_v41  ;;  %v558_v19 = vshrl.u32 %v553_v49, 16  ;;  %v542_v44 = vsel %vm538_vm8, %v522_v4, %v525_v63 }
  0x75   : > { %v317_v39 = vmul.f32 %v316_v32, %v314_v21  ;;  %v544_v51 = vsel %vm540_vm11, %v528_v17, %v543_v47  ;;  %v559_v60 = vmul.u32 %v557_v9, %v555_v52  ;;  %v4857_v62 = vand.u32 3, %v4839_v45 }
  0x76   : > { %v456_v27 = vsel %vm454_vm13, %v455_v50, %v4829_v41  ;;  %v560_v61 = vmul.u32 %v558_v19, %v555_v52  ;;  %v445_v5 = vadd.s32 %v4779_v28, %v4781_v42  ;;  %v4861_v10 = vmul.u32 %v557_v9, %v556_v54 }
  0x77   : > { %v318_v58 = vxor.u32 2147483648, %v317_v39  ;;  %v457_v59 = vclz %v456_v27  ;;  %v580_v40 = vshrl.u32 %v549_v55, 16  ;;  %v4867_v11 = vsel %vm539_vm12, %v542_v44, %v544_v51 }
  0x78   : > { %v563_v17 = vshll.u32 %v560_v61, 16  ;;  %v562_v13 = vmul.u32 %v558_v19, %v556_v54  ;;  %v565_v28 = vshll.u32 %v4861_v10, 16  ;;  %v579_v42 = vand.u32 65535, %v549_v55 }
  0x79   : > { %v319_v63 = vsel %vm198_vm5, %v318_v58, %v317_v39  ;;  %v4090_v26 = vadd.s32 4294967294, %v457_v59  ;;  %v661_v48 = vand.u32 2147483647, %v4876_v18  ;;  %v582_v14 = vmul.u32 %v580_v40, %v555_v52 }
  0x7a   : > { %v4872_v12 = vsel %vm4808_vm10, %v4624_v1, %v319_v63  ;;  %vm567_vm15 = vc.u32 %v559_v60, %v563_v17  ;;  %v569_v8 = vadd.s32 %v563_v17, %v559_v60  ;;  %vm353_vm0 = vcmp.lt.s32.totalorder %v4627_v2, 0 }
  0x7b   : > { %v324_v15 = vmul.f32 %v4872_v12, %v4872_v12  ;;  %vm4091_vm14 = vcmp.lt.s32.totalorder %v4090_v26, 0  ;;  %v568_v25 = vsel %vm567_vm15, 1, %v4493_v53  ;;  %v583_v32 = vmul.u32 %v579_v42, %v556_v54 }
  0x7c   : > { %v460_v20 = vsel %vm4091_vm14, 0, %v4090_v26  ;;  %v570_v7 = vadd.s32 %v568_v25, %v562_v13  ;;  %vm571_vm1 = vc.u32 %v569_v8, %v565_v28  ;;  %vm1585_vm2 = vcmp.eq.s32.totalorder %v4857_v62, 2 }
  0x7d   : > { %v325_v16 = vmul.f32 -0.001358992, %v324_v15  ;;  %v332_v23 = vmul.f32 -0.00019511016, %v324_v15  ;;  %v461_v24 = vsub.s32 32, %v460_v20  ;;  %v462_v4 = vshll.u32 %v4829_v41, %v460_v20 }
  0x7e   : > { %v465_v30 = vsub.s32 4294967266, %v460_v20  ;;  %v572_v36 = vsel %vm571_vm1, 1, %v4493_v53  ;;  %v564_v47 = vshrl.u32 %v560_v61, 16  ;;  %v581_v49 = vmul.u32 %v579_v42, %v555_v52 }
  0x7f   : > { %v326_v34 = vadd.f32 0.041655596, %v325_v16  ;;  %v333_v38 = vadd.f32 0.008332121, %v332_v23  ;;  %v463_v43 = vshrl.u32 %v445_v5, %v461_v24  ;;  %v585_v50 = vshll.u32 %v582_v14, 16 }
  0x80   : > { %v466_v21 = vadd.s32 127, %v465_v30  ;;  %v584_v9 = vmul.u32 %v580_v40, %v556_v54  ;;  %vm4888_vm3 = vcmp.le.f32.partialorder %v351_v6, 0.7853982  ;;  %v475_v44 = vsub.s32 4, %v4815_v22 }
  0x81   : > { %v327_v39 = vmul.f32 %v326_v34, %v324_v15  ;;  %v334_v55 = vmul.f32 %v333_v38, %v324_v15  ;;  %v464_v41 = vor.u32 %v463_v43, %v462_v4  ;;  %v574_v51 = vadd.s32 %v572_v36, %v570_v7 }
  0x82   : > { %v467_v27 = vshll.u32 %v466_v21, 23  ;;  %v587_v58 = vshll.u32 %v583_v32, 16  ;;  %v566_v52 = vshrl.u32 %v4861_v10, 16  ;;  %vm339_vm4 = vweird.f32 %v4624_v1 }
  0x83   : > { %v328_v59 = vadd.f32 -0.4999988, %v327_v39  ;;  %v335_v60 = vadd.f32 -0.16666654, %v334_v55  ;;  %v471_v61 = vcvt.s32.f32 %v464_v41  ;;  %v575_v54 = vadd.s32 %v574_v51, %v564_v47 }
  0x84   : > { %v468_v5 = vor.u32 4788187, %v467_v27  ;;  %vm589_vm5 = vc.u32 %v581_v49, %v585_v50  ;;  %v591_v40 = vadd.s32 %v585_v50, %v581_v49  ;;  %v664_v17 = vand.u32 2139095040, %v4876_v18 }
  0x85   : > { %v329_v6 = vmul.f32 %v328_v59, %v324_v15  ;;  %v336_v63 = vmul.f32 %v335_v60, %v324_v15  ;;  %v590_v26 = vsel %vm589_vm5, 1, %v4493_v53  ;;  %v586_v28 = vshrl.u32 %v582_v14, 16 }
  0x86   : > { %v469_v13 = vand.u32 2147483647, %v468_v5  ;;  %v592_v42 = vadd.s32 %v590_v26, %v584_v9  ;;  %vm593_vm6 = vc.u32 %v591_v40, %v587_v58  ;;  %v476_v10 = vsel %vm353_vm0, %v475_v44, %v4815_v22 }
  0x87   : > { %v4897_v20 = vadd.f32 1.0, %v329_v6  ;;  %v337_v25 = vadd.f32 1.0, %v336_v63  ;;  %v594_v8 = vsel %vm593_vm6, 1, %v4493_v53  ;;  %v588_v23 = vshrl.u32 %v583_v32, 16 }
  0x88   : > { %v472_v16 = vmul.f32 %v471_v61, %v469_v13  ;;  %v596_v15 = vadd.s32 %v594_v8, %v592_v42  ;;  %v665_v24 = vshrl.u32 %v664_v17, 23  ;;  %v4907_v30 = vadd.s32 %v575_v54, %v566_v52 }
  0x89   : > { %v4904_v4 = vmul.f32 %v337_v25, %v4872_v12  ;;  %v347_v14 = vxor.u32 2147483648, %v4897_v20  ;;  %v4909_v7 = vadd.s32 %v591_v40, %v587_v58  ;;  %vm1582_vm7 = vcmp.eq.s32.totalorder %v4857_v62, 0 }
  0x8a   : > { %v473_v34 = vxor.u32 2147483648, %v472_v16  ;;  %v597_v38 = vadd.s32 %v596_v15, %v586_v28  ;;  %v4095_v22 = vadd.s32 4294967169, %v665_v24  ;;  %vm1581_vm8 = vcmp.lt.s32.totalorder %v4857_v62, 2 }
  0x8b   : > { %v344_v43 = vxor.u32 2147483648, %v4904_v4  ;;  %v1587_v12 = vsel %vm1585_vm2, %v347_v14, %v4904_v4  ;;  %v599_v32 = vmul.u32 %v4835_v57, %v4867_v11  ;;  %v4925_v21 = vsel %vm4888_vm3, 0, %v476_v10 }
  0x8c   : > { %v474_v36 = vsel %vm353_vm0, %v473_v34, %v472_v16  ;;  %v598_v47 = vadd.s32 %v597_v38, %v588_v23  ;;  %v671_v49 = vadd.s32 1, %v4095_v22  ;;  %vm601_vm9 = vc.u32 %v4907_v30, %v4909_v7 }
  0x8d   : > { %v1584_v50 = vsel %vm1582_vm7, %v4897_v20, %v344_v43  ;;  %v477_v62 = vsel %vm4888_vm3, %v4627_v2, %v474_v36  ;;  %v668_v57 = vand.u32 8388607, %v661_v48  ;;  %v4943_v58 = vand.u32 3, %v4925_v21 }
  0x8e   : > { %v1588_v11 = vsel %vm1581_vm8, %v1584_v50, %v1587_v12  ;;  %v479_v39 = vmul.f32 %v477_v62, %v477_v62  ;;  %v602_v55 = vadd.s32 1, %v598_v47  ;;  %vm672_vm10 = vcmp.gt.s32.totalorder %v671_v49, 0 }
  0x8f   : > { %v4939_v41 = vsel %vm339_vm4, nan, %v1588_v11  ;;  %v673_v9 = vsel %vm672_vm10, %v671_v49, 0  ;;  %v669_v60 = vor.u32 8388608, %v668_v57  ;;  %vm1736_vm11 = vcmp.eq.s32.totalorder %v4943_v58, 0 }
  0x90   : > { %v2700_v27 = vmul.f32 2.0, %v4939_v41  ;;  %v480_v44 = vmul.f32 -0.001358992, %v479_v39  ;;  %v487_v19 = vmul.f32 -0.00019511016, %v479_v39  ;;  %v603_v51 = vsel %vm601_vm9, %v602_v55, %v598_v47 }
  0x91   : > { %v604_v59 = vadd.s32 %v603_v51, %v599_v32  ;;  %v675_v61 = vand.u32 31, %v673_v9  ;;  %vm1739_vm12 = vcmp.eq.s32.totalorder %v4943_v58, 2  ;;  %v4954_v28 = vshll.u32 %v669_v60, 8 }
  0x92   : > { %v2708_v52 = vmul.f32 %v2700_v27, %v4939_v41  ;;  %v481_v5 = vadd.f32 0.041655596, %v480_v44  ;;  %v488_v54 = vadd.f32 0.008332121, %v487_v19  ;;  %vm1735_vm13 = vcmp.lt.s32.totalorder %v4943_v58, 2 }
  0x93   : > { %v605_v40 = vadd.s32 536870912, %v604_v59  ;;  %v4946_v6 = vsub.s32 32, %v675_v61  ;;  %v678_v8 = vshll.u32 %v4487_v29, %v675_v61  ;;  %vm494_vm14 = vweird.f32 %v4627_v2 }
  0x94   : > { %v4948_v63 = vadd.f32 -1.0, %v2708_v52  ;;  %v482_v26 = vmul.f32 %v481_v5, %v479_v39  ;;  %v489_v17 = vmul.f32 %v488_v54, %v479_v39  ;;  %v681_v15 = vshll.u32 %v4488_v31, %v675_v61 }
  0x95   : > { %v4952_v13 = vshrl.u32 %v605_v40, 30  ;;  %v679_v23 = vshrl.u32 %v4488_v31, %v4946_v6  ;;  %v682_v24 = vshrl.u32 %v4489_v33, %v4946_v6  ;;  %v4967_v12 = vshrl.u32 %v673_v9, 5 }
  0x96   : > { %v2756_v42 = vmul.f32 2.0, %v4948_v63  ;;  %v483_v25 = vadd.f32 -0.4999988, %v482_v26  ;;  %v490_v10 = vadd.f32 -0.16666654, %v489_v17  ;;  %v684_v36 = vshll.u32 %v4489_v33, %v675_v61 }
  0x97   : > { %v607_v16 = vshll.u32 %v4952_v13, 30  ;;  %v687_v47 = vshll.u32 %v6337_v35, %v675_v61  ;;  %v688_v49 = vshrl.u32 %v4491_v37, %v4946_v6  ;;  %v685_v55 = vshrl.u32 %v6337_v35, %v4946_v6 }
  0x98   : > { %v2764_v34 = vmul.f32 %v4948_v63, %v2756_v42  ;;  %v484_v38 = vmul.f32 %v483_v25, %v479_v39  ;;  %v491_v22 = vmul.f32 %v490_v10, %v479_v39  ;;  %v680_v9 = vor.u32 %v679_v23, %v678_v8 }
  0x99   : > { %v4969_v32 = vsub.s32 %v604_v59, %v607_v16  ;;  %v4983_v27 = vor.u32 %v682_v24, %v681_v15  ;;  %vm508_vm0 = vcmp.lt.s32.totalorder %v4630_v3, 0  ;;  %v689_v59 = vor.u32 %v688_v49, %v687_v47 }
  0x9a   : > { %v4975_v50 = vadd.f32 -1.0, %v2764_v34  ;;  %v4977_v57 = vadd.f32 1.0, %v484_v38  ;;  %v492_v11 = vadd.f32 1.0, %v491_v22  ;;  %v690_v52 = vshll.u32 %v4491_v37, %v675_v61 }
  0x9b   : > { %vm609_vm15 = vcmp.lt.s32.totalorder %v4969_v32, 0  ;;  %v610_v39 = vsub.s32 0, %v4969_v32  ;;  %v691_v5 = vshrl.u32 %v6339_v46, %v4946_v6  ;;  %vm693_vm1 = vcmp.lt.s32.totalorder %v4967_v12, 1 }
  0x9c   : > { %v2812_v44 = vmul.f32 2.0, %v4975_v50  ;;  %v4986_v19 = vmul.f32 %v492_v11, %v477_v62  ;;  %v502_v51 = vxor.u32 2147483648, %v4977_v57  ;;  %v600_v17 = vadd.s32 %v4909_v7, %v4907_v30 }
  0x9d   : > { %v611_v60 = vsel %vm609_vm15, %v610_v39, %v4969_v32  ;;  %v630_v61 = vsub.s32 4, %v4952_v13  ;;  %v686_v42 = vor.u32 %v685_v55, %v684_v36  ;;  %vm696_vm2 = vcmp.lt.s32.totalorder %v4967_v12, 4 }
  0x9e   : > { %v2820_v54 = vmul.f32 %v4975_v50, %v2812_v44  ;;  %v499_v40 = vxor.u32 2147483648, %v4986_v19  ;;  %v1741_v62 = vsel %vm1739_vm12, %v502_v51, %v4986_v19  ;;  %v612_v26 = vclz %v611_v60 }
  0x9f   : > { %vm695_vm3 = vcmp.lt.s32.totalorder %v4967_v12, 3  ;;  %vm694_vm5 = vcmp.lt.s32.totalorder %v4967_v12, 2  ;;  %v701_v30 = vsel %vm693_vm1, %v680_v9, %v4983_v27  ;;  %v702_v7 = vsel %vm696_vm2, %v689_v59, 920167782 }
  0xa0   : > { %v4150_v25 = vadd.f32 -1.0, %v2820_v54  ;;  %v1738_v10 = vsel %vm1736_vm11, %v4977_v57, %v499_v40  ;;  %v4093_v8 = vadd.s32 4294967294, %v612_v26  ;;  %v692_v15 = vor.u32 %v691_v5, %v690_v52 }
  0xa1   : > { %v1742_v16 = vsel %vm1735_vm13, %v1738_v10, %v1741_v62  ;;  %v710_v24 = vand.u32 65535, %v4954_v28  ;;  %v677_v38 = vshrl.u32 %v4487_v29, %v4946_v6  ;;  %v703_v22 = vsel %vm695_vm3, %v686_v42, %v702_v7 }
  0xa2   : > { %2964 = vmatpush.msra.mxu0 %v4150_v25  ;;  %v5022_v23 = vsel %vm494_vm14, nan, %v1742_v16  ;;  %vm4094_vm6 = vcmp.lt.s32.totalorder %v4093_v8, 0  ;;  %v704_v11 = vsel %vm694_vm5, %v701_v30, %v703_v22  ;;  %v5037_v39 = vsel %vm508_vm0, %v630_v61, %v4952_v13  ;;  %v5102_v61 = vld [vmem:[%s4609_s6 + $0x28] sm:$0xff] }
  0xa3   : > { %v2701_v58 = vmul.f32 2.0, %v5022_v23  ;;  %v615_v34 = vsel %vm4094_vm6, 0, %v4093_v8  ;;  %v705_v6 = vsel %vm693_vm1, %v4983_v27, %v686_v42  ;;  %v711_v44 = vshrl.u32 %v4954_v28, 16 }
  0xa4   : > { %v616_v36 = vsub.s32 32, %v615_v34  ;;  %v617_v47 = vshll.u32 %v4969_v32, %v615_v34  ;;  %v620_v49 = vsub.s32 4294967266, %v615_v34  ;;  %v706_v32 = vsel %vm696_vm2, %v692_v15, 1326507024 }
  0xa5   : > { %v2709_v55 = vmul.f32 %v2701_v58, %v5022_v23  ;;  %v734_v5 = vand.u32 65535, %v704_v11  ;;  %v697_v62 = vsel %vm693_vm1, %v677_v38, %v680_v9  ;;  %v707_v13 = vsel %vm695_vm3, %v689_v59, %v706_v32 }
  0xa6   : > { %v618_v60 = vshrl.u32 %v600_v17, %v616_v36  ;;  %v621_v52 = vadd.s32 127, %v620_v49  ;;  %v735_v26 = vshrl.u32 %v704_v11, 16  ;;  %vm5053_vm7 = vcmp.le.f32.partialorder %v506_v56, 0.7853982 }
  0xa7   : > { %v5045_v54 = vadd.f32 -1.0, %v2709_v55  ;;  %v698_v10 = vsel %vm696_vm2, %v686_v42, 2102212464  ;;  %v708_v8 = vsel %vm694_vm5, %v705_v6, %v707_v13  ;;  %v736_v58 = vmul.u32 %v734_v5, %v710_v24 }
  0xa8   : > { %v619_v17 = vor.u32 %v618_v60, %v617_v47  ;;  %v622_v25 = vshll.u32 %v621_v52, 23  ;;  %v712_v16 = vand.u32 65535, %v708_v8  ;;  %v713_v30 = vshrl.u32 %v708_v8, 16 }
  0xa9   : > { %v2757_v9 = vmul.f32 2.0, %v5045_v54  ;;  %v737_v59 = vmul.u32 %v735_v26, %v710_v24  ;;  %v738_v56 = vmul.u32 %v734_v5, %v711_v44  ;;  %v699_v42 = vsel %vm695_vm3, %v4983_v27, %v698_v10 }
  0xaa   : > { %v623_v7 = vor.u32 4788187, %v622_v25  ;;  %v626_v15 = vcvt.s32.f32 %v619_v17  ;;  %v714_v38 = vmul.u32 %v712_v16, %v710_v24  ;;  %v715_v22 = vmul.u32 %v713_v30, %v710_v24 }
  0xab   : > { %v2765_v34 = vmul.f32 %v5045_v54, %v2757_v9  ;;  %v716_v36 = vmul.u32 %v712_v16, %v711_v44  ;;  %v739_v49 = vmul.u32 %v735_v26, %v711_v44  ;;  %v740_v11 = vshll.u32 %v737_v59, 16 }
  0xac   : > { %v624_v47 = vand.u32 2147483647, %v623_v7  ;;  %v717_v6 = vmul.u32 %v713_v30, %v711_v44  ;;  %v718_v60 = vshll.u32 %v715_v22, 16  ;;  %v719_v5 = vshrl.u32 %v715_v22, 16  ;;  %v5073_v30 = vld [vmem:[%s4609_s6 + $0x20] sm:$0xff] }
  0xad   : > { %v5066_v55 = vadd.f32 -1.0, %v2765_v34  ;;  %v720_v52 = vshll.u32 %v716_v36, 16  ;;  %v741_v13 = vshrl.u32 %v737_v59, 16  ;;  %v742_v17 = vshll.u32 %v738_v56, 16 }
  0xae   : > { %v627_v32 = vmul.f32 %v626_v15, %v624_v47  ;;  %vm722_vm8 = vc.u32 %v714_v38, %v718_v60  ;;  %v724_v25 = vadd.s32 %v718_v60, %v714_v38  ;;  %vm744_vm9 = vc.u32 %v736_v58, %v740_v11  ;;  %v5079_v38 = vld [vmem:[%s4609_s6 + $0x10] sm:$0xff] }
  0xaf   : > { %v2813_v24 = vmul.f32 2.0, %v5066_v55  ;;  %v723_v27 = vsel %vm722_vm8, 1, %v4493_v53  ;;  %v745_v26 = vsel %vm744_vm9, 1, %v4493_v53  ;;  %v746_v10 = vadd.s32 %v740_v11, %v736_v58 }
  0xb0   : > { %v628_v8 = vxor.u32 2147483648, %v627_v32  ;;  %v725_v9 = vadd.s32 %v723_v27, %v717_v6  ;;  %vm726_vm10 = vc.u32 %v724_v25, %v720_v52  ;;  %v747_v16 = vadd.s32 %v745_v26, %v739_v49 }
  0xb1   : > { %v2821_v44 = vmul.f32 %v5066_v55, %v2813_v24  ;;  %v721_v7 = vshrl.u32 %v716_v36, 16  ;;  %v727_v15 = vsel %vm726_vm10, 1, %v4493_v53  ;;  %vm748_vm11 = vc.u32 %v746_v10, %v742_v17 }
  0xb2   : > { %v629_v59 = vsel %vm508_vm0, %v628_v8, %v627_v32  ;;  %v729_v22 = vadd.s32 %v727_v15, %v725_v9  ;;  %v749_v47 = vsel %vm748_vm11, 1, %v4493_v53  ;;  %v743_v11 = vshrl.u32 %v738_v56, 16 }
  0xb3   : > { %v4151_v34 = vadd.f32 -1.0, %v2821_v44  ;;  %v632_v58 = vsel %vm5053_vm7, %v5079_v38, %v629_v59  ;;  %v751_v6 = vadd.s32 %v749_v47, %v747_v16  ;;  %v819_v3 = vand.u32 2139095040, %v5073_v30 }
  0xb4   : > { %v634_v49 = vmul.f32 %v632_v58, %v632_v58  ;;  %v700_v36 = vsel %vm694_vm5, %v697_v62, %v699_v42  ;;  %v730_v60 = vadd.s32 %v729_v22, %v719_v5  ;;  %v5088_v52 = vadd.s32 %v746_v10, %v742_v17 }
  0xb5   : > { %2993 = vmatpush.msra.mxu1 %v4151_v34  ;;  %v752_v25 = vadd.s32 %v751_v6, %v741_v13  ;;  %v820_v8 = vshrl.u32 %v819_v3, 23  ;;  %v5093_v27 = vsel %vm5053_vm7, 0, %v5037_v39  ;;  %v754_v62 = vmul.u32 %v4954_v28, %v700_v36 }
  0xb6   : > { %v635_v32 = vmul.f32 -0.001358992, %v634_v49  ;;  %v642_v24 = vmul.f32 -0.00019511016, %v634_v49  ;;  %v5095_v56 = vadd.s32 %v730_v60, %v721_v7  ;;  %v6334_v42 = vand.u32 2147483647, %v5073_v30 }
  0xb7   : > { %v753_v9 = vadd.s32 %v752_v25, %v743_v11  ;;  %v4098_v12 = vadd.s32 4294967169, %v820_v8  ;;  %v1888_v39 = vand.u32 3, %v5093_v27  ;;  %v974_v22 = vand.u32 2139095040, %v5102_v61 }
  0xb8   : > { %v636_v26 = vadd.f32 0.041655596, %v635_v32  ;;  %v643_v44 = vadd.f32 0.008332121, %v642_v24  ;;  %vm756_vm12 = vc.u32 %v5095_v56, %v5088_v52  ;;  %v823_v28 = vand.u32 8388607, %v6334_v42 }
  0xb9   : > { %v757_v17 = vadd.s32 1, %v753_v9  ;;  %v826_v10 = vadd.s32 1, %v4098_v12  ;;  %vm649_vm15 = vweird.f32 %v5079_v38  ;;  %vm1889_vm0 = vcmp.lt.s32.totalorder %v1888_v39, 2 }
  0xba   : > { %v637_v5 = vmul.f32 %v636_v26, %v634_v49  ;;  %v644_v13 = vmul.f32 %v643_v44, %v634_v49  ;;  %vm1890_vm1 = vcmp.eq.s32.totalorder %v1888_v39, 0  ;;  %vm1893_vm2 = vcmp.eq.s32.totalorder %v1888_v39, 2 }
  0xbb   : > { %v758_v7 = vsel %vm756_vm12, %v757_v17, %v753_v9  ;;  %vm827_vm13 = vcmp.gt.s32.totalorder %v826_v10, 0  ;;  %v824_v25 = vor.u32 8388608, %v823_v28  ;;  %v5111_v8 = vshrl.u32 %v974_v22, 23 }
  0xbc   : > { %v638_v16 = vadd.f32 -0.4999988, %v637_v5  ;;  %v645_v59 = vadd.f32 -0.16666654, %v644_v13  ;;  %v759_v15 = vadd.s32 %v758_v7, %v754_v62  ;;  %v828_v34 = vsel %vm827_vm13, %v826_v10, 0 }
  0xbd   : > { %v830_v6 = vand.u32 31, %v828_v34  ;;  %v5118_v62 = vshrl.u32 %v828_v34, 5  ;;  %vm663_vm3 = vcmp.lt.s32.totalorder %v4876_v18, 0  ;;  %v5131_v34 = vshll.u32 %v824_v25, 8 }
  0xbe   : > { %v639_v47 = vmul.f32 %v638_v16, %v634_v49  ;;  %v646_v11 = vmul.f32 %v645_v59, %v634_v49  ;;  %v760_v3 = vadd.s32 536870912, %v759_v15  ;;  %vm5178_vm11 = vcmp.le.f32.partialorder %v661_v48, 0.7853982 }
  0xbf   : > { %v831_v32 = vsub.s32 32, %v830_v6  ;;  %v836_v49 = vshll.u32 %v4488_v31, %v830_v6  ;;  %v839_v9 = vshll.u32 %v4489_v33, %v830_v6  ;;  %v842_v10 = vshll.u32 %v6337_v35, %v830_v6 }
  0xc0   : > { %v5109_v36 = vadd.f32 1.0, %v639_v47  ;;  %v647_v60 = vadd.f32 1.0, %v646_v11  ;;  %v761_v24 = vshrl.u32 %v760_v3, 30  ;;  %v833_v7 = vshll.u32 %v4487_v29, %v830_v6 }
  0xc1   : > { %v837_v5 = vshrl.u32 %v4489_v33, %v831_v32  ;;  %v840_v13 = vshrl.u32 %v6337_v35, %v831_v32  ;;  %v843_v16 = vshrl.u32 %v4491_v37, %v831_v32  ;;  %v834_v28 = vshrl.u32 %v4488_v31, %v831_v32 }
  0xc2   : > { %v5113_v26 = vmul.f32 %v647_v60, %v632_v58  ;;  %v657_v44 = vxor.u32 2147483648, %v5109_v36  ;;  %v762_v12 = vshll.u32 %v761_v24, 30  ;;  %v845_v3 = vshll.u32 %v4491_v37, %v830_v6 }
  0xc3   : > { %v838_v47 = vor.u32 %v837_v5, %v836_v49  ;;  %v841_v11 = vor.u32 %v840_v13, %v839_v9  ;;  %v785_v25 = vsub.s32 4, %v761_v24  ;;  %v844_v0 = vor.u32 %v843_v16, %v842_v10 }
  0xc4   : > { %v654_v17 = vxor.u32 2147483648, %v5113_v26  ;;  %v1895_v58 = vsel %vm1893_vm2, %v657_v44, %v5113_v26  ;;  %v763_v59 = vsub.s32 %v759_v15, %v762_v12  ;;  %v846_v15 = vshrl.u32 %v6339_v46, %v831_v32 }
  0xc5   : > { %vm848_vm6 = vcmp.lt.s32.totalorder %v5118_v62, 1  ;;  %vm851_vm7 = vcmp.lt.s32.totalorder %v5118_v62, 4  ;;  %v832_v6 = vshrl.u32 %v4487_v29, %v831_v32  ;;  %v835_v5 = vor.u32 %v834_v28, %v833_v7 }
  0xc6   : > { %v1892_v22 = vsel %vm1890_vm1, %v5109_v36, %v654_v17  ;;  %vm764_vm5 = vcmp.lt.s32.totalorder %v763_v59, 0  ;;  %v765_v42 = vsub.s32 0, %v763_v59  ;;  %v847_v9 = vor.u32 %v846_v15, %v845_v3 }
  0xc7   : > { %v1896_v60 = vsel %vm1889_vm0, %v1892_v22, %v1895_v58  ;;  %vm850_vm8 = vcmp.lt.s32.totalorder %v5118_v62, 3  ;;  %vm849_vm9 = vcmp.lt.s32.totalorder %v5118_v62, 2  ;;  %v853_v58 = vsel %vm851_vm7, %v841_v11, 2102212464 }
  0xc8   : > { %v5142_v12 = vsel %vm649_vm15, nan, %v1896_v60  ;;  %v766_v49 = vsel %vm764_vm5, %v765_v42, %v763_v59  ;;  %v860_v10 = vsel %vm848_vm6, %v838_v47, %v841_v11  ;;  %v755_v42 = vadd.s32 %v5088_v52, %v5095_v56 }
  0xc9   : > { %v2702_v35 = vmul.f32 2.0, %v5142_v12  ;;  %v767_v39 = vclz %v766_v49  ;;  %v857_v22 = vsel %vm851_vm7, %v844_v0, 920167782  ;;  %v861_v3 = vsel %vm851_vm7, %v847_v9, 1326507024 }
  0xca   : > { %v786_v32 = vsel %vm663_vm3, %v785_v25, %v761_v24  ;;  %v5162_v7 = vand.u32 65535, %v5131_v34  ;;  %v852_v28 = vsel %vm848_vm6, %v832_v6, %v835_v5  ;;  %v856_v52 = vsel %vm848_vm6, %v835_v5, %v838_v47 }
  0xcb   : > { %v2710_v13 = vmul.f32 %v2702_v35, %v5142_v12  ;;  %v4096_v16 = vadd.s32 4294967294, %v767_v39  ;;  %v862_v35 = vsel %vm850_vm8, %v844_v0, %v861_v3  ;;  %v854_v24 = vsel %vm850_vm8, %v838_v47, %v853_v58 }
  0xcc   : > { %v863_v56 = vsel %vm849_vm9, %v860_v10, %v862_v35  ;;  %v858_v0 = vsel %vm850_vm8, %v841_v11, %v857_v22  ;;  %v5183_v10 = vshrl.u32 %v5131_v34, 16  ;;  %v5186_v47 = vadd.s32 4294967169, %v5111_v8 }
  0xcd   : > { %v5155_v60 = vadd.f32 -1.0, %v2710_v13  ;;  %vm4097_vm10 = vcmp.lt.s32.totalorder %v4096_v16, 0  ;;  %v868_v13 = vshrl.u32 %v863_v56, 16  ;;  %v788_v3 = vsel %vm5178_vm11, 0, %v786_v32 }
  0xce   : > { %v770_v49 = vsel %vm4097_vm10, 0, %v4096_v16  ;;  %v867_v16 = vand.u32 65535, %v863_v56  ;;  %v5195_v48 = vsel %vm849_vm9, %v852_v28, %v854_v24  ;;  %v5199_v35 = vsel %vm849_vm9, %v856_v52, %v858_v0 }
  0xcf   : > { %v2758_v15 = vmul.f32 2.0, %v5155_v60  ;;  %v771_v25 = vsub.s32 32, %v770_v49  ;;  %v772_v9 = vshll.u32 %v763_v59, %v770_v49  ;;  %v775_v39 = vsub.s32 4294967266, %v770_v49 }
  0xd0   : > { %v971_v59 = vand.u32 2147483647, %v5102_v61  ;;  %v889_v56 = vand.u32 65535, %v5199_v35  ;;  %v495_v32 = vadd.s32 3, %v4925_v21  ;;  %v650_v28 = vadd.s32 3, %v5093_v27 }
  0xd1   : > { %v2766_v6 = vmul.f32 %v5155_v60, %v2758_v15  ;;  %v773_v58 = vshrl.u32 %v755_v42, %v771_v25  ;;  %v776_v11 = vadd.s32 127, %v775_v39  ;;  %v5202_v42 = vmul.u32 %v868_v13, %v5162_v7 }
  0xd2   : > { %v340_v25 = vadd.s32 3, %v4839_v45  ;;  %v5209_v62 = vand.u32 3, %v788_v3  ;;  %v869_v52 = vmul.u32 %v867_v16, %v5162_v7  ;;  %v651_v46 = vand.u32 3, %v650_v28 }
  0xd3   : > { %v5189_v22 = vadd.f32 -1.0, %v2766_v6  ;;  %v774_v8 = vor.u32 %v773_v58, %v772_v9  ;;  %v777_v15 = vshll.u32 %v776_v11, 23  ;;  %v496_v6 = vand.u32 3, %v495_v32 }
  0xd4   : > { %v341_v9 = vand.u32 3, %v340_v25  ;;  %v5214_v58 = vmul.u32 %v867_v16, %v5183_v10  ;;  %v872_v45 = vmul.u32 %v868_v13, %v5183_v10  ;;  %v873_v21 = vshll.u32 %v5202_v42, 16 }
  0xd5   : > { %v2814_v49 = vmul.f32 2.0, %v5189_v22  ;;  %v778_v24 = vor.u32 4788187, %v777_v15  ;;  %v781_v39 = vcvt.s32.f32 %v774_v8  ;;  %vm498_vm0 = vcmp.eq.s32.totalorder %v496_v6, 0 }
  0xd6   : > { %vm343_vm12 = vcmp.eq.s32.totalorder %v341_v9, 0  ;;  %vm346_vm13 = vcmp.eq.s32.totalorder %v341_v9, 2  ;;  %vm342_vm1 = vcmp.lt.s32.totalorder %v341_v9, 2  ;;  %vm497_vm2 = vcmp.lt.s32.totalorder %v496_v6, 2 }
  0xd7   : > { %v2822_v0 = vmul.f32 %v5189_v22, %v2814_v49  ;;  %v779_v11 = vand.u32 2147483647, %v778_v24  ;;  %v345_v15 = vsel %vm343_vm12, %v4897_v20, %v344_v43  ;;  %v348_v16 = vsel %vm346_vm13, %v347_v14, %v4904_v4 }
  0xd8   : > { %v349_v49 = vsel %vm342_vm1, %v345_v15, %v348_v16  ;;  %v500_v13 = vsel %vm498_vm0, %v4977_v57, %v499_v40  ;;  %vm501_vm5 = vcmp.eq.s32.totalorder %v496_v6, 2  ;;  %vm652_vm6 = vcmp.lt.s32.totalorder %v651_v46, 2 }
  0xd9   : > { %v4152_v27 = vadd.f32 -1.0, %v2822_v0  ;;  %v782_v8 = vmul.f32 %v781_v39, %v779_v11  ;;  %v5229_v32 = vsel %vm339_vm4, nan, %v349_v49  ;;  %v503_v43 = vsel %vm501_vm5, %v502_v51, %v4986_v19 }
  0xda   : > { %v2684_v20 = vmul.f32 2.0, %v5229_v32  ;;  %v504_v4 = vsel %vm497_vm2, %v500_v13, %v503_v43  ;;  %vm653_vm7 = vcmp.eq.s32.totalorder %v651_v46, 0  ;;  %vm656_vm8 = vcmp.eq.s32.totalorder %v651_v46, 2 }
  0xdb   : > { %3022 = vmatpush.msra.mxu2 %v4152_v27  ;;  %v783_v25 = vxor.u32 2147483648, %v782_v8  ;;  %v5239_v40 = vsel %vm494_vm14, nan, %v504_v4  ;;  %v655_v1 = vsel %vm653_vm7, %v5109_v36, %v654_v17  ;;  %v658_v57 = vsel %vm656_vm8, %v657_v44, %v5113_v26 }
  0xdc   : > { %v5253_v46 = vmul.f32 %v2684_v20, %v4939_v41  ;;  %v2685_v2 = vmul.f32 2.0, %v5239_v40  ;;  %v659_v51 = vsel %vm652_vm6, %v655_v1, %v658_v57  ;;  %v875_v36 = vshll.u32 %v5214_v58, 16 }
  0xdd   : > { %v784_v14 = vsel %vm663_vm3, %v783_v25, %v782_v8  ;;  %v5260_v17 = vsel %vm649_vm15, nan, %v659_v51  ;;  %v890_v26 = vshrl.u32 %v5199_v35, 16  ;;  %vm877_vm4 = vc.u32 %v869_v52, %v873_v21 }
  0xde   : > { %v5250_v19 = vsel %vm5178_vm11, %v4876_v18, %v784_v14  ;;  %v2740_v44 = vmul.f32 2.0, %v5253_v46  ;;  %v5266_v5 = vmul.f32 %v2685_v2, %v5022_v23  ;;  %v2686_v24 = vmul.f32 2.0, %v5260_v17 }
  0xdf   : > { %v789_v28 = vmul.f32 %v5250_v19, %v5250_v19  ;;  %v805_v9 = vadd.s32 3, %v788_v3  ;;  %v879_v6 = vadd.s32 %v873_v21, %v869_v52  ;;  %v874_v15 = vshrl.u32 %v5202_v42, 16 }
  0xe0   : > { %v2748_v11 = vmul.f32 %v4948_v63, %v2740_v44  ;;  %v2741_v27 = vmul.f32 2.0, %v5266_v5  ;;  %v5272_v8 = vmul.f32 %v2686_v24, %v5142_v12  ;;  %v878_v13 = vsel %vm877_vm4, 1, %v4493_v53 }
  0xe1   : > { %v790_v39 = vmul.f32 -0.001358992, %v789_v28  ;;  %v797_v0 = vmul.f32 -0.00019511016, %v789_v28  ;;  %vm881_vm14 = vc.u32 %v879_v6, %v875_v36  ;;  %vm2047_vm15 = vcmp.eq.s32.totalorder %v5209_v62, 2 }
  0xe2   : > { %v2796_v25 = vmul.f32 2.0, %v2748_v11  ;;  %v2749_v3 = vmul.f32 %v5045_v54, %v2741_v27  ;;  %v2742_v52 = vmul.f32 2.0, %v5272_v8  ;;  %v880_v21 = vadd.s32 %v878_v13, %v872_v45 }
  0xe3   : > { %v791_v16 = vadd.f32 0.041655596, %v790_v39  ;;  %v798_v49 = vadd.f32 0.008332121, %v797_v0  ;;  %v5279_v4 = vand.u32 3, %v805_v9  ;;  %v882_v14 = vsel %vm881_vm14, 1, %v4493_v53 }
  0xe4   : > { %vm2044_vm3 = vcmp.eq.s32.totalorder %v5209_v62, 0  ;;  %v2804_v42 = vmul.f32 %v4975_v50, %v2796_v25  ;;  %v2797_v1 = vmul.f32 2.0, %v2749_v3  ;;  %v2750_v57 = vmul.f32 %v5155_v60, %v2742_v52 }
  0xe5   : > { %v792_v43 = vmul.f32 %v791_v16, %v789_v28  ;;  %v799_v20 = vmul.f32 %v798_v49, %v789_v28  ;;  %v891_v2 = vmul.u32 %v889_v56, %v5162_v7  ;;  %vm2043_vm9 = vcmp.lt.s32.totalorder %v5209_v62, 2 }
  0xe6   : > { %v892_v45 = vmul.u32 %v890_v26, %v5162_v7  ;;  %v893_v44 = vmul.u32 %v889_v56, %v5183_v10  ;;  %2965 = vmatpush.msra.mxu0 %v2804_v42  ;;  %v2805_v24 = vmul.f32 %v5066_v55, %v2797_v1  ;;  %v2798_v39 = vmul.f32 2.0, %v2750_v57 }
  0xe7   : > { %v793_v51 = vadd.f32 -0.4999988, %v792_v43  ;;  %v800_v36 = vadd.f32 -0.16666654, %v799_v20  ;;  %v876_v0 = vshrl.u32 %v5214_v58, 16  ;;  %v884_v9 = vadd.s32 %v882_v14, %v880_v21 }
  0xe8   : > { %v894_v16 = vmul.u32 %v890_v26, %v5183_v10  ;;  %v895_v49 = vshll.u32 %v892_v45, 16  ;;  %2994 = vmatpush.msra.mxu1 %v2805_v24  ;;  %v2806_v13 = vmul.f32 %v5189_v22, %v2798_v39  ;;  %vm807_vm10 = vcmp.lt.s32.totalorder %v5279_v4, 2  ;;  %2966 = vmatpush.msra.mxu0 %v4975_v50 }
  0xe9   : > { %v794_v6 = vmul.f32 %v793_v51, %v789_v28  ;;  %v801_v27 = vmul.f32 %v800_v36, %v789_v28  ;;  %vm811_vm11 = vcmp.eq.s32.totalorder %v5279_v4, 2  ;;  %v897_v7 = vshll.u32 %v893_v44, 16 }
  0xea   : > { %vm899_vm12 = vc.u32 %v891_v2, %v895_v49  ;;  %v901_v58 = vadd.s32 %v895_v49, %v891_v2  ;;  %3023 = vmatpush.msra.mxu2 %v2806_v13  ;;  %2995 = vmatpush.msra.mxu1 %v5066_v55  ;;  %v885_v28 = vadd.s32 %v884_v9, %v874_v15  ;;  %v896_v10 = vshrl.u32 %v892_v45, 16 }
  0xeb   : > { %v795_v35 = vadd.f32 1.0, %v794_v6  ;;  %v802_v56 = vadd.f32 1.0, %v801_v27  ;;  %v900_v26 = vsel %vm899_vm12, 1, %v4493_v53  ;;  %v981_v25 = vadd.s32 1, %v5186_v47  ;;  %2967 = vmatpush.msra.mxu0 %v2748_v11  ;;  %v4343_v27 = vld [vmem:[%s4609_s6 + $0x8] sm:$0xff] }
  0xec   : > { %v902_v43 = vadd.s32 %v900_v26, %v894_v16  ;;  %vm903_vm13 = vc.u32 %v901_v58, %v897_v7  ;;  %vm808_vm0 = vcmp.eq.s32.totalorder %v5279_v4, 0  ;;  %3024 = vmatpush.msra.mxu2 %v5189_v22  ;;  %2996 = vmatpush.msra.mxu1 %v2749_v3  ;;  %v898_v50 = vshrl.u32 %v893_v44, 16  ;;  %v4342_v44 = vld [vmem:[%s4609_s6] sm:$0xff] }
  0xed   : > { %v803_v52 = vmul.f32 %v802_v56, %v5250_v19  ;;  %v812_v21 = vxor.u32 2147483648, %v795_v35  ;;  %v904_v55 = vsel %vm903_vm13, 1, %v4493_v53  ;;  %vm982_vm1 = vcmp.gt.s32.totalorder %v981_v25, 0  ;;  %2968 = vmatpush.msra.mxu0 %v4948_v63 }
  0xee   : > { %v906_v19 = vadd.s32 %v904_v55, %v902_v43  ;;  %vm804_vm2 = vweird.f32 %v4876_v18  ;;  %3025 = vmatpush.msra.mxu2 %v2750_v57  ;;  %2997 = vmatpush.msra.mxu1 %v5045_v54  ;;  %v5314_v22 = vadd.s32 %v885_v28, %v876_v0  ;;  %v5316_v11 = vadd.s32 %v901_v58, %v897_v7 }
  0xef   : > { %v809_v15 = vxor.u32 2147483648, %v803_v52  ;;  %v2049_v20 = vsel %vm2047_vm15, %v812_v21, %v803_v52  ;;  %v813_v47 = vsel %vm811_vm11, %v812_v21, %v803_v52  ;;  %v983_v3 = vsel %vm982_vm1, %v981_v25, 0  ;;  %2969 = vmatpush.msra.mxu0 %v5253_v46 }
  0xf0   : > { %v907_v63 = vadd.s32 %v906_v19, %v896_v10  ;;  %3026 = vmatpush.msra.mxu2 %v5155_v60  ;;  %2998 = vmatpush.msra.mxu1 %v5266_v5  ;;  %v5331_v57 = vand.u32 8388607, %v971_v59  ;;  %v985_v2 = vand.u32 31, %v983_v3  ;;  %v909_v60 = vmul.u32 %v5131_v34, %v5195_v48 }
  0xf1   : > { %v2046_v14 = vsel %vm2044_vm3, %v795_v35, %v809_v15  ;;  %v810_v42 = vsel %vm808_vm0, %v795_v35, %v809_v15  ;;  %2970 = vmatpush.msra.mxu0 %v4939_v41  ;;  %vm911_vm5 = vc.u32 %v5314_v22, %v5316_v11  ;;  %v5353_v36 = vshrl.u32 %v983_v3, 5 }
  0xf2   : > { %v2050_v1 = vsel %vm2043_vm9, %v2046_v14, %v2049_v20  ;;  %v814_v54 = vsel %vm807_vm10, %v810_v42, %v813_v47  ;;  %v908_v46 = vadd.s32 %v907_v63, %v898_v50  ;;  %3027 = vmatpush.msra.mxu2 %v5272_v8  ;;  %2999 = vmatpush.msra.mxu1 %v5022_v23  ;;  %v5350_v18 = vsub.s32 32, %v985_v2  ;;  %v5363_v23 = vld [vmem:[#allocation6] sm:$0xff]  ;;  %v5415_v47 = vld [vmem:[#allocation6 + $0x10] sm:$0xff] }
  0xf3   : > { %v5335_v51 = vsel %vm804_vm2, nan, %v2050_v1  ;;  %v5339_v62 = vsel %vm804_vm2, nan, %v814_v54  ;;  %2971 = vmatpush.msra.mxu0 %v5229_v32  ;;  %v988_v34 = vshll.u32 %v4487_v29, %v985_v2  ;;  %v991_v48 = vshll.u32 %v4488_v31, %v985_v2 }
  0xf4   : > { %v2703_v5 = vmul.f32 2.0, %v5335_v51  ;;  %v2687_v4 = vmul.f32 2.0, %v5339_v62  ;;  %v912_v41 = vadd.s32 1, %v908_v46  ;;  %3028 = vmatpush.msra.mxu2 %v5142_v12  ;;  %3000 = vmatpush.msra.mxu1 %v5239_v40  ;;  %vm2944_vm6 = vcmask 654336  }
  0xf5   : > { %v994_v32 = vshll.u32 %v4489_v33, %v985_v2  ;;  %2972 = vmatpush.msra.mxu0 %v4342_v44  ;;  %v989_v39 = vshrl.u32 %v4488_v31, %v5350_v18  ;;  %v992_v0 = vshrl.u32 %v4489_v33, %v5350_v18  ;;  %v6354_v12 = vmov 2102212464   ;;  %v5451_v44 = vld [vmem:[%s4609_s6 + $0x30] sm:$0xff] }
  0xf6   : > { %v2711_v45 = vmul.f32 %v2703_v5, %v5335_v51  ;;  %v5359_v8 = vmul.f32 %v2687_v4, %v5335_v51  ;;  %v913_v24 = vsel %vm911_vm5, %v912_v41, %v908_v46  ;;  %v995_v40 = vshrl.u32 %v6354_v12, %v5350_v18  ;;  %3029 = vmatpush.msra.mxu2 %v5260_v17 }
  0xf7   : > { %3001 = vmatpush.msra.mxu1 %v4343_v27  ;;  %v914_v16 = vadd.s32 %v913_v24, %v909_v60  ;;  %v997_v49 = vshll.u32 %v6354_v12, %v985_v2  ;;  %4158 = vmatmul.msk.f32.vlgmr.msra.gmra.mxu0 %vm2944_vm6, %v5363_v23  ;;  %v979_v13 = vor.u32 8388608, %v5331_v57  ;;  %v5387_v7 = vor.u32 %v989_v39, %v988_v34 }
  0xf8   : > { %v5376_v9 = vadd.f32 -1.0, %v2711_v45  ;;  %v2743_v6 = vmul.f32 2.0, %v5359_v8  ;;  %4162 = vmatmul.msk.f32.vlgmr.msra.gmra.mxu1 %vm2944_vm6, %v5363_v23  ;;  %v5389_v35 = vor.u32 %v992_v0, %v991_v48  ;;  %3030 = vmatpush.msra.mxu2 %v5079_v38  ;;  %v6355_v17 = vmov 1.0  }
  0xf9   : > { %3079 = vmatpush.msrb.mxu0 %v6355_v17  ;;  %v915_v58 = vadd.s32 536870912, %v914_v16  ;;  %v996_v28 = vor.u32 %v995_v40, %v994_v32  ;;  %v998_v10 = vshrl.u32 %v4491_v37, %v5350_v18  ;;  %4166 = vmatmul.msk.f32.vlgmr.msra.gmra.mxu2 %vm2944_vm6, %v5363_v23  ;;  %v1000_v25 = vshll.u32 %v4491_v37, %v985_v2 }
  0xfa   : > { %v2759_v56 = vmul.f32 2.0, %v5376_v9  ;;  %v5397_v26 = vmul.f32 %v5376_v9, %v2743_v6  ;;  %3108 = vmatpush.msrb.mxu1 %v6355_v17  ;;  %v6356_v52 = vmov 1326507024   ;;  %vm1003_vm7 = vcmp.lt.s32.totalorder %v5353_v36, 1  ;;  %3137 = vmatpush.msrb.mxu2 %v6355_v17 }
  0xfb   : > { %v1001_v38 = vshrl.u32 %v6356_v52, %v5350_v18  ;;  %v5408_v43 = vshrl.u32 %v915_v58, 30  ;;  %v999_v50 = vor.u32 %v998_v10, %v997_v49  ;;  %vm1005_vm8 = vcmp.lt.s32.totalorder %v5353_v36, 3 }
  0xfc   : > { %v2767_v21 = vmul.f32 %v5376_v9, %v2759_v56  ;;  %vm1004_vm4 = vcmp.lt.s32.totalorder %v5353_v36, 2  ;;  %vm1006_vm14 = vcmp.lt.s32.totalorder %v5353_v36, 4  ;;  %v5413_v15 = vshll.u32 %v979_v13, 8 }
  0xfd   : > { %v1002_v55 = vor.u32 %v1001_v38, %v1000_v25  ;;  %v917_v19 = vshll.u32 %v5408_v43, 30  ;;  %v1011_v3 = vsel %vm1003_vm7, %v5387_v7, %v5389_v35  ;;  %v1012_v14 = vsel %vm1006_vm14, %v999_v50, 920167782 }
  0xfe   : > { %v4145_v20 = vadd.f32 -1.0, %v2767_v21  ;;  %v2799_v42 = vmul.f32 2.0, %v5397_v26  ;;  %v1013_v63 = vsel %vm1005_vm8, %v996_v28, %v1012_v14  ;;  %v1015_v2 = vsel %vm1003_vm7, %v5389_v35, %v996_v28 }
  0xff   : > { %v5427_v54 = vsub.s32 %v914_v16, %v917_v19  ;;  %4159 = vmatmul.msk.f32.gmra.mxu0 %vm2944_vm6, %v5415_v47  ;;  %v1014_v57 = vsel %vm1004_vm4, %v1011_v3, %v1013_v63  ;;  %v1016_v46 = vsel %vm1006_vm14, %v1002_v55, 1326507024  ;;  %v1020_v60 = vand.u32 65535, %v5413_v15 }
 0x100   : > { %v2815_v1 = vmul.f32 2.0, %v4145_v20  ;;  %4163 = vmatmul.msk.f32.gmra.mxu1 %vm2944_vm6, %v5415_v47  ;;  %v1021_v41 = vshrl.u32 %v5413_v15, 16  ;;  %v2807_v34 = vmul.f32 %v4145_v20, %v2799_v42  ;;  %v987_v48 = vshrl.u32 %v4487_v29, %v5350_v18 }
 0x101   : > { %vm919_vm15 = vcmp.lt.s32.totalorder %v5427_v54, 0  ;;  %v920_v4 = vsub.s32 0, %v5427_v54  ;;  %4167 = vmatmul.msk.f32.gmra.mxu2 %vm2944_vm6, %v5415_v47  ;;  %v1017_v45 = vsel %vm1005_vm8, %v999_v50, %v1016_v46  ;;  %v1045_v32 = vshrl.u32 %v1014_v57, 16 }
 0x102   : > { %v2823_v5 = vmul.f32 %v4145_v20, %v2815_v1  ;;  %v1018_v0 = vsel %vm1004_vm4, %v1015_v2, %v1017_v45  ;;  %v1044_v40 = vand.u32 65535, %v1014_v57  ;;  %v1008_v27 = vsel %vm1006_vm14, %v996_v28, 2102212464 }
 0x103   : > { %v921_v39 = vsel %vm919_vm15, %v920_v4, %v5427_v54  ;;  %v1022_v16 = vand.u32 65535, %v1018_v0  ;;  %v1023_v49 = vshrl.u32 %v1018_v0, 16  ;;  %v910_v18 = vadd.s32 %v5316_v11, %v5314_v22 }
 0x104   : > { %v4153_v24 = vadd.f32 -1.0, %v2823_v5  ;;  %v922_v6 = vclz %v921_v39  ;;  %v5460_v13 = vmul.u32 %v1045_v32, %v1020_v60  ;;  %v1129_v56 = vand.u32 2139095040, %v5451_v44 }
 0x105   : > { %v1024_v10 = vmul.u32 %v1022_v16, %v1020_v60  ;;  %v1025_v25 = vmul.u32 %v1023_v49, %v1020_v60  ;;  %v1026_v38 = vmul.u32 %v1022_v16, %v1021_v41  ;;  %v940_v21 = vsub.s32 4, %v5408_v43 }
 0x106   : > { %3051 = vmatpush.msra.mxu3 %v4153_v24  ;;  %v4099_v58 = vadd.s32 4294967294, %v922_v6  ;;  %v1007_v28 = vsel %vm1003_vm7, %v987_v48, %v5387_v7  ;;  %v1009_v50 = vsel %vm1005_vm8, %v5389_v35, %v1008_v27  ;;  %v5470_v22 = vmul.u32 %v1044_v40, %v1021_v41 }
 0x107   : > { %v1027_v11 = vmul.u32 %v1023_v49, %v1021_v41  ;;  %v1028_v55 = vshll.u32 %v1025_v25, 16  ;;  %v1046_v19 = vmul.u32 %v1044_v40, %v1020_v60  ;;  %v1030_v14 = vshll.u32 %v1026_v38, 16 }
 0x108   : > { %3052 = vmatpush.msra.mxu3 %v2807_v34  ;;  %vm4100_vm3 = vcmp.lt.s32.totalorder %v4099_v58, 0  ;;  %v1050_v42 = vshll.u32 %v5460_v13, 16  ;;  %v1130_v63 = vshrl.u32 %v1129_v56, 23  ;;  %v1049_v2 = vmul.u32 %v1045_v32, %v1021_v41 }
 0x109   : > { %v925_v3 = vsel %vm4100_vm3, 0, %v4099_v58  ;;  %vm1032_vm9 = vc.u32 %v1024_v10, %v1028_v55  ;;  %v1051_v46 = vshrl.u32 %v5460_v13, 16  ;;  %v1052_v60 = vshll.u32 %v5470_v22, 16 }
 0x10a   : > { %3053 = vmatpush.msra.mxu3 %v4145_v20  ;;  %v926_v1 = vsub.s32 32, %v925_v3  ;;  %v927_v57 = vshll.u32 %v5427_v54, %v925_v3  ;;  %v930_v7 = vsub.s32 4294967266, %v925_v3  ;;  %v1033_v35 = vsel %vm1032_vm9, 1, %v4493_v53 }
 0x10b   : > { %v1034_v4 = vadd.s32 %v1028_v55, %v1024_v10  ;;  %v1035_v34 = vadd.s32 %v1033_v35, %v1027_v11  ;;  %v1029_v48 = vshrl.u32 %v1025_v25, 16  ;;  %vm1054_vm10 = vc.u32 %v1046_v19, %v1050_v42  ;;  %v4344_v55 = vld [vmem:[%s4609_s6 + $0x18] sm:$0xff] }
 0x10c   : > { %3054 = vmatpush.msra.mxu3 %v5397_v26  ;;  %v928_v20 = vshrl.u32 %v910_v18, %v926_v1  ;;  %v931_v5 = vadd.s32 127, %v930_v7  ;;  %v1056_v54 = vadd.s32 %v1050_v42, %v1046_v19  ;;  %v4104_v45 = vadd.s32 4294967169, %v1130_v63 }
 0x10d   : > { %vm1036_vm11 = vc.u32 %v1034_v4, %v1030_v14  ;;  %v1055_v26 = vsel %vm1054_vm10, 1, %v4493_v53  ;;  %v1031_v41 = vshrl.u32 %v1026_v38, 16  ;;  %vm818_vm13 = vcmp.lt.s32.totalorder %v5073_v30, 0 }
 0x10e   : > { %3055 = vmatpush.msra.mxu3 %v5376_v9  ;;  %v929_v24 = vor.u32 %v928_v20, %v927_v57  ;;  %v932_v39 = vshll.u32 %v931_v5, 23  ;;  %v1037_v32 = vsel %vm1036_vm11, 1, %v4493_v53  ;;  %v1057_v0 = vadd.s32 %v1055_v26, %v1049_v2  ;;  %v5535_v20 = vld [vmem:[%s4609_s6 + $0x38] sm:$0xff] }
 0x10f   : > { %vm1058_vm12 = vc.u32 %v1056_v54, %v1052_v60  ;;  %v1039_v27 = vadd.s32 %v1037_v32, %v1035_v34  ;;  %v1053_v16 = vshrl.u32 %v5470_v22, 16  ;;  %v1136_v18 = vadd.s32 1, %v4104_v45 }
 0x110   : > { %3056 = vmatpush.msra.mxu3 %v5359_v8  ;;  %v933_v40 = vor.u32 4788187, %v932_v39  ;;  %v936_v6 = vcvt.s32.f32 %v929_v24  ;;  %v1059_v9 = vsel %vm1058_vm12, 1, %v4493_v53  ;;  %v941_v13 = vsel %vm818_vm13, %v940_v21, %v5408_v43 }
 0x111   : > { %v1061_v49 = vadd.s32 %v1059_v9, %v1057_v0  ;;  %v1040_v56 = vadd.s32 %v1039_v27, %v1029_v48  ;;  %v5489_v58 = vadd.s32 %v1056_v54, %v1052_v60  ;;  %v6357_v10 = vand.u32 2147483647, %v5073_v30 }
 0x112   : > { %3057 = vmatpush.msra.mxu3 %v5335_v51  ;;  %v934_v8 = vand.u32 2147483647, %v933_v40  ;;  %v1010_v25 = vsel %vm1004_vm4, %v1007_v28, %v1009_v50  ;;  %vm1137_vm1 = vcmp.gt.s32.totalorder %v1136_v18, 0  ;;  %v1126_v43 = vand.u32 2147483647, %v5451_v44 }
 0x113   : > { %vm5494_vm0 = vcmp.le.f32.partialorder %v6357_v10, 0.7853982  ;;  %v1062_v38 = vadd.s32 %v1061_v49, %v1051_v46  ;;  %v5500_v11 = vadd.s32 %v1040_v56, %v1031_v41  ;;  %v1138_v21 = vsel %vm1137_vm1, %v1136_v18, 0 }
 0x114   : > { %3058 = vmatpush.msra.mxu3 %v5339_v62  ;;  %v937_v22 = vmul.f32 %v936_v6, %v934_v8  ;;  %v5506_v62 = vsel %vm5494_vm0, 0, %v941_v13  ;;  %v1140_v3 = vand.u32 31, %v1138_v21  ;;  %v1064_v28 = vmul.u32 %v5413_v15, %v1010_v25 }
 0x115   : > { %v1063_v19 = vadd.s32 %v1062_v38, %v1053_v16  ;;  %vm1066_vm2 = vc.u32 %v5500_v11, %v5489_v58  ;;  %v5517_v63 = vand.u32 3, %v5506_v62  ;;  %v5521_v1 = vshrl.u32 %v1138_v21, 5 }
 0x116   : > { %3059 = vmatpush.msra.mxu3 %v4344_v55  ;;  %v938_v36 = vxor.u32 2147483648, %v937_v22  ;;  %v1141_v14 = vsub.s32 32, %v1140_v3  ;;  %v1149_v7 = vshll.u32 %v4489_v33, %v1140_v3  ;;  %v1152_v46 = vshll.u32 %v6354_v12, %v1140_v3 }
 0x117   : > { %4170 = vmatmul.msk.f32.vlgmr.msra.gmra.mxu3 %vm2944_vm6, %v5363_v23  ;;  %v1067_v50 = vadd.s32 1, %v1063_v19  ;;  %v1133_v23 = vand.u32 8388607, %v1126_v43  ;;  %v1155_v60 = vshll.u32 %v4491_v37, %v1140_v3  ;;  %v1143_v26 = vshll.u32 %v4487_v29, %v1140_v3 }
 0x118   : > { %3166 = vmatpush.msrb.mxu3 %v6355_v17  ;;  %v939_v42 = vsel %vm818_vm13, %v938_v36, %v937_v22  ;;  %v1146_v17 = vshll.u32 %v4488_v31, %v1140_v3  ;;  %v1147_v5 = vshrl.u32 %v4489_v33, %v1141_v14  ;;  %v1150_v4 = vshrl.u32 %v6354_v12, %v1141_v14 }
 0x119   : > { %v5526_v15 = vsel %vm5494_vm0, %v5073_v30, %v939_v42  ;;  %v1068_v57 = vsel %vm1066_vm2, %v1067_v50, %v1063_v19  ;;  %v1153_v34 = vshrl.u32 %v4491_v37, %v1141_v14  ;;  %v1156_v48 = vshrl.u32 %v6356_v52, %v1141_v14 }
 0x11a   : > { %v944_v35 = vmul.f32 %v5526_v15, %v5526_v15  ;;  %v1069_v2 = vadd.s32 %v1068_v57, %v1064_v28  ;;  %v1134_v39 = vor.u32 8388608, %v1133_v23  ;;  %v1144_v41 = vshrl.u32 %v4488_v31, %v1141_v14 }
 0x11b   : > { %v1284_v32 = vand.u32 2139095040, %v5535_v20  ;;  %v1154_v27 = vor.u32 %v1153_v34, %v1152_v46  ;;  %vm2201_vm5 = vcmp.eq.s32.totalorder %v5517_v63, 2  ;;  %v5549_v9 = vor.u32 %v1147_v5, %v1146_v17 }
 0x11c   : > { %v945_v54 = vmul.f32 -0.001358992, %v944_v35  ;;  %v952_v45 = vmul.f32 -0.00019511016, %v944_v35  ;;  %v1070_v24 = vadd.s32 536870912, %v1069_v2  ;;  %v1151_v16 = vor.u32 %v1150_v4, %v1149_v7 }
 0x11d   : > { %v1157_v49 = vor.u32 %v1156_v48, %v1155_v60  ;;  %vm1161_vm7 = vcmp.lt.s32.totalorder %v5521_v1, 4  ;;  %vm1158_vm8 = vcmp.lt.s32.totalorder %v5521_v1, 1  ;;  %vm2198_vm4 = vcmp.eq.s32.totalorder %v5517_v63, 0 }
 0x11e   : > { %v946_v0 = vadd.f32 0.041655596, %v945_v54  ;;  %v953_v40 = vadd.f32 0.008332121, %v952_v45  ;;  %v5546_v6 = vshrl.u32 %v1070_v24, 30  ;;  %vm1160_vm14 = vcmp.lt.s32.totalorder %v5521_v1, 3 }
 0x11f   : > { %4171 = vmatmul.msk.f32.gmra.mxu3 %vm2944_vm6, %v5415_v47  ;;  %v1145_v47 = vor.u32 %v1144_v41, %v1143_v26  ;;  %v5556_v56 = vshll.u32 %v1134_v39, 8  ;;  %v1285_v10 = vshrl.u32 %v1284_v32, 23  ;;  %vm2197_vm15 = vcmp.lt.s32.totalorder %v5517_v63, 2 }
 0x120   : > { %v947_v18 = vmul.f32 %v946_v0, %v944_v35  ;;  %v954_v8 = vmul.f32 %v953_v40, %v944_v35  ;;  %v1072_v13 = vshll.u32 %v5546_v6, 30  ;;  %v1167_v22 = vsel %vm1161_vm7, %v1154_v27, 920167782 }
 0x121   : > { %vm959_vm3 = vweird.f32 %v5073_v30  ;;  %v1142_v21 = vshrl.u32 %v4487_v29, %v1141_v14  ;;  %vm1159_vm9 = vcmp.lt.s32.totalorder %v5521_v1, 2  ;;  %v1170_v55 = vsel %vm1158_vm8, %v5549_v9, %v1151_v16 }
 0x122   : > { %v948_v51 = vadd.f32 -0.4999988, %v947_v18  ;;  %v955_v25 = vadd.f32 -0.16666654, %v954_v8  ;;  %v5559_v38 = vsub.s32 %v1069_v2, %v1072_v13  ;;  %v1171_v19 = vsel %vm1161_vm7, %v1157_v49, 1326507024 }
 0x123   : > { %v1166_v50 = vsel %vm1158_vm8, %v1145_v47, %v5549_v9  ;;  %v1168_v14 = vsel %vm1160_vm14, %v1151_v16, %v1167_v22  ;;  %v1172_v42 = vsel %vm1160_vm14, %v1154_v27, %v1171_v19  ;;  %v1175_v23 = vand.u32 65535, %v5556_v56 }
 0x124   : > { %v949_v3 = vmul.f32 %v948_v51, %v944_v35  ;;  %v956_v36 = vmul.f32 %v955_v25, %v944_v35  ;;  %vm1074_vm10 = vcmp.lt.s32.totalorder %v5559_v38, 0  ;;  %v1075_v28 = vsub.s32 0, %v5559_v38 }
 0x125   : > { %v1173_v35 = vsel %vm1159_vm9, %v1170_v55, %v1172_v42  ;;  %v1176_v46 = vshrl.u32 %v5556_v56, 16  ;;  %v1169_v48 = vsel %vm1159_vm9, %v1166_v50, %v1168_v14  ;;  %v1281_v54 = vand.u32 2147483647, %v5535_v20 }
 0x126   : > { %v5581_v57 = vadd.f32 1.0, %v949_v3  ;;  %v957_v17 = vadd.f32 1.0, %v956_v36  ;;  %v1076_v7 = vsel %vm1074_vm10, %v1075_v28, %v5559_v38  ;;  %v1177_v60 = vand.u32 65535, %v1173_v35  ;;  %v5623_v28 = vld [vmem:[%s4609_s6 + $0x28] sm:$0xff] }
 0x127   : > { %v1077_v2 = vclz %v1076_v7  ;;  %v1178_v5 = vshrl.u32 %v1173_v35, 16  ;;  %v1065_v45 = vadd.s32 %v5489_v58, %v5500_v11  ;;  %v4107_v26 = vadd.s32 4294967169, %v1285_v10 }
 0x128   : > { %v5588_v4 = vmul.f32 %v957_v17, %v5526_v15  ;;  %v967_v34 = vxor.u32 2147483648, %v5581_v57  ;;  %v5602_v32 = vmul.u32 %v1177_v60, %v1176_v46  ;;  %v1199_v0 = vand.u32 65535, %v1169_v48 }
 0x129   : > { %v4102_v24 = vadd.s32 4294967294, %v1077_v2  ;;  %v1180_v39 = vmul.u32 %v1178_v5, %v1175_v23  ;;  %v1162_v40 = vsel %vm1158_vm8, %v1142_v21, %v1145_v47  ;;  %v1163_v58 = vsel %vm1161_vm7, %v1151_v16, 2102212464 }
 0x12a   : > { %v964_v41 = vxor.u32 2147483648, %v5588_v4  ;;  %v2203_v15 = vsel %vm2201_vm5, %v967_v34, %v5588_v4  ;;  %v1200_v11 = vshrl.u32 %v1169_v48, 16  ;;  %v1179_v18 = vmul.u32 %v1177_v60, %v1175_v23 }
 0x12b   : > { %vm4103_vm11 = vcmp.lt.s32.totalorder %v4102_v24, 0  ;;  %v1183_v8 = vshll.u32 %v1180_v39, 16  ;;  %v1182_v25 = vmul.u32 %v1178_v5, %v1176_v46  ;;  %v1185_v22 = vshll.u32 %v5602_v32, 16 }
 0x12c   : > { %v2200_v27 = vsel %vm2198_vm4, %v5581_v57, %v964_v41  ;;  %v1080_v49 = vsel %vm4103_vm11, 0, %v4102_v24  ;;  %v1201_v21 = vmul.u32 %v1199_v0, %v1175_v23  ;;  %v1184_v36 = vshrl.u32 %v1180_v39, 16 }
 0x12d   : > { %v2204_v13 = vsel %vm2197_vm15, %v2200_v27, %v2203_v15  ;;  %v1081_v10 = vsub.s32 32, %v1080_v49  ;;  %v1082_v47 = vshll.u32 %v5559_v38, %v1080_v49  ;;  %v1085_v51 = vsub.s32 4294967266, %v1080_v49 }
 0x12e   : > { %v5618_v16 = vsel %vm959_vm3, nan, %v2204_v13  ;;  %vm973_vm12 = vcmp.lt.s32.totalorder %v5623_v28, 0  ;;  %vm1187_vm13 = vc.u32 %v1179_v18, %v1183_v8  ;;  %v1189_v63 = vadd.s32 %v1183_v8, %v1179_v18 }
 0x12f   : > { %v2704_v55 = vmul.f32 2.0, %v5618_v16  ;;  %v1083_v19 = vshrl.u32 %v1065_v45, %v1081_v10  ;;  %v1086_v3 = vadd.s32 127, %v1085_v51  ;;  %v1202_v38 = vmul.u32 %v1200_v11, %v1175_v23 }
 0x130   : > { %v1203_v50 = vmul.u32 %v1199_v0, %v1176_v46  ;;  %vm5629_vm0 = vcmp.le.f32.partialorder %v971_v59, 0.7853982  ;;  %v1188_v35 = vsel %vm1187_vm13, 1, %v4493_v53  ;;  %vm1191_vm1 = vc.u32 %v1189_v63, %v1185_v22 }
 0x131   : > { %v2712_v14 = vmul.f32 %v2704_v55, %v5618_v16  ;;  %v1084_v17 = vor.u32 %v1083_v19, %v1082_v47  ;;  %v1087_v7 = vshll.u32 %v1086_v3, 23  ;;  %v1190_v2 = vadd.s32 %v1188_v35, %v1182_v25 }
 0x132   : > { %v1204_v60 = vmul.u32 %v1200_v11, %v1176_v46  ;;  %v1205_v5 = vshll.u32 %v1202_v38, 16  ;;  %v1192_v24 = vsel %vm1191_vm1, 1, %v4493_v53  ;;  %v1095_v61 = vsub.s32 4, %v5546_v6 }
 0x133   : > { %v5634_v48 = vadd.f32 -1.0, %v2712_v14  ;;  %v1088_v23 = vor.u32 4788187, %v1087_v7  ;;  %v1091_v45 = vcvt.s32.f32 %v1084_v17  ;;  %v1164_v59 = vsel %vm1160_vm14, %v5549_v9, %v1163_v58 }
 0x134   : > { %v1194_v39 = vadd.s32 %v1192_v24, %v1190_v2  ;;  %v1207_v15 = vshll.u32 %v1203_v50, 16  ;;  %vm1209_vm2 = vc.u32 %v1201_v21, %v1205_v5  ;;  %v1211_v46 = vadd.s32 %v1205_v5, %v1201_v21 }
 0x135   : > { %v2760_v0 = vmul.f32 2.0, %v5634_v48  ;;  %v1089_v27 = vand.u32 2147483647, %v1088_v23  ;;  %v1186_v11 = vshrl.u32 %v5602_v32, 16  ;;  %v1206_v18 = vshrl.u32 %v1202_v38, 16 }
 0x136   : > { %v1195_v49 = vadd.s32 %v1194_v39, %v1184_v36  ;;  %v1210_v8 = vsel %vm1209_vm2, 1, %v4493_v53  ;;  %vm1213_vm5 = vc.u32 %v1211_v46, %v1207_v15  ;;  %v1165_v9 = vsel %vm1159_vm9, %v1162_v40, %v1164_v59 }
 0x137   : > { %v2768_v13 = vmul.f32 %v5634_v48, %v2760_v0  ;;  %v1092_v10 = vmul.f32 %v1091_v45, %v1089_v27  ;;  %v1212_v47 = vadd.s32 %v1210_v8, %v1204_v60  ;;  %v1214_v58 = vsel %vm1213_vm5, 1, %v4493_v53 }
 0x138   : > { %v1288_v51 = vand.u32 8388607, %v1281_v54  ;;  %v1291_v25 = vadd.s32 1, %v4107_v26  ;;  %v1208_v21 = vshrl.u32 %v1203_v50, 16  ;;  %v1096_v19 = vsel %vm973_vm12, %v1095_v61, %v5546_v6 }
 0x139   : > { %v5650_v22 = vadd.f32 -1.0, %v2768_v13  ;;  %v1093_v32 = vxor.u32 2147483648, %v1092_v10  ;;  %v1216_v55 = vadd.s32 %v1214_v58, %v1212_v47  ;;  %v5655_v3 = vadd.s32 %v1195_v49, %v1186_v11 }
 0x13a   : > { %v5657_v36 = vadd.s32 %v1211_v46, %v1207_v15  ;;  %vm1292_vm7 = vcmp.gt.s32.totalorder %v1291_v25, 0  ;;  %v5668_v6 = vsel %vm5629_vm0, 0, %v1096_v19  ;;  %v1219_v35 = vmul.u32 %v5556_v56, %v1165_v9 }
 0x13b   : > { %v2816_v1 = vmul.f32 2.0, %v5650_v22  ;;  %v1094_v40 = vsel %vm973_vm12, %v1093_v32, %v1092_v10  ;;  %v1217_v26 = vadd.s32 %v1216_v55, %v1206_v18  ;;  %v1293_v63 = vsel %vm1292_vm7, %v1291_v25, 0 }
 0x13c   : > { %v1097_v38 = vsel %vm5629_vm0, %v5623_v28, %v1094_v40  ;;  %v1295_v50 = vand.u32 31, %v1293_v63  ;;  %vm1221_vm8 = vc.u32 %v5655_v3, %v5657_v36  ;;  %v1289_v2 = vor.u32 8388608, %v1288_v51 }
 0x13d   : > { %v2824_v14 = vmul.f32 %v5650_v22, %v2816_v1  ;;  %v1099_v17 = vmul.f32 %v1097_v38, %v1097_v38  ;;  %v1218_v7 = vadd.s32 %v1217_v26, %v1208_v21  ;;  %v5675_v61 = vshrl.u32 %v1293_v63, 5 }
 0x13e   : > { %v5673_v60 = vsub.s32 32, %v1295_v50  ;;  %v1298_v42 = vshll.u32 %v4487_v29, %v1295_v50  ;;  %v1301_v39 = vshll.u32 %v4488_v31, %v1295_v50  ;;  %v1304_v11 = vshll.u32 %v4489_v33, %v1295_v50 }
 0x13f   : > { %v4154_v5 = vadd.f32 -1.0, %v2824_v14  ;;  %v1100_v23 = vmul.f32 -0.001358992, %v1099_v17  ;;  %v1107_v45 = vmul.f32 -0.00019511016, %v1099_v17  ;;  %v1222_v24 = vadd.s32 1, %v1218_v7 }
 0x140   : > { %v1299_v59 = vshrl.u32 %v4488_v31, %v5673_v60  ;;  %v1302_v27 = vshrl.u32 %v4489_v33, %v5673_v60  ;;  %v1305_v49 = vshrl.u32 %v6354_v12, %v5673_v60  ;;  %v1307_v18 = vshll.u32 %v6354_v12, %v1295_v50 }
 0x141   : > { %3080 = vmatpush.msrb.mxu0 %v4154_v5  ;;  %v1101_v56 = vadd.f32 0.041655596, %v1100_v23  ;;  %v1108_v15 = vadd.f32 0.008332121, %v1107_v45  ;;  %v1223_v0 = vsel %vm1221_vm8, %v1222_v24, %v1218_v7  ;;  %v2350_v10 = vand.u32 3, %v5668_v6 }
 0x142   : > { %v1224_v46 = vadd.s32 %v1223_v0, %v1219_v35  ;;  %v5688_v31 = vshll.u32 %v1289_v2, 8  ;;  %v1308_v9 = vshrl.u32 %v4491_v37, %v5673_v60  ;;  %v1310_v58 = vshll.u32 %v4491_v37, %v1295_v50 }
 0x143   : > { %v1102_v8 = vmul.f32 %v1101_v56, %v1099_v17  ;;  %v1109_v13 = vmul.f32 %v1108_v15, %v1099_v17  ;;  %v1311_v33 = vshrl.u32 %v6356_v52, %v5673_v60  ;;  %v5695_v32 = vor.u32 %v1299_v59, %v1298_v42 }
 0x144   : > { %v1225_v47 = vadd.s32 536870912, %v1224_v46  ;;  %v5697_v12 = vor.u32 %v1302_v27, %v1301_v39  ;;  %v5701_v55 = vor.u32 %v1305_v49, %v1304_v11  ;;  %v1309_v19 = vor.u32 %v1308_v9, %v1307_v18 }
 0x145   : > { %v1103_v51 = vadd.f32 -0.4999988, %v1102_v8  ;;  %v1110_v25 = vadd.f32 -0.16666654, %v1109_v13  ;;  %vm1313_vm4 = vcmp.lt.s32.totalorder %v5675_v61, 1  ;;  %vm1315_vm14 = vcmp.lt.s32.totalorder %v5675_v61, 3 }
 0x146   : > { %v5699_v21 = vshrl.u32 %v1225_v47, 30  ;;  %vm1316_vm15 = vcmp.lt.s32.totalorder %v5675_v61, 4  ;;  %vm2351_vm9 = vcmp.lt.s32.totalorder %v2350_v10, 2  ;;  %v1312_v52 = vor.u32 %v1311_v33, %v1310_v58 }
 0x147   : > { %v1104_v1 = vmul.f32 %v1103_v51, %v1099_v17  ;;  %v1111_v40 = vmul.f32 %v1110_v25, %v1099_v17  ;;  %vm2355_vm10 = vcmp.eq.s32.totalorder %v2350_v10, 2  ;;  %v1322_v50 = vsel %vm1316_vm15, %v1309_v19, 920167782 }
 0x148   : > { %v1227_v37 = vshll.u32 %v5699_v21, 30  ;;  %vm1314_vm11 = vcmp.lt.s32.totalorder %v5675_v61, 2  ;;  %v1321_v17 = vsel %vm1313_vm4, %v5695_v32, %v5697_v12  ;;  %v1323_v7 = vsel %vm1315_vm14, %v5701_v55, %v1322_v50 }
 0x149   : > { %v5707_v26 = vadd.f32 1.0, %v1104_v1  ;;  %v1112_v63 = vadd.f32 1.0, %v1111_v40  ;;  %vm2352_vm12 = vcmp.eq.s32.totalorder %v2350_v10, 0  ;;  %v1330_v5 = vand.u32 65535, %v5688_v31 }
 0x14a   : > { %v1228_v14 = vsub.s32 %v1224_v46, %v1227_v37  ;;  %v1325_v45 = vsel %vm1313_vm4, %v5697_v12, %v5701_v55  ;;  %v1326_v24 = vsel %vm1316_vm15, %v1312_v52, 1326507024  ;;  %v1324_v59 = vsel %vm1314_vm11, %v1321_v17, %v1323_v7 }
 0x14b   : > { %v5719_v35 = vmul.f32 %v1112_v63, %v1097_v38  ;;  %v1122_v2 = vxor.u32 2147483648, %v5707_v26  ;;  %v1327_v39 = vsel %vm1315_vm14, %v1309_v19, %v1326_v24  ;;  %vm1114_vm0 = vweird.f32 %v5623_v28 }
 0x14c   : > { %vm1229_vm13 = vcmp.lt.s32.totalorder %v1228_v14, 0  ;;  %v1230_v23 = vsub.s32 0, %v1228_v14  ;;  %v1328_v15 = vsel %vm1314_vm11, %v1325_v45, %v1327_v39  ;;  %v1331_v0 = vshrl.u32 %v5688_v31, 16 }
 0x14d   : > { %v1119_v42 = vxor.u32 2147483648, %v5719_v35  ;;  %v2357_v38 = vsel %vm2355_vm10, %v1122_v2, %v5719_v35  ;;  %v1332_v11 = vand.u32 65535, %v1328_v15  ;;  %v1333_v49 = vshrl.u32 %v1328_v15, 16 }
 0x14e   : > { %v1231_v56 = vsel %vm1229_vm13, %v1230_v23, %v1228_v14  ;;  %v1355_v8 = vshrl.u32 %v1324_v59, 16  ;;  %v1354_v51 = vand.u32 65535, %v1324_v59  ;;  %v1220_v25 = vadd.s32 %v5657_v36, %v5655_v3 }
 0x14f   : > { %v2354_v27 = vsel %vm2352_vm12, %v5707_v26, %v1119_v42  ;;  %v1232_v46 = vclz %v1231_v56  ;;  %v1335_v9 = vmul.u32 %v1333_v49, %v1330_v5  ;;  %v1336_v33 = vmul.u32 %v1332_v11, %v1331_v0 }
 0x150   : > { %v2358_v18 = vsel %vm2351_vm9, %v2354_v27, %v2357_v38  ;;  %v1334_v19 = vmul.u32 %v1332_v11, %v1330_v5  ;;  %v1337_v37 = vmul.u32 %v1333_v49, %v1331_v0  ;;  %v1357_v52 = vmul.u32 %v1355_v8, %v1330_v5 }
 0x151   : > { %v5747_v13 = vsel %vm1114_vm0, nan, %v2358_v18  ;;  %v4105_v47 = vadd.s32 4294967294, %v1232_v46  ;;  %v1338_v1 = vshll.u32 %v1335_v9, 16  ;;  %v1340_v7 = vshll.u32 %v1336_v33, 16 }
 0x152   : > { %v2705_v58 = vmul.f32 2.0, %v5747_v13  ;;  %v1356_v45 = vmul.u32 %v1354_v51, %v1330_v5  ;;  %v1358_v24 = vmul.u32 %v1354_v51, %v1331_v0  ;;  %v1359_v38 = vmul.u32 %v1355_v8, %v1331_v0 }
 0x153   : > { %vm4106_vm1 = vcmp.lt.s32.totalorder %v4105_v47, 0  ;;  %vm1342_vm2 = vc.u32 %v1334_v19, %v1338_v1  ;;  %v1344_v3 = vadd.s32 %v1338_v1, %v1334_v19  ;;  %v1339_v56 = vshrl.u32 %v1335_v9, 16 }
 0x154   : > { %v2713_v10 = vmul.f32 %v2705_v58, %v5747_v13  ;;  %v1235_v40 = vsel %vm4106_vm1, 0, %v4105_v47  ;;  %v1343_v15 = vsel %vm1342_vm2, 1, %v4493_v53  ;;  %v1360_v27 = vshll.u32 %v1357_v52, 16 }
 0x155   : > { %v1236_v63 = vsub.s32 32, %v1235_v40  ;;  %v1237_v50 = vshll.u32 %v1228_v14, %v1235_v40  ;;  %v1240_v17 = vsub.s32 4294967266, %v1235_v40  ;;  %v1345_v14 = vadd.s32 %v1343_v15, %v1337_v37 }
 0x156   : > { %v5753_v23 = vadd.f32 -1.0, %v2713_v10  ;;  %vm1346_vm5 = vc.u32 %v1344_v3, %v1340_v7  ;;  %v1297_v5 = vshrl.u32 %v4487_v29, %v5673_v60  ;;  %v1362_v18 = vshll.u32 %v1358_v24, 16 }
 0x157   : > { %v1238_v59 = vshrl.u32 %v1220_v25, %v1236_v63  ;;  %v1241_v39 = vadd.s32 127, %v1240_v17  ;;  %v1347_v0 = vsel %vm1346_vm5, 1, %v4493_v53  ;;  %vm1364_vm7 = vc.u32 %v1356_v45, %v1360_v27 }
 0x158   : > { %v2761_v36 = vmul.f32 2.0, %v5753_v23  ;;  %v1349_v58 = vadd.s32 %v1347_v0, %v1345_v14  ;;  %v1318_v51 = vsel %vm1316_vm15, %v5701_v55, 2102212464  ;;  %v1365_v25 = vsel %vm1364_vm7, 1, %v4493_v53 }
 0x159   : > { %v1239_v46 = vor.u32 %v1238_v59, %v1237_v50  ;;  %v1242_v11 = vshll.u32 %v1241_v39, 23  ;;  %v1366_v19 = vadd.s32 %v1360_v27, %v1356_v45  ;;  %v1341_v10 = vshrl.u32 %v1336_v33, 16 }
 0x15a   : > { %v2769_v49 = vmul.f32 %v5753_v23, %v2761_v36  ;;  %v1350_v40 = vadd.s32 %v1349_v58, %v1339_v56  ;;  %v1367_v29 = vadd.s32 %v1365_v25, %v1359_v38  ;;  %v1361_v37 = vshrl.u32 %v1357_v52, 16 }
 0x15b   : > { %v1243_v8 = vor.u32 4788187, %v1242_v11  ;;  %v1246_v47 = vcvt.s32.f32 %v1239_v46  ;;  %vm1368_vm8 = vc.u32 %v1366_v19, %v1362_v18  ;;  %v1317_v50 = vsel %vm1313_vm4, %v1297_v5, %v5695_v32 }
 0x15c   : > { %v5761_v9 = vadd.f32 -1.0, %v2769_v49  ;;  %v1319_v55 = vsel %vm1315_vm14, %v5697_v12, %v1318_v51  ;;  %v1369_v17 = vsel %vm1368_vm8, 1, %v4493_v53  ;;  %vm1128_vm15 = vcmp.lt.s32.totalorder %v5451_v44, 0 }
 0x15d   : > { %v1244_v1 = vand.u32 2147483647, %v1243_v8  ;;  %v1363_v33 = vshrl.u32 %v1358_v24, 16  ;;  %v1371_v45 = vadd.s32 %v1369_v17, %v1367_v29  ;;  %vm5779_vm9 = vcmp.le.f32.partialorder %v1126_v43, 0.7853982 }
 0x15e   : > { %v2817_v60 = vmul.f32 2.0, %v5761_v9  ;;  %v1351_v32 = vadd.s32 %v1350_v40, %v1341_v10  ;;  %v1370_v59 = vadd.s32 %v1366_v19, %v1362_v18  ;;  %v1320_v12 = vsel %vm1314_vm11, %v1317_v50, %v1319_v55 }
 0x15f   : > { %v1247_v63 = vmul.f32 %v1246_v47, %v1244_v1  ;;  %v1372_v53 = vadd.s32 %v1371_v45, %v1361_v37  ;;  %v1250_v24 = vsub.s32 4, %v5699_v21  ;;  %v1374_v15 = vmul.u32 %v5688_v31, %v1320_v12 }
 0x160   : > { %v2825_v7 = vmul.f32 %v5761_v9, %v2817_v60  ;;  %vm1376_vm4 = vc.u32 %v1351_v32, %v1370_v59  ;;  %vm1269_vm13 = vweird.f32 %v5451_v44  ;;  %vm5827_vm2 = vcmp.le.f32.partialorder %v1281_v54, 0.7853982 }
 0x161   : > { %v1248_v38 = vxor.u32 2147483648, %v1247_v63  ;;  %v1373_v36 = vadd.s32 %v1372_v53, %v1363_v33  ;;  %v1251_v11 = vsel %vm1128_vm15, %v1250_v24, %v5699_v21  ;;  %v1375_v53 = vadd.s32 %v1370_v59, %v1351_v32 }
 0x162   : > { %v4155_v39 = vadd.f32 -1.0, %v2825_v7  ;;  %v1253_v18 = vsel %vm5779_vm9, 0, %v1251_v11  ;;  %vm1283_vm5 = vcmp.lt.s32.totalorder %v5535_v20, 0 }
 0x163   : > { %v1249_v3 = vsel %vm1128_vm15, %v1248_v38, %v1247_v63  ;;  %v1377_v27 = vadd.s32 1, %v1373_v36  ;;  %v2504_v19 = vand.u32 3, %v1253_v18  ;;  %v1270_v32 = vadd.s32 3, %v1253_v18 }
 0x164   : > { %3109 = vmatpush.msrb.mxu1 %v4155_v39  ;;  %v1252_v43 = vsel %vm5779_vm9, %v5451_v44, %v1249_v3 }
 0x165   : > { %v1254_v56 = vmul.f32 %v1252_v43, %v1252_v43  ;;  %v1378_v14 = vsel %vm1376_vm4, %v1377_v27, %v1373_v36  ;;  %vm2509_vm14 = vcmp.eq.s32.totalorder %v2504_v19, 2  ;;  %vm2506_vm11 = vcmp.eq.s32.totalorder %v2504_v19, 0 }
 0x166   : > { %v1379_v0 = vadd.s32 %v1378_v14, %v1374_v15  ;;  %vm2505_vm12 = vcmp.lt.s32.totalorder %v2504_v19, 2  ;;  %v1271_v18 = vand.u32 3, %v1270_v32 }
 0x167   : > { %v1255_v46 = vmul.f32 -0.001358992, %v1254_v56  ;;  %v1262_v61 = vmul.f32 -0.00019511016, %v1254_v56 }
 0x168   : > { %v1380_v58 = vadd.s32 536870912, %v1379_v0 }
 0x169   : > { %v1256_v49 = vadd.f32 0.041655596, %v1255_v46  ;;  %v1263_v5 = vadd.f32 0.008332121, %v1262_v61 }
 0x16a   : > { %v5797_v25 = vshrl.u32 %v1380_v58, 30 }
 0x16b   : > { %v1257_v8 = vmul.f32 %v1256_v49, %v1254_v56  ;;  %v1264_v47 = vmul.f32 %v1263_v5, %v1254_v56  ;;  %v960_v49 = vadd.s32 3, %v5506_v62  ;;  %v1115_v5 = vadd.s32 3, %v5668_v6 }
 0x16c   : > { %v1382_v40 = vshll.u32 %v5797_v25, 30  ;;  %v1405_v6 = vsub.s32 4, %v5797_v25 }
 0x16d   : > { %v1258_v51 = vadd.f32 -0.4999988, %v1257_v8  ;;  %v1265_v31 = vadd.f32 -0.16666654, %v1264_v47  ;;  %v961_v58 = vand.u32 3, %v960_v49  ;;  %v5890_v49 = vld [vmem:[#allocation6 + $0x20] sm:$0xff] }
 0x16e   : > { %v1383_v60 = vsub.s32 %v1379_v0, %v1382_v40  ;;  %v1406_v30 = vsel %vm1283_vm5, %v1405_v6, %v5797_v25  ;;  %4160 = vmatmul.msk.f32.gmra.mxu0 %vm2944_vm6, %v5890_v49  ;;  %4164 = vmatmul.msk.f32.gmra.mxu1 %vm2944_vm6, %v5890_v49 }
 0x16f   : > { %v1259_v1 = vmul.f32 %v1258_v51, %v1254_v56  ;;  %v1266_v10 = vmul.f32 %v1265_v31, %v1254_v56  ;;  %v1116_v51 = vand.u32 3, %v1115_v5  ;;  %vm963_vm7 = vcmp.eq.s32.totalorder %v961_v58, 0  ;;  %4168 = vmatmul.msk.f32.gmra.mxu2 %vm2944_vm6, %v5890_v49  ;;  %4172 = vmatmul.msk.f32.gmra.mxu3 %vm2944_vm6, %v5890_v49 }
 0x170   : > { %vm1384_vm10 = vcmp.lt.s32.totalorder %v1383_v60, 0  ;;  %v1385_v50 = vsub.s32 0, %v1383_v60  ;;  %vm966_vm8 = vcmp.eq.s32.totalorder %v961_v58, 2  ;;  %vm962_vm4 = vcmp.lt.s32.totalorder %v961_v58, 2 }
 0x171   : > { %v5800_v21 = vadd.f32 1.0, %v1259_v1  ;;  %v1267_v29 = vadd.f32 1.0, %v1266_v10  ;;  %vm1118_vm15 = vcmp.eq.s32.totalorder %v1116_v51, 0  ;;  %vm1121_vm9 = vcmp.eq.s32.totalorder %v1116_v51, 2 }
 0x172   : > { %v1386_v7 = vsel %vm1384_vm10, %v1385_v50, %v1383_v60  ;;  %v965_v1 = vsel %vm963_vm7, %v5581_v57, %v964_v41  ;;  %v968_v10 = vsel %vm966_vm8, %v967_v34, %v5588_v4  ;;  %v1120_v40 = vsel %vm1118_vm15, %v5707_v26, %v1119_v42 }
 0x173   : > { %v5802_v37 = vmul.f32 %v1267_v29, %v1252_v43  ;;  %v1277_v63 = vxor.u32 2147483648, %v5800_v21  ;;  %v1387_v33 = vclz %v1386_v7  ;;  %v1123_v29 = vsel %vm1121_vm9, %v1122_v2, %v5719_v35 }
 0x174   : > { %vm1272_vm10 = vcmp.lt.s32.totalorder %v1271_v18, 2  ;;  %vm1424_vm7 = vweird.f32 %v5535_v20  ;;  %vm3965_vm8 = vcmask 1042434   ;;  %vm3963_vm15 = vcmask 1040384  }
 0x175   : > { %v1274_v55 = vxor.u32 2147483648, %v5802_v37  ;;  %v2511_v17 = vsel %vm2509_vm14, %v1277_v63, %v5802_v37  ;;  %v4108_v38 = vadd.s32 4294967294, %v1387_v33  ;;  %vm1117_vm14 = vcmp.lt.s32.totalorder %v1116_v51, 2 }
 0x176   : > { %v1124_v7 = vsel %vm1117_vm14, %v1120_v40, %v1123_v29  ;;  %v5910_v29 = vld [vmem:[#allocation6 + $0x30] sm:$0xff]  ;;  %vm3969_vm9 = vcmask 1044484   ;;  %vm3967_vm14 = vcmask 1041408  }
 0x177   : > { %v2508_v45 = vsel %vm2506_vm11, %v5800_v21, %v1274_v55  ;;  %vm4109_vm1 = vcmp.lt.s32.totalorder %v4108_v38, 0  ;;  %v5855_v57 = vsel %vm1114_vm0, nan, %v1124_v7  ;;  %vm1273_vm11 = vcmp.eq.s32.totalorder %v1271_v18, 0  ;;  %4161 = vmatmul.msk.f32.gmra.mxu0 %vm2944_vm6, %v5910_v29  ;;  %4165 = vmatmul.msk.f32.gmra.mxu1 %vm2944_vm6, %v5910_v29 }
 0x178   : > { %v2512_v52 = vsel %vm2505_vm12, %v2508_v45, %v2511_v17  ;;  %v1390_v3 = vsel %vm4109_vm1, 0, %v4108_v38  ;;  %v969_v17 = vsel %vm962_vm4, %v965_v1, %v968_v10  ;;  %v2689_v35 = vmul.f32 2.0, %v5855_v57  ;;  %4169 = vmatmul.msk.f32.gmra.mxu2 %vm2944_vm6, %v5910_v29  ;;  %4173 = vmatmul.msk.f32.gmra.mxu3 %vm2944_vm6, %v5910_v29 }
 0x179   : > { %v5815_v39 = vsel %vm1269_vm13, nan, %v2512_v52  ;;  %v1391_v43 = vsub.s32 32, %v1390_v3  ;;  %v1392_v36 = vshll.u32 %v1383_v60, %v1390_v3  ;;  %v1395_v56 = vsub.s32 4294967266, %v1390_v3 }
 0x17a   : > { %v2706_v12 = vmul.f32 2.0, %v5815_v39  ;;  %v5851_v41 = vsel %vm959_vm3, nan, %v969_v17  ;;  %v1275_v42 = vsel %vm1273_vm11, %v5800_v21, %v1274_v55  ;;  %vm1276_vm3 = vcmp.eq.s32.totalorder %v1271_v18, 2 }
 0x17b   : > { %v1393_v27 = vshrl.u32 %v1375_v53, %v1391_v43  ;;  %v1396_v46 = vadd.s32 127, %v1395_v56  ;;  %v2688_v26 = vmul.f32 2.0, %v5851_v41  ;;  %v5874_v52 = vmul.f32 %v2689_v35, %v5747_v13 }
 0x17c   : > { %v2714_v24 = vmul.f32 %v2706_v12, %v5815_v39  ;;  %v1278_v25 = vsel %vm1276_vm3, %v1277_v63, %v5802_v37  ;;  %vm3971_vm4 = vcmask 1046534   ;;  %vm3975_vm11 = vcmask 1043456  }
 0x17d   : > { %v1394_v11 = vor.u32 %v1393_v27, %v1392_v36  ;;  %v1397_v14 = vshll.u32 %v1396_v46, 23  ;;  %v5871_v45 = vmul.f32 %v2688_v26, %v5618_v16  ;;  %v1279_v38 = vsel %vm1272_vm10, %v1275_v42, %v1278_v25  ;;  %v4348_v42 = vld [vmem:[%s4609_s6 + $0x30] sm:$0xff] }
 0x17e   : > { %v5819_v15 = vadd.f32 -1.0, %v2714_v24  ;;  %v2745_v55 = vmul.f32 2.0, %v5874_v52  ;;  %v1408_v24 = vsel %vm5827_vm2, 0, %v1406_v30  ;;  %v5885_v43 = vsel %vm1269_vm13, nan, %v1279_v38  ;;  %v4350_v38 = vld [vmem:[%s4609_s6 + $0x38] sm:$0xff] }
 0x17f   : > { %v1398_v0 = vor.u32 4788187, %v1397_v14  ;;  %v1401_v8 = vcvt.s32.f32 %v1394_v11  ;;  %v2744_v3 = vmul.f32 2.0, %v5871_v45  ;;  %v2690_v37 = vmul.f32 2.0, %v5885_v43 }
 0x180   : > { %v2762_v61 = vmul.f32 2.0, %v5819_v15  ;;  %v2753_v21 = vmul.f32 %v5753_v23, %v2745_v55  ;;  %v1425_v63 = vadd.s32 3, %v1408_v24  ;;  %vm3973_vm10 = vcmask 1045508  }
 0x181   : > { %v1399_v62 = vand.u32 2147483647, %v1398_v0  ;;  %v2752_v27 = vmul.f32 %v5634_v48, %v2744_v3  ;;  %v5893_v5 = vmul.f32 %v2690_v37, %v5815_v39  ;;  %v3032_v3 = vpop.f32.mrf.mxu2 }
 0x182   : > { %v2770_v59 = vmul.f32 %v5819_v15, %v2762_v61  ;;  %v2801_v14 = vmul.f32 2.0, %v2753_v21  ;;  %v1426_v58 = vand.u32 3, %v1425_v63 }
 0x183   : > { %v1402_v54 = vmul.f32 %v1401_v8, %v1399_v62  ;;  %v2800_v11 = vmul.f32 2.0, %v2752_v27  ;;  %v2658_v8 = vand.u32 3, %v1408_v24  ;;  %v2746_v47 = vmul.f32 2.0, %v5893_v5  ;;  %v5963_v24 = vld [vmem:[#allocation6 + $0x8] sm:$0xff] }
 0x184   : > { %v5832_v31 = vadd.f32 -1.0, %v2770_v59  ;;  %v2809_v0 = vmul.f32 %v5761_v9, %v2801_v14  ;;  %vm1431_vm12 = vcmp.eq.s32.totalorder %v1426_v58, 2  ;;  %3534 = vrot.lane.b32.xlu2 %v5963_v24, %s4494_s17 }
 0x185   : > { %v1403_v50 = vxor.u32 2147483648, %v1402_v54  ;;  %v2808_v59 = vmul.f32 %v5650_v22, %v2800_v11  ;;  %v2754_v6 = vmul.f32 %v5819_v15, %v2746_v47  ;;  %vm2663_vm0 = vcmp.eq.s32.totalorder %v2658_v8, 2 }
 0x186   : > { %v2818_v19 = vmul.f32 2.0, %v5832_v31  ;;  %3110 = vmatpush.msrb.mxu1 %v2809_v0  ;;  %vm2659_vm13 = vcmp.lt.s32.totalorder %v2658_v8, 2  ;;  %vm2660_vm1 = vcmp.eq.s32.totalorder %v2658_v8, 0 }
 0x187   : > { %v1404_v34 = vsel %vm1283_vm5, %v1403_v50, %v1402_v54  ;;  %3081 = vmatpush.msrb.mxu0 %v2808_v59  ;;  %v2802_v54 = vmul.f32 2.0, %v2754_v6  ;;  %vm1427_vm5 = vcmp.lt.s32.totalorder %v1426_v58, 2 }
 0x188   : > { %v2826_v60 = vmul.f32 %v5832_v31, %v2818_v19  ;;  %v1407_v2 = vsel %vm5827_vm2, %v5535_v20, %v1404_v34  ;;  %3111 = vmatpush.msrb.mxu1 %v5761_v9  ;;  %vm1428_vm2 = vcmp.eq.s32.totalorder %v1426_v58, 0 }
 0x189   : > { %v1409_v33 = vmul.f32 %v1407_v2, %v1407_v2  ;;  %3082 = vmatpush.msrb.mxu0 %v5650_v22  ;;  %v2810_v40 = vmul.f32 %v5832_v31, %v2802_v54 }
 0x18a   : > { %v4156_v4 = vadd.f32 -1.0, %v2826_v60  ;;  %3112 = vmatpush.msrb.mxu1 %v2753_v21 }
 0x18b   : > { %v1410_v12 = vmul.f32 -0.001358992, %v1409_v33  ;;  %v1417_v53 = vmul.f32 -0.00019511016, %v1409_v33  ;;  %3083 = vmatpush.msrb.mxu0 %v2752_v27 }
 0x18c   : > { %3138 = vmatpush.msrb.mxu2 %v4156_v4  ;;  %3113 = vmatpush.msrb.mxu1 %v5753_v23 }
 0x18d   : > { %v1411_v36 = vadd.f32 0.041655596, %v1410_v12  ;;  %v1418_v56 = vadd.f32 0.008332121, %v1417_v53  ;;  %3084 = vmatpush.msrb.mxu0 %v5634_v48  ;;  %v2974_v12 = vpop.f32.mrf.mxu0  ;;  %v3003_v53 = vpop.f32.mrf.mxu1 }
 0x18e   : > { %3139 = vmatpush.msrb.mxu2 %v2810_v40  ;;  %3114 = vmatpush.msrb.mxu1 %v5874_v52  ;;  %v4349_v52 = vld [vmem:[#allocation6 + $0x10] sm:$0xff]  ;;  %v3189_v0 = vmax.f32 %v2974_v12, 0.0  ;;  %v3190_v47 = vmax.f32 %v3003_v53, 0.0  ;;  %v3191_v40 = vmax.f32 %v3032_v3, 0.0 }
 0x18f   : > { %v1412_v46 = vmul.f32 %v1411_v36, %v1409_v33  ;;  %v1419_v61 = vmul.f32 %v1418_v56, %v1409_v33  ;;  %3085 = vmatpush.msrb.mxu0 %v5871_v45  ;;  %v3035_v56 = vpop.f32.mrf.mxu2 }
 0x190   : > { %3140 = vmatpush.msrb.mxu2 %v5832_v31  ;;  %3115 = vmatpush.msrb.mxu1 %v5747_v13  ;;  %v4347_v13 = vld [vmem:[#allocation6] sm:$0xff] }
 0x191   : > { %v1413_v44 = vadd.f32 -0.4999988, %v1412_v46  ;;  %v1420_v32 = vadd.f32 -0.16666654, %v1419_v61  ;;  %3086 = vmatpush.msrb.mxu0 %v5618_v16 }
 0x192   : > { %3141 = vmatpush.msrb.mxu2 %v2754_v6  ;;  %3116 = vmatpush.msrb.mxu1 %v5855_v57 }
 0x193   : > { %v1414_v51 = vmul.f32 %v1413_v44, %v1409_v33  ;;  %v1421_v62 = vmul.f32 %v1420_v32, %v1409_v33  ;;  %3087 = vmatpush.msrb.mxu0 %v5851_v41 }
 0x194   : > { %3142 = vmatpush.msrb.mxu2 %v5819_v15  ;;  %3117 = vmatpush.msrb.mxu1 %v5623_v28 }
 0x195   : > { %v1415_v18 = vadd.f32 1.0, %v1414_v51  ;;  %v1422_v19 = vadd.f32 1.0, %v1421_v62  ;;  %4178 = vmatmul.msk.f32.vlgmr.msrb.gmra.mxu1 %vm2944_vm6, %v4347_v13  ;;  %v3006_v36 = vpop.f32.mrf.mxu1 }
 0x196   : > { %3143 = vmatpush.msrb.mxu2 %v5893_v5  ;;  %v3198_v59 = vmax.f32 %v3006_v36, 0.0 }
 0x197   : > { %v1423_v1 = vmul.f32 %v1422_v19, %v1407_v2  ;;  %v1432_v10 = vxor.u32 2147483648, %v1415_v18  ;;  %v4346_v2 = vld [vmem:[%s4609_s6 + $0x20] sm:$0xff] }
 0x198   : > { %3088 = vmatpush.msrb.mxu0 %v4346_v2  ;;  %3144 = vmatpush.msrb.mxu2 %v5815_v39 }
 0x199   : > { %v1429_v60 = vxor.u32 2147483648, %v1423_v1  ;;  %v2665_v50 = vsel %vm2663_vm0, %v1432_v10, %v1423_v1  ;;  %v1433_v22 = vsel %vm1431_vm12, %v1432_v10, %v1423_v1  ;;  %4174 = vmatmul.msk.f32.vlgmr.msrb.gmra.mxu0 %vm2944_vm6, %v4347_v13  ;;  %v3199_v1 = vmax.f32 %v3035_v56, 0.0 }
 0x19a   : > { %3145 = vmatpush.msrb.mxu2 %v5885_v43  ;;  %v3061_v55 = vpop.f32.mrf.mxu3  ;;  %v2977_v43 = vpop.f32.mrf.mxu0 }
 0x19b   : > { %v2662_v9 = vsel %vm2660_vm1, %v1415_v18, %v1429_v60  ;;  %v1430_v17 = vsel %vm1428_vm2, %v1415_v18, %v1429_v60  ;;  %v3197_v32 = vmax.f32 %v2977_v43, 0.0  ;;  %v3192_v60 = vmax.f32 %v3061_v55, 0.0 }
 0x19c   : > { %v2666_v7 = vsel %vm2659_vm13, %v2662_v9, %v2665_v50  ;;  %v1434_v4 = vsel %vm1427_vm5, %v1430_v17, %v1433_v22  ;;  %3146 = vmatpush.msrb.mxu2 %v4348_v42  ;;  %v4495_v17 = vmov 64  }
 0x19d   : > { %v2667_v20 = vsel %vm1424_vm7, nan, %v2666_v7  ;;  %v1435_v48 = vsel %vm1424_vm7, nan, %v1434_v4  ;;  %4182 = vmatmul.msk.f32.vlgmr.msrb.gmra.mxu2 %vm2944_vm6, %v4347_v13  ;;  %4179 = vmatmul.msk.f32.gmra.mxu1 %vm2944_vm6, %v4349_v52  ;;  %v5988_v7 = vld [vmem:[#allocation6 + $0x28] sm:$0xff] }
 0x19e   : > { %v2707_v23 = vmul.f32 2.0, %v2667_v20  ;;  %v2691_v34 = vmul.f32 2.0, %v1435_v48  ;;  %4332 = vset.pattern.permute.xlu1 %v4495_v17  ;;  %4331 = vset.pattern.permute.xlu0 %v4495_v17 }
 0x1a0   : > { %v2715_v26 = vmul.f32 %v2707_v23, %v2667_v20  ;;  %v2699_v35 = vmul.f32 %v2691_v34, %v2667_v20  ;;  %v5998_v23 = vld [vmem:[#allocation6 + $0x38] sm:$0xff] }
 0x1a1   : > { %4175 = vmatmul.msk.f32.gmra.mxu0 %vm2944_vm6, %v4349_v52  ;;  %3242 = vperm.xlu0 %4331, %v5998_v23  }
 0x1a2   : > { %v4141_v31 = vadd.f32 -1.0, %v2715_v26  ;;  %v2747_v30 = vmul.f32 2.0, %v2699_v35  ;;  %v3064_v27 = vpop.f32.mrf.mxu3 }
 0x1a3   : > { %v3200_v10 = vmax.f32 %v3064_v27, 0.0 }
 0x1a4   : > { %v2763_v16 = vmul.f32 2.0, %v4141_v31  ;;  %v2755_v41 = vmul.f32 %v4141_v31, %v2747_v30 }
 0x1a5   : > { %4183 = vmatmul.msk.f32.gmra.mxu2 %vm2944_vm6, %v4349_v52  ;;  %4180 = vmatmul.msk.f32.gmra.mxu1 %vm2944_vm6, %v5890_v49 }
 0x1a6   : > { %v2771_v15 = vmul.f32 %v4141_v31, %v2763_v16  ;;  %v2803_v45 = vmul.f32 2.0, %v2755_v41 }
 0x1a8   : > { %v4149_v57 = vadd.f32 -1.0, %v2771_v15 }
 0x1a9   : > { %4176 = vmatmul.msk.f32.gmra.mxu0 %vm2944_vm6, %v5890_v49  ;;  %3237 = vperm.xlu0 %4331, %v5988_v7  }
 0x1aa   : > { %v2819_v33 = vmul.f32 2.0, %v4149_v57  ;;  %v2811_v25 = vmul.f32 %v4149_v57, %v2803_v45 }
 0x1ac   : > { %v2827_v28 = vmul.f32 %v4149_v57, %v2819_v33 }
 0x1ad   : > { %4184 = vmatmul.msk.f32.gmra.mxu2 %vm2944_vm6, %v5890_v49  ;;  %4181 = vmatmul.msk.f32.gmra.mxu1 %vm2944_vm6, %v5910_v29 }
 0x1ae   : > { %v4157_v39 = vadd.f32 -1.0, %v2827_v28 }
 0x1b0   : > { %3167 = vmatpush.msrb.mxu3 %v4157_v39 }
 0x1b1   : > { %4177 = vmatmul.msk.f32.gmra.mxu0 %vm2944_vm6, %v5910_v29  ;;  %3538 = vrot.lane.b32.xlu0 %v5988_v7, %s4494_s17 }
 0x1b2   : > { %3168 = vmatpush.msrb.mxu3 %v2811_v25 }
 0x1b4   : > { %3169 = vmatpush.msrb.mxu3 %v4149_v57 }
 0x1b5   : > { %4185 = vmatmul.msk.f32.gmra.mxu2 %vm2944_vm6, %v5910_v29 }
 0x1b6   : > { %3170 = vmatpush.msrb.mxu3 %v2755_v41 }
 0x1b8   : > { %3171 = vmatpush.msrb.mxu3 %v4141_v31 }
 0x1ba   : > { %3172 = vmatpush.msrb.mxu3 %v2699_v35 }
 0x1bc   : > { %3173 = vmatpush.msrb.mxu3 %v2667_v20 }
 0x1be   : > { %3174 = vmatpush.msrb.mxu3 %v1435_v48 }
 0x1c0   : > { %3175 = vmatpush.msrb.mxu3 %v4350_v38 }
 0x1c1   : > { %4186 = vmatmul.msk.f32.vlgmr.msrb.gmra.mxu3 %vm2944_vm6, %v4347_v13 }
 0x1c9   : > { %4187 = vmatmul.msk.f32.gmra.mxu3 %vm2944_vm6, %v4349_v52 }
 0x1d1   : > { %4188 = vmatmul.msk.f32.gmra.mxu3 %vm2944_vm6, %v5890_v49 }
 0x1d9   : > { %4189 = vmatmul.msk.f32.gmra.mxu3 %vm2944_vm6, %v5910_v29  ;;  %vm3245_vm6 = vcmask 261120   ;;  %v5975_v29 = vld [vmem:[#allocation6 + $0x18] sm:$0xff] }
 0x1da   : > { %3536 = vrot.lane.b32.xlu2 %v5975_v29, %s4494_s17  ;;  %3232 = vperm.xlu1 %4332, %v5975_v29  }
 0x1e2   : > { %3227 = vperm.xlu1 %4332, %v5963_v24  }
 0x1ea   : > { %3540 = vrot.lane.b32.xlu1 %v5998_v23, %s4494_s17 }
 0x1eb   : > { %v2980_v21 = vpop.f32.mrf.mxu0  ;;  %v3009_v37 = vpop.f32.mrf.mxu1 }
 0x1ec   : > { %v3205_v11 = vmax.f32 %v2980_v21, 0.0  ;;  %v3206_v5 = vmax.f32 %v3009_v37, 0.0 }
 0x1f2   : > { %v3038_v63 = vpop.f32.mrf.mxu2  ;;  %v3067_v46 = vpop.f32.mrf.mxu3 }
 0x1f3   : > { %v3207_v6 = vmax.f32 %v3038_v63, 0.0  ;;  %v3208_v19 = vmax.f32 %v3067_v46, 0.0 }
 0x1f4   : > { %v2983_v61 = vpop.f32.mrf.mxu0  ;;  %v3012_v49 = vpop.f32.mrf.mxu1 }
 0x1f5   : > { %v3213_v14 = vmax.f32 %v2983_v61, 0.0  ;;  %v3214_v44 = vmax.f32 %v3012_v49, 0.0 }
 0x1f7   : > { %3266 = vmatpush.msra.mxu0 %v3213_v14  ;;  %3295 = vmatpush.msra.mxu1 %v3214_v44 }
 0x1f9   : > { %3267 = vmatpush.msra.mxu0 %v3205_v11  ;;  %3296 = vmatpush.msra.mxu1 %v3206_v5 }
 0x1fb   : > { %v3041_v8 = vpop.f32.mrf.mxu2  ;;  %3268 = vmatpush.msra.mxu0 %v3197_v32  ;;  %v3070_v51 = vpop.f32.mrf.mxu3  ;;  %3297 = vmatpush.msra.mxu1 %v3198_v59 }
 0x1fc   : > { %v3215_v58 = vmax.f32 %v3041_v8, 0.0  ;;  %v3216_v62 = vmax.f32 %v3070_v51, 0.0 }
 0x1fd   : > { %3269 = vmatpush.msra.mxu0 %v3189_v0  ;;  %3298 = vmatpush.msra.mxu1 %v3190_v47 }
 0x1fe   : > { %3324 = vmatpush.msra.mxu2 %v3215_v58  ;;  %3353 = vmatpush.msra.mxu3 %v3216_v62 }
 0x1ff   : > { %4190 = vmatmul.msk.f32.vlgmr.msra.gmra.mxu0 %vm3245_vm6, %v5963_v24  ;;  %4194 = vmatmul.msk.f32.vlgmr.msra.gmra.mxu1 %vm3245_vm6, %v5963_v24 }
 0x200   : > { %3325 = vmatpush.msra.mxu2 %v3207_v6  ;;  %3354 = vmatpush.msra.mxu3 %v3208_v19 }
 0x202   : > { %3326 = vmatpush.msra.mxu2 %v3199_v1  ;;  %3355 = vmatpush.msra.mxu3 %v3200_v10 }
 0x204   : > { %3327 = vmatpush.msra.mxu2 %v3191_v40  ;;  %3356 = vmatpush.msra.mxu3 %v3192_v60 }
 0x205   : > { %4198 = vmatmul.msk.f32.vlgmr.msra.gmra.mxu2 %vm3245_vm6, %v5963_v24  ;;  %4202 = vmatmul.msk.f32.vlgmr.msra.gmra.mxu3 %vm3245_vm6, %v5963_v24 }
 0x207   : > { %4191 = vmatmul.msk.f32.gmra.mxu0 %vm3245_vm6, %v5975_v29  ;;  %4195 = vmatmul.msk.f32.gmra.mxu1 %vm3245_vm6, %v5975_v29 }
 0x20d   : > { %4199 = vmatmul.msk.f32.gmra.mxu2 %vm3245_vm6, %v5975_v29  ;;  %4203 = vmatmul.msk.f32.gmra.mxu3 %vm3245_vm6, %v5975_v29 }
 0x20f   : > { %4192 = vmatmul.msk.f32.gmra.mxu0 %vm3245_vm6, %v5988_v7  ;;  %4196 = vmatmul.msk.f32.gmra.mxu1 %vm3245_vm6, %v5988_v7 }
 0x212   : > { %v5969_v54 = vpop.f32.mrf.mxu1 }
 0x213   : > { %v3194_v57 = vmax.f32 %v5969_v54, 0.0  ;;  %v6053_v37 = vpop.permute.xlu0 %3242 }
 0x215   : > { %4200 = vmatmul.msk.f32.gmra.mxu2 %vm3245_vm6, %v5988_v7  ;;  %4204 = vmatmul.msk.f32.gmra.mxu3 %vm3245_vm6, %v5988_v7 }
 0x216   : > { %v5967_v18 = vpop.f32.mrf.mxu0 }
 0x217   : > { %4193 = vmatmul.msk.f32.gmra.mxu0 %vm3245_vm6, %v5998_v23  ;;  %4197 = vmatmul.msk.f32.gmra.mxu1 %vm3245_vm6, %v5998_v23  ;;  %v3193_v41 = vmax.f32 %v5967_v18, 0.0 }
 0x21a   : > { %v3122_v22 = vpop.f32.mrf.mxu1 }
 0x21b   : > { %v3202_v15 = vmax.f32 %v3122_v22, 0.0  ;;  %v6057_v5 = vpop.permute.xlu0 %3237 }
 0x21d   : > { %4201 = vmatmul.msk.f32.gmra.mxu2 %vm3245_vm6, %v5998_v23  ;;  %4205 = vmatmul.msk.f32.gmra.mxu3 %vm3245_vm6, %v5998_v23 }
 0x21e   : > { %v3093_v50 = vpop.f32.mrf.mxu0 }
 0x21f   : > { %v3201_v13 = vmax.f32 %v3093_v50, 0.0 }
 0x220   : > { %v3148_v9 = vpop.f32.mrf.mxu2 }
 0x221   : > { %v3195_v39 = vmax.f32 %v3148_v9, 0.0  ;;  %v6069_v9 = vpop.permute.xlu2 %3534 }
 0x222   : > { %v3125_v20 = vpop.f32.mrf.mxu1 }
 0x223   : > { %v3210_v30 = vmax.f32 %v3125_v20, 0.0 }
 0x226   : > { %v3096_v4 = vpop.f32.mrf.mxu0 }
 0x227   : > { %v3209_v26 = vmax.f32 %v3096_v4, 0.0 }
 0x228   : > { %v3151_v48 = vpop.f32.mrf.mxu2 }
 0x229   : > { %v3203_v52 = vmax.f32 %v3151_v48, 0.0 }
 0x22a   : > { %v3128_v31 = vpop.f32.mrf.mxu1 }
 0x22b   : > { %v3218_v2 = vmax.f32 %v3128_v31, 0.0 }
 0x22d   : > { %3411 = vmatpush.msrb.mxu1 %v3218_v2 }
 0x22e   : > { %v3099_v34 = vpop.f32.mrf.mxu0 }
 0x22f   : > { %v3217_v35 = vmax.f32 %v3099_v34, 0.0  ;;  %3412 = vmatpush.msrb.mxu1 %v3210_v30 }
 0x230   : > { %v3154_v16 = vpop.f32.mrf.mxu2 }
 0x231   : > { %3382 = vmatpush.msrb.mxu0 %v3217_v35  ;;  %3413 = vmatpush.msrb.mxu1 %v3202_v15  ;;  %v3211_v28 = vmax.f32 %v3154_v16, 0.0 }
 0x233   : > { %3383 = vmatpush.msrb.mxu0 %v3209_v26  ;;  %3414 = vmatpush.msrb.mxu1 %v3194_v57 }
 0x234   : > { %4210 = vmatmul.msk.f32.vlgmr.msrb.gmra.mxu1 %vm3245_vm6, %v5963_v24 }
 0x235   : > { %3384 = vmatpush.msrb.mxu0 %v3201_v13 }
 0x237   : > { %3385 = vmatpush.msrb.mxu0 %v3193_v41 }
 0x238   : > { %4206 = vmatmul.msk.f32.vlgmr.msrb.gmra.mxu0 %vm3245_vm6, %v5963_v24  ;;  %v3157_v33 = vpop.f32.mrf.mxu2 }
 0x239   : > { %v3219_v45 = vmax.f32 %v3157_v33, 0.0 }
 0x23b   : > { %3440 = vmatpush.msrb.mxu2 %v3219_v45 }
 0x23c   : > { %4211 = vmatmul.msk.f32.gmra.mxu1 %vm3245_vm6, %v5975_v29 }
 0x23d   : > { %3441 = vmatpush.msrb.mxu2 %v3211_v28  ;;  %v6086_v28 = vpop.permute.xlu2 %3536 }
 0x23f   : > { %3442 = vmatpush.msrb.mxu2 %v3203_v52 }
 0x240   : > { %4207 = vmatmul.msk.f32.gmra.mxu0 %vm3245_vm6, %v5975_v29 }
 0x241   : > { %3443 = vmatpush.msrb.mxu2 %v3195_v39 }
 0x242   : > { %4214 = vmatmul.msk.f32.vlgmr.msrb.gmra.mxu2 %vm3245_vm6, %v5963_v24 }
 0x244   : > { %v3177_v42 = vpop.f32.mrf.mxu3  ;;  %4212 = vmatmul.msk.f32.gmra.mxu1 %vm3245_vm6, %v5988_v7 }
 0x245   : > { %v3196_v43 = vmax.f32 %v3177_v42, 0.0 }
 0x248   : > { %4208 = vmatmul.msk.f32.gmra.mxu0 %vm3245_vm6, %v5988_v7 }
 0x24a   : > { %4215 = vmatmul.msk.f32.gmra.mxu2 %vm3245_vm6, %v5975_v29 }
 0x24c   : > { %v3180_v25 = vpop.f32.mrf.mxu3  ;;  %4213 = vmatmul.msk.f32.gmra.mxu1 %vm3245_vm6, %v5998_v23  ;;  %v6055_v14 = vpop.permute.xlu1 %3232 }
 0x24d   : > { %v3204_v55 = vmax.f32 %v3180_v25, 0.0 }
 0x250   : > { %4209 = vmatmul.msk.f32.gmra.mxu0 %vm3245_vm6, %v5998_v23 }
 0x252   : > { %4216 = vmatmul.msk.f32.gmra.mxu2 %vm3245_vm6, %v5988_v7 }
 0x254   : > { %v3183_v38 = vpop.f32.mrf.mxu3  ;;  %v6065_v19 = vpop.permute.xlu1 %3227 }
 0x255   : > { %v3212_v3 = vmax.f32 %v3183_v38, 0.0 }
 0x25a   : > { %4217 = vmatmul.msk.f32.gmra.mxu2 %vm3245_vm6, %v5998_v23 }
 0x25c   : > { %v3186_v12 = vpop.f32.mrf.mxu3 }
 0x25d   : > { %v3220_v53 = vmax.f32 %v3186_v12, 0.0 }
 0x25f   : > { %3469 = vmatpush.msrb.mxu3 %v3220_v53 }
 0x261   : > { %3470 = vmatpush.msrb.mxu3 %v3212_v3 }
 0x263   : > { %3471 = vmatpush.msrb.mxu3 %v3204_v55 }
 0x265   : > { %3472 = vmatpush.msrb.mxu3 %v3196_v43  ;;  %v6097_v43 = vpop.permute.xlu0 %3538 }
 0x266   : > { %4218 = vmatmul.msk.f32.vlgmr.msrb.gmra.mxu3 %vm3245_vm6, %v5963_v24 }
 0x26e   : > { %4219 = vmatmul.msk.f32.gmra.mxu3 %vm3245_vm6, %v5975_v29 }
 0x276   : > { %4220 = vmatmul.msk.f32.gmra.mxu3 %vm3245_vm6, %v5988_v7 }
 0x27c   : > { %v3271_v36 = vpop.f32.mrf.mxu0  ;;  %v3300_v56 = vpop.f32.mrf.mxu1 }
 0x27d   : > { %v3272_v60 = vadd.f32 %v3271_v36, %v6065_v19  ;;  %v3301_v50 = vadd.f32 %v3300_v56, %v6065_v19 }
 0x27e   : > { %4221 = vmatmul.msk.f32.gmra.mxu3 %vm3245_vm6, %v5998_v23 }
 0x27f   : > { %v3486_v20 = vmax.f32 %v3272_v60, 0.0  ;;  %v3487_v34 = vmax.f32 %v3301_v50, 0.0 }
 0x284   : > { %v3274_v27 = vpop.f32.mrf.mxu0  ;;  %v3303_v21 = vpop.f32.mrf.mxu1 }
 0x285   : > { %v3275_v51 = vadd.f32 %v3274_v27, %v6055_v14  ;;  %v3304_v18 = vadd.f32 %v3303_v21, %v6055_v14  ;;  %v4496_v27 = vmov 65  }
 0x286   : > { %4335 = vset.pattern.permute.xlu1 %v4496_v27  ;;  %4334 = vset.pattern.permute.xlu0 %v4496_v27 }
 0x287   : > { %v3494_v22 = vmax.f32 %v3275_v51, 0.0  ;;  %v3495_v17 = vmax.f32 %v3304_v18, 0.0  ;;  %3527 = vperm.xlu1 %4335, %v5988_v7   ;;  %3523 = vperm.xlu0 %4334, %v5975_v29  }
 0x288   : > { %v3329_v63 = vpop.f32.mrf.mxu2  ;;  %v3358_v46 = vpop.f32.mrf.mxu3  ;;  %4333 = vset.pattern.permute.xlu2 %v4496_v27 }
 0x289   : > { %v3330_v42 = vadd.f32 %v3329_v63, %v6065_v19  ;;  %v3359_v52 = vadd.f32 %v3358_v46, %v6065_v19  ;;  %3519 = vperm.xlu2 %4333, %v5963_v24   ;;  %v6112_v63 = vpop.permute.xlu1 %3540 }
 0x28b   : > { %v3488_v53 = vmax.f32 %v3330_v42, 0.0  ;;  %v3489_v3 = vmax.f32 %v3359_v52, 0.0 }
 0x28c   : > { %v3277_v61 = vpop.f32.mrf.mxu0  ;;  %v3306_v11 = vpop.f32.mrf.mxu1 }
 0x28d   : > { %v3278_v32 = vadd.f32 %v3277_v61, %v6057_v5  ;;  %v3307_v0 = vadd.f32 %v3306_v11, %v6057_v5 }
 0x28f   : > { %v3502_v6 = vmax.f32 %v3278_v32, 0.0  ;;  %v3503_v10 = vmax.f32 %v3307_v0, 0.0 }
 0x290   : > { %v3332_v49 = vpop.f32.mrf.mxu2  ;;  %v3361_v44 = vpop.f32.mrf.mxu3 }
 0x291   : > { %v3333_v13 = vadd.f32 %v3332_v49, %v6055_v14  ;;  %v3362_v41 = vadd.f32 %v3361_v44, %v6055_v14  ;;  %3531 = vperm.xlu2 %4333, %v5998_v23  }
 0x293   : > { %v3496_v38 = vmax.f32 %v3333_v13, 0.0  ;;  %v3497_v12 = vmax.f32 %v3362_v41, 0.0  ;;  %v3814_v13 = vld [vmem:[#allocation6 + $0x8] ss:$0 sm:$0xff] }
 0x294   : > { %v3280_v59 = vpop.f32.mrf.mxu0  ;;  %v3309_v47 = vpop.f32.mrf.mxu1 }
 0x295   : > { %v3281_v8 = vadd.f32 %v3280_v59, %v6053_v37  ;;  %v3310_v58 = vadd.f32 %v3309_v47, %v6053_v37 }
 0x297   : > { %v3510_v62 = vmax.f32 %v3281_v8, 0.0  ;;  %v3511_v54 = vmax.f32 %v3310_v58, 0.0  ;;  %v4497_v8 = vmov 66  }
 0x298   : > { %v3335_v1 = vpop.f32.mrf.mxu2  ;;  %v3364_v40 = vpop.f32.mrf.mxu3  ;;  %4336 = vset.pattern.permute.xlu1 %v4497_v8  ;;  %4338 = vset.pattern.permute.xlu0 %v4497_v8 }
 0x299   : > { %3562 = vmatpush.msra.mxu0 %v3510_v62  ;;  %3591 = vmatpush.msra.mxu1 %v3511_v54  ;;  %v3336_v35 = vadd.f32 %v3335_v1, %v6057_v5  ;;  %v3365_v2 = vadd.f32 %v3364_v40, %v6057_v5 }
 0x29a   : > { %3816 = vperm.xlu1 %4336, %v5963_v24   ;;  %3824 = vperm.xlu0 %4338, %v5988_v7  }
 0x29b   : > { %3563 = vmatpush.msra.mxu0 %v3502_v6  ;;  %3592 = vmatpush.msra.mxu1 %v3503_v10  ;;  %v3504_v33 = vmax.f32 %v3336_v35, 0.0  ;;  %v3505_v39 = vmax.f32 %v3365_v2, 0.0 }
 0x29c   : > { %4337 = vset.pattern.permute.xlu2 %v4497_v8 }
 0x29d   : > { %3564 = vmatpush.msra.mxu0 %v3494_v22  ;;  %3593 = vmatpush.msra.mxu1 %v3495_v17 }
 0x29e   : > { %3820 = vperm.xlu2 %4337, %v5975_v29  }
 0x29f   : > { %3565 = vmatpush.msra.mxu0 %v3486_v20  ;;  %3594 = vmatpush.msra.mxu1 %v3487_v34 }
 0x2a0   : > { %v3338_v26 = vpop.f32.mrf.mxu2  ;;  %4222 = vmatmul.msk.f32.vlgmr.msra.gmra.mxu0 %vm3245_vm6, %v6069_v9  ;;  %v3367_v30 = vpop.f32.mrf.mxu3  ;;  %4226 = vmatmul.msk.f32.vlgmr.msra.gmra.mxu1 %vm3245_vm6, %v6069_v9 }
 0x2a1   : > { %v3339_v31 = vadd.f32 %v3338_v26, %v6053_v37  ;;  %v3368_v16 = vadd.f32 %v3367_v30, %v6053_v37 }
 0x2a2   : > { %3828 = vperm.xlu1 %4336, %v5998_v23  }
 0x2a3   : > { %v3512_v15 = vmax.f32 %v3339_v31, 0.0  ;;  %v3513_v57 = vmax.f32 %v3368_v16, 0.0 }
 0x2a5   : > { %3620 = vmatpush.msra.mxu2 %v3512_v15  ;;  %3649 = vmatpush.msra.mxu3 %v3513_v57  ;;  %v4498_v57 = vmov 67  }
 0x2a6   : > { %4339 = vset.pattern.permute.xlu2 %v4498_v57  ;;  %4340 = vset.pattern.permute.xlu0 %v4498_v57 }
 0x2a7   : > { %3621 = vmatpush.msra.mxu2 %v3504_v33  ;;  %3650 = vmatpush.msra.mxu3 %v3505_v39 }
 0x2a8   : > { %4223 = vmatmul.msk.f32.gmra.mxu0 %vm3245_vm6, %v6086_v28  ;;  %4227 = vmatmul.msk.f32.gmra.mxu1 %vm3245_vm6, %v6086_v28 }
 0x2a9   : > { %3622 = vmatpush.msra.mxu2 %v3496_v38  ;;  %3651 = vmatpush.msra.mxu3 %v3497_v12 }
 0x2aa   : > { %3937 = vperm.xlu2 %4339, %v3814_v13  }
 0x2ab   : > { %3623 = vmatpush.msra.mxu2 %v3488_v53  ;;  %3652 = vmatpush.msra.mxu3 %v3489_v3 }
 0x2ac   : > { %4230 = vmatmul.msk.f32.vlgmr.msra.gmra.mxu2 %vm3245_vm6, %v6069_v9  ;;  %4234 = vmatmul.msk.f32.vlgmr.msra.gmra.mxu3 %vm3245_vm6, %v6069_v9 }
 0x2b0   : > { %4224 = vmatmul.msk.f32.gmra.mxu0 %vm3245_vm6, %v6097_v43  ;;  %4228 = vmatmul.msk.f32.gmra.mxu1 %vm3245_vm6, %v6097_v43 }
 0x2b1   : > { %v6073_v48 = vpop.f32.mrf.mxu1 }
 0x2b2   : > { %v3417_v6 = vadd.f32 %v6073_v48, %v6065_v19 }
 0x2b4   : > { %4231 = vmatmul.msk.f32.gmra.mxu2 %vm3245_vm6, %v6086_v28  ;;  %4235 = vmatmul.msk.f32.gmra.mxu3 %vm3245_vm6, %v6086_v28  ;;  %v3491_v40 = vmax.f32 %v3417_v6, 0.0 }
 0x2b5   : > { %v6071_v4 = vpop.f32.mrf.mxu0 }
 0x2b6   : > { %v3388_v51 = vadd.f32 %v6071_v4, %v6065_v19 }
 0x2b8   : > { %4225 = vmatmul.msk.f32.gmra.mxu0 %vm3245_vm6, %v6112_v63  ;;  %4229 = vmatmul.msk.f32.gmra.mxu1 %vm3245_vm6, %v6112_v63  ;;  %v3490_v24 = vmax.f32 %v3388_v51, 0.0 }
 0x2b9   : > { %v3419_v25 = vpop.f32.mrf.mxu1 }
 0x2ba   : > { %v3420_v47 = vadd.f32 %v3419_v25, %v6055_v14 }
 0x2bc   : > { %4232 = vmatmul.msk.f32.gmra.mxu2 %vm3245_vm6, %v6097_v43  ;;  %v3499_v1 = vmax.f32 %v3420_v47, 0.0  ;;  %4236 = vmatmul.msk.f32.gmra.mxu3 %vm3245_vm6, %v6097_v43 }
 0x2bd   : > { %v3390_v45 = vpop.f32.mrf.mxu0 }
 0x2be   : > { %v3391_v59 = vadd.f32 %v3390_v45, %v6055_v14 }
 0x2c0   : > { %v3498_v54 = vmax.f32 %v3391_v59, 0.0 }
 0x2c1   : > { %v3422_v56 = vpop.f32.mrf.mxu1 }
 0x2c2   : > { %v3423_v44 = vadd.f32 %v3422_v56, %v6057_v5 }
 0x2c4   : > { %v3507_v18 = vmax.f32 %v3423_v44, 0.0  ;;  %4233 = vmatmul.msk.f32.gmra.mxu2 %vm3245_vm6, %v6112_v63  ;;  %4237 = vmatmul.msk.f32.gmra.mxu3 %vm3245_vm6, %v6112_v63 }
 0x2c5   : > { %v3393_v55 = vpop.f32.mrf.mxu0  ;;  %v6099_v36 = vpop.f32.mrf.mxu2 }
 0x2c6   : > { %v3394_v46 = vadd.f32 %v3393_v55, %v6057_v5  ;;  %v3446_v23 = vadd.f32 %v6099_v36, %v6065_v19 }
 0x2c8   : > { %v3506_v62 = vmax.f32 %v3394_v46, 0.0  ;;  %v3492_v26 = vmax.f32 %v3446_v23, 0.0 }
 0x2c9   : > { %v3425_v49 = vpop.f32.mrf.mxu1 }
 0x2ca   : > { %v3426_v32 = vadd.f32 %v3425_v49, %v6053_v37 }
 0x2cc   : > { %v3515_v58 = vmax.f32 %v3426_v32, 0.0 }
 0x2cd   : > { %v3396_v21 = vpop.f32.mrf.mxu0  ;;  %v3448_v61 = vpop.f32.mrf.mxu2 }
 0x2ce   : > { %v3397_v11 = vadd.f32 %v3396_v21, %v6053_v37  ;;  %3707 = vmatpush.msrb.mxu1 %v3515_v58  ;;  %v3449_v17 = vadd.f32 %v3448_v61, %v6055_v14 }
 0x2d0   : > { %v3514_v0 = vmax.f32 %v3397_v11, 0.0  ;;  %3708 = vmatpush.msrb.mxu1 %v3507_v18  ;;  %v3500_v48 = vmax.f32 %v3449_v17, 0.0 }
 0x2d2   : > { %3678 = vmatpush.msrb.mxu0 %v3514_v0  ;;  %3709 = vmatpush.msrb.mxu1 %v3499_v1 }
 0x2d4   : > { %3679 = vmatpush.msrb.mxu0 %v3506_v62  ;;  %3710 = vmatpush.msrb.mxu1 %v3491_v40 }
 0x2d5   : > { %v3451_v10 = vpop.f32.mrf.mxu2  ;;  %4242 = vmatmul.msk.f32.vlgmr.msrb.gmra.mxu1 %vm3245_vm6, %v6069_v9 }
 0x2d6   : > { %3680 = vmatpush.msrb.mxu0 %v3498_v54  ;;  %v3452_v50 = vadd.f32 %v3451_v10, %v6057_v5 }
 0x2d8   : > { %3681 = vmatpush.msrb.mxu0 %v3490_v24  ;;  %v3508_v20 = vmax.f32 %v3452_v50, 0.0 }
 0x2d9   : > { %4238 = vmatmul.msk.f32.vlgmr.msrb.gmra.mxu0 %vm3245_vm6, %v6069_v9 }
 0x2dd   : > { %v3454_v60 = vpop.f32.mrf.mxu2  ;;  %4243 = vmatmul.msk.f32.gmra.mxu1 %vm3245_vm6, %v6086_v28 }
 0x2de   : > { %v3455_v22 = vadd.f32 %v3454_v60, %v6053_v37 }
 0x2e0   : > { %v3516_v4 = vmax.f32 %v3455_v22, 0.0 }
 0x2e1   : > { %4239 = vmatmul.msk.f32.gmra.mxu0 %vm3245_vm6, %v6086_v28 }
 0x2e2   : > { %3736 = vmatpush.msrb.mxu2 %v3516_v4 }
 0x2e4   : > { %3737 = vmatpush.msrb.mxu2 %v3508_v20 }
 0x2e5   : > { %4244 = vmatmul.msk.f32.gmra.mxu1 %vm3245_vm6, %v6097_v43 }
 0x2e6   : > { %3738 = vmatpush.msrb.mxu2 %v3500_v48 }
 0x2e8   : > { %3739 = vmatpush.msrb.mxu2 %v3492_v26 }
 0x2e9   : > { %v3474_v7 = vpop.f32.mrf.mxu3  ;;  %4240 = vmatmul.msk.f32.gmra.mxu0 %vm3245_vm6, %v6097_v43  ;;  %4246 = vmatmul.msk.f32.vlgmr.msrb.gmra.mxu2 %vm3245_vm6, %v6069_v9 }
 0x2ea   : > { %v3475_v15 = vadd.f32 %v3474_v7, %v6065_v19 }
 0x2ed   : > { %4245 = vmatmul.msk.f32.gmra.mxu1 %vm3245_vm6, %v6112_v63 }
 0x2f1   : > { %v3477_v34 = vpop.f32.mrf.mxu3  ;;  %4241 = vmatmul.msk.f32.gmra.mxu0 %vm3245_vm6, %v6112_v63  ;;  %4247 = vmatmul.msk.f32.gmra.mxu2 %vm3245_vm6, %v6086_v28 }
 0x2f2   : > { %v3478_v2 = vadd.f32 %v3477_v34, %v6055_v14 }
 0x2f4   : > { %v3501_v42 = vmax.f32 %v3478_v2, 0.0 }
 0x2f9   : > { %v3480_v29 = vpop.f32.mrf.mxu3  ;;  %4248 = vmatmul.msk.f32.gmra.mxu2 %vm3245_vm6, %v6097_v43  ;;  %v6188_v56 = vpop.permute.xlu1 %3527 }
 0x2fa   : > { %v3481_v31 = vadd.f32 %v3480_v29, %v6057_v5  ;;  %v3493_v5 = vmax.f32 %v3475_v15, 0.0  ;;  %v6194_v61 = vpop.permute.xlu0 %3523 }
 0x2fc   : > { %v3509_v41 = vmax.f32 %v3481_v31, 0.0 }
 0x301   : > { %v3483_v35 = vpop.f32.mrf.mxu3  ;;  %4249 = vmatmul.msk.f32.gmra.mxu2 %vm3245_vm6, %v6112_v63 }
 0x302   : > { %v3484_v30 = vadd.f32 %v3483_v35, %v6053_v37 }
 0x304   : > { %v3517_v16 = vmax.f32 %v3484_v30, 0.0 }
 0x306   : > { %3765 = vmatpush.msrb.mxu3 %v3517_v16 }
 0x308   : > { %3766 = vmatpush.msrb.mxu3 %v3509_v41 }
 0x30a   : > { %3767 = vmatpush.msrb.mxu3 %v3501_v42 }
 0x30c   : > { %3768 = vmatpush.msrb.mxu3 %v3493_v5  ;;  %v6201_v47 = vpop.permute.xlu1 %3816  ;;  %v6215_v29 = vpop.permute.xlu0 %3824 }
 0x30d   : > { %4250 = vmatmul.msk.f32.vlgmr.msrb.gmra.mxu3 %vm3245_vm6, %v6069_v9 }
 0x314   : > { %v6221_v16 = vpop.permute.xlu1 %3828 }
 0x315   : > { %4251 = vmatmul.msk.f32.gmra.mxu3 %vm3245_vm6, %v6086_v28  ;;  %v6184_v28 = vpop.permute.xlu2 %3519 }
 0x31d   : > { %4252 = vmatmul.msk.f32.gmra.mxu3 %vm3245_vm6, %v6097_v43  ;;  %v3567_v37 = vpop.f32.mrf.mxu0  ;;  %v3596_v14 = vpop.f32.mrf.mxu1 }
 0x31e   : > { %v6190_v27 = vpop.permute.xlu2 %3531  ;;  %v3597_v49 = vadd.f32 %v3596_v14, %v6184_v28  ;;  %v3568_v0 = vadd.f32 %v3567_v37, %v6184_v28 }
 0x320   : > { %v3783_v58 = vmax.f32 %v3597_v49, 0.0  ;;  %v3782_v60 = vmax.f32 %v3568_v0, 0.0 }
 0x322   : > { %v3832_v17 = vmul.f32 %v6201_v47, %v3783_v58  ;;  %v6224_v13 = vmul.f32 %v6201_v47, %v3782_v60 }
 0x325   : > { %4253 = vmatmul.msk.f32.gmra.mxu3 %vm3245_vm6, %v6112_v63  ;;  %v3570_v19 = vpop.f32.mrf.mxu0  ;;  %v3599_v33 = vpop.f32.mrf.mxu1 }
 0x326   : > { %v3600_v44 = vadd.f32 %v3599_v33, %v6194_v61  ;;  %v3571_v8 = vadd.f32 %v3570_v19, %v6194_v61  ;;  %v6204_v6 = vpop.permute.xlu2 %3820 }
 0x328   : > { %v3791_v62 = vmax.f32 %v3600_v44, 0.0  ;;  %v3790_v50 = vmax.f32 %v3571_v8, 0.0 }
 0x32a   : > { %v3840_v4 = vmul.f32 %v6204_v6, %v3791_v62  ;;  %v6219_v2 = vmul.f32 %v6204_v6, %v3790_v50 }
 0x32c   : > { %v6226_v15 = vadd.f32 %v3840_v4, %v3832_v17 }
 0x32d   : > { %v3573_v39 = vpop.f32.mrf.mxu0  ;;  %v3602_v9 = vpop.f32.mrf.mxu1 }
 0x32e   : > { %v3603_v1 = vadd.f32 %v3602_v9, %v6188_v56  ;;  %v6213_v34 = vadd.f32 %v3573_v39, %v6188_v56 }
 0x32f   : > { %v3625_v45 = vpop.f32.mrf.mxu2  ;;  %v3654_v53 = vpop.f32.mrf.mxu3 }
 0x330   : > { %v3626_v51 = vadd.f32 %v3625_v45, %v6184_v28  ;;  %v3655_v54 = vadd.f32 %v3654_v53, %v6184_v28  ;;  %v3799_v26 = vmax.f32 %v3603_v1, 0.0  ;;  %v3798_v42 = vmax.f32 %v6213_v34, 0.0 }
 0x332   : > { %v3784_v22 = vmax.f32 %v3626_v51, 0.0  ;;  %v3785_v48 = vmax.f32 %v3655_v54, 0.0  ;;  %v6232_v5 = vmul.f32 %v6215_v29, %v3799_v26 }
 0x334   : > { %v3833_v41 = vmul.f32 %v6201_v47, %v3784_v22  ;;  %v3834_v14 = vmul.f32 %v6201_v47, %v3785_v48 }
 0x335   : > { %v3576_v38 = vpop.f32.mrf.mxu0  ;;  %v3605_v12 = vpop.f32.mrf.mxu1 }
 0x336   : > { %v3606_v40 = vadd.f32 %v3605_v12, %v6190_v27  ;;  %v6235_v37 = vadd.f32 %v3576_v38, %v6190_v27 }
 0x337   : > { %v3628_v52 = vpop.f32.mrf.mxu2  ;;  %v3657_v36 = vpop.f32.mrf.mxu3 }
 0x338   : > { %v3629_v32 = vadd.f32 %v3628_v52, %v6194_v61  ;;  %v3658_v18 = vadd.f32 %v3657_v36, %v6194_v61  ;;  %v3807_v35 = vmax.f32 %v3606_v40, 0.0 }
 0x33a   : > { %v3792_v7 = vmax.f32 %v3629_v32, 0.0  ;;  %v3793_v20 = vmax.f32 %v3658_v18, 0.0  ;;  %v6239_v19 = vmul.f32 %v6221_v16, %v3807_v35 }
 0x33c   : > { %v3841_v31 = vmul.f32 %v6204_v6, %v3792_v7  ;;  %v3842_v57 = vmul.f32 %v6204_v6, %v3793_v20 }
 0x33e   : > { %v3881_v52 = vadd.f32 %v3841_v31, %v3833_v41  ;;  %v3890_v44 = vadd.f32 %v3842_v57, %v3834_v14 }
 0x33f   : > { %v6182_v25 = vpop.f32.mrf.mxu2  ;;  %v3660_v11 = vpop.f32.mrf.mxu3 }
 0x340   : > { %v3632_v9 = vadd.f32 %v6182_v25, %v6188_v56  ;;  %v3661_v12 = vadd.f32 %v3660_v11, %v6188_v56 }
 0x342   : > { %v3800_v62 = vmax.f32 %v3632_v9, 0.0  ;;  %v3801_v18 = vmax.f32 %v3661_v12, 0.0 }
 0x344   : > { %v3849_v20 = vmul.f32 %v6215_v29, %v3800_v62  ;;  %v3850_v48 = vmul.f32 %v6215_v29, %v3801_v18 }
 0x347   : > { %v6186_v3 = vpop.f32.mrf.mxu2  ;;  %v3663_v23 = vpop.f32.mrf.mxu3 }
 0x352   : > { %v3712_v43 = vpop.f32.mrf.mxu1 }
 0x353   : > { %v3713_v49 = vadd.f32 %v3712_v43, %v6184_v28 }
 0x356   : > { %v3683_v55 = vpop.f32.mrf.mxu0 }
 0x357   : > { %v3684_v39 = vadd.f32 %v3683_v55, %v6184_v28  ;;  %v3664_v55 = vadd.f32 %v3663_v23, %v6190_v27 }
 0x359   : > { %v3786_v1 = vmax.f32 %v3684_v39, 0.0  ;;  %v3809_v7 = vmax.f32 %v3664_v55, 0.0  ;;  %v3873_v55 = vadd.f32 %v6226_v15, %v6232_v5 }
 0x35a   : > { %v3715_v46 = vpop.f32.mrf.mxu1 }
 0x35b   : > { %v3716_v45 = vadd.f32 %v3715_v46, %v6194_v61  ;;  %v3635_v46 = vadd.f32 %v6186_v3, %v6190_v27  ;;  %v3835_v31 = vmul.f32 %v6201_v47, %v3786_v1 }
 0x35d   : > { %v3795_v8 = vmax.f32 %v3716_v45, 0.0  ;;  %v3808_v40 = vmax.f32 %v3635_v46, 0.0 }
 0x35e   : > { %v3686_v63 = vpop.f32.mrf.mxu0 }
 0x35f   : > { %v3687_v33 = vadd.f32 %v3686_v63, %v6194_v61  ;;  %v3844_v17 = vmul.f32 %v6204_v6, %v3795_v8  ;;  %v3857_v14 = vmul.f32 %v6221_v16, %v3808_v40 }
 0x361   : > { %v3794_v0 = vmax.f32 %v3687_v33, 0.0  ;;  %v3858_v33 = vmul.f32 %v6221_v16, %v3809_v7 }
 0x362   : > { %v3718_v10 = vpop.f32.mrf.mxu1 }
 0x363   : > { %v3719_v63 = vadd.f32 %v3718_v10, %v6188_v56  ;;  %v3843_v22 = vmul.f32 %v6204_v6, %v3794_v0 }
 0x365   : > { %v3899_v9 = vadd.f32 %v3843_v22, %v3835_v31 }
 0x366   : > { %v3689_v24 = vpop.f32.mrf.mxu0 }
 0x367   : > { %v3690_v32 = vadd.f32 %v3689_v24, %v6188_v56  ;;  %v3787_v24 = vmax.f32 %v3713_v49, 0.0  ;;  %v3882_v49 = vadd.f32 %v3881_v52, %v3849_v20  ;;  %v3874_v52 = vadd.f32 %v3873_v55, %v6239_v19 }
 0x369   : > { %v3802_v10 = vmax.f32 %v3690_v32, 0.0  ;;  %v3891_v32 = vadd.f32 %v3890_v44, %v3850_v48  ;;  %v3883_v8 = vadd.f32 %v3882_v49, %v3857_v14 }
 0x36a   : > { %v3721_v38 = vpop.f32.mrf.mxu1 }
 0x36b   : > { %v3722_v58 = vadd.f32 %v3721_v38, %v6190_v27  ;;  %v3851_v41 = vmul.f32 %v6215_v29, %v3802_v10  ;;  %v3884_v5 = vrot.slane %v3883_v8, 4 }
 0x36c   : > { %v6192_v21 = vpop.f32.mrf.mxu2 }
 0x36d   : > { %v3742_v25 = vadd.f32 %v6192_v21, %v6184_v28  ;;  %v3803_v21 = vmax.f32 %v3719_v63, 0.0  ;;  %v3811_v23 = vmax.f32 %v3722_v58, 0.0 }
 0x36e   : > { %v3692_v53 = vpop.f32.mrf.mxu0 }
 0x36f   : > { %v3693_v43 = vadd.f32 %v3692_v53, %v6190_v27  ;;  %v3788_v60 = vmax.f32 %v3742_v25, 0.0  ;;  %v3852_v57 = vmul.f32 %v6215_v29, %v3803_v21  ;;  %v3860_v38 = vmul.f32 %v6221_v16, %v3811_v23 }
 0x370   : > { %v3806_v25 = vmax.f32 %v6235_v37, 0.0 }
 0x371   : > { %v3810_v4 = vmax.f32 %v3693_v43, 0.0  ;;  %v3837_v45 = vmul.f32 %v6201_v47, %v3788_v60  ;;  %v3892_v43 = vadd.f32 %v3891_v32, %v3858_v33  ;;  %v3885_v60 = vadd.f32 %v3884_v5, %v3883_v8 }
 0x372   : > { %v3855_v15 = vmul.f32 %v6221_v16, %v3806_v25 }
 0x373   : > { %v3859_v53 = vmul.f32 %v6221_v16, %v3810_v4  ;;  %v3893_v37 = vrot.slane %v3892_v43, 4  ;;  %v3886_v48 = vrot.slane %v3885_v60, 2 }
 0x374   : > { %v3744_v59 = vpop.f32.mrf.mxu2 }
 0x375   : > { %v3745_v36 = vadd.f32 %v3744_v59, %v6194_v61 }
 0x377   : > { %v3796_v54 = vmax.f32 %v3745_v36, 0.0 }
 0x379   : > { %v3845_v26 = vmul.f32 %v6204_v6, %v3796_v54  ;;  %v3863_v54 = vadd.f32 %v6219_v2, %v6224_v13  ;;  %v3894_v2 = vadd.f32 %v3893_v37, %v3892_v43 }
 0x37b   : > { %v3917_v63 = vadd.f32 %v3845_v26, %v3837_v45  ;;  %v3895_v26 = vrot.slane %v3894_v2, 2  ;;  %v3887_v45 = vadd.f32 %v3886_v48, %v3885_v60 }
 0x37c   : > { %v3747_v30 = vpop.f32.mrf.mxu2 }
 0x37d   : > { %v3748_v11 = vadd.f32 %v3747_v30, %v6188_v56  ;;  %v3836_v30 = vmul.f32 %v6201_v47, %v3787_v24  ;;  %v3875_v24 = vrot.slane %v3874_v52, 4 }
 0x37f   : > { %v3804_v50 = vmax.f32 %v3748_v11, 0.0  ;;  %v3908_v12 = vadd.f32 %v3844_v17, %v3836_v30  ;;  %v3900_v11 = vadd.f32 %v3899_v9, %v3851_v41 }
 0x381   : > { %v3853_v39 = vmul.f32 %v6215_v29, %v3804_v50  ;;  %v3909_v0 = vadd.f32 %v3908_v12, %v3852_v57  ;;  %v3901_v44 = vadd.f32 %v3900_v11, %v3859_v53  ;;  %v3876_v50 = vadd.f32 %v3875_v24, %v3874_v52 }
 0x383   : > { %v3918_v58 = vadd.f32 %v3917_v63, %v3853_v39  ;;  %v3910_v62 = vadd.f32 %v3909_v0, %v3860_v38  ;;  %v3902_v10 = vrot.slane %v3901_v44, 4  ;;  %v3877_v31 = vrot.slane %v3876_v50, 2 }
 0x384   : > { %v3750_v51 = vpop.f32.mrf.mxu2  ;;  %v3896_v39 = vadd.f32 %v3895_v26, %v3894_v2 }
 0x385   : > { %v3751_v3 = vadd.f32 %v3750_v51, %v6190_v27  ;;  %v3847_v51 = vmul.f32 %v6215_v29, %v3798_v42  ;;  %v3911_v34 = vrot.slane %v3910_v62, 4  ;;  %v3903_v22 = vadd.f32 %v3902_v10, %v3901_v44  ;;  %v3938_v44 = vpop.permute.xlu2 %3937 }
 0x386   : > { %v3878_v53 = vadd.f32 %v3877_v31, %v3876_v50 }
 0x387   : > { %v3812_v35 = vmax.f32 %v3751_v3, 0.0  ;;  %v3864_v1 = vadd.f32 %v3863_v54, %v3847_v51  ;;  %v3912_v17 = vadd.f32 %v3911_v34, %v3910_v62 }
 0x389   : > { %v3861_v46 = vmul.f32 %v6221_v16, %v3812_v35  ;;  %v3865_v7 = vadd.f32 %v3864_v1, %v3855_v15 }
 0x38b   : > { %v3919_v18 = vadd.f32 %v3918_v58, %v3861_v46  ;;  %v3866_v20 = vrot.slane %v3865_v7, 4  ;;  %v3888_v46 = vrot.slane %v3887_v45, 1 }
 0x38d   : > { %v3920_v40 = vrot.slane %v3919_v18, 4  ;;  %v3867_v33 = vadd.f32 %v3866_v20, %v3865_v7  ;;  %v3889_v43 = vadd.f32 %v3888_v46, %v3887_v45 }
 0x38f   : > { %v3921_v23 = vadd.f32 %v3920_v40, %v3919_v18  ;;  %v3868_v63 = vrot.slane %v3867_v33, 2  ;;  %v3942_v5 = vadd.f32 %v3938_v44, %v3889_v43 }
 0x390   : > { %v6257_v59 = vpop.f32.mrf.mxu3 }
 0x391   : > { %v3771_v42 = vadd.f32 %v6257_v59, %v6184_v28  ;;  %v3904_v28 = vrot.slane %v3903_v22, 2  ;;  %v3913_v59 = vrot.slane %v3912_v17, 2  ;;  %v3922_v57 = vrot.slane %v3921_v23, 2 }
 0x392   : > { %v3869_v8 = vadd.f32 %v3868_v63, %v3867_v33 }
 0x393   : > { %v3789_v4 = vmax.f32 %v3771_v42, 0.0  ;;  %v3905_v38 = vadd.f32 %v3904_v28, %v3903_v22  ;;  %v3923_v49 = vadd.f32 %v3922_v57, %v3921_v23 }
 0x394   : > { %v3870_v15 = vrot.slane %v3869_v8, 1 }
 0x395   : > { %v3838_v30 = vmul.f32 %v6201_v47, %v3789_v4  ;;  %v3897_v47 = vrot.slane %v3896_v39, 1  ;;  %v3906_v25 = vrot.slane %v3905_v38, 1 }
 0x396   : > { %v3871_v42 = vadd.f32 %v3870_v15, %v3869_v8 }
 0x397   : > { %v3898_v58 = vadd.f32 %v3897_v47, %v3896_v39  ;;  %v3907_v62 = vadd.f32 %v3906_v25, %v3905_v38 }
 0x398   : > { %v3773_v36 = vpop.f32.mrf.mxu3 }
 0x399   : > { %v3774_v3 = vadd.f32 %v3773_v36, %v6194_v61  ;;  %v3914_v36 = vadd.f32 %v3913_v59, %v3912_v17  ;;  %v3943_v37 = vadd.f32 %v3938_v44, %v3898_v58  ;;  %v3944_v24 = vadd.f32 %v3938_v44, %v3907_v62 }
 0x39a   : > { %v3940_v17 = vadd.f32 %v3938_v44, %v3871_v42 }
 0x39b   : > { %v3797_v13 = vmax.f32 %v3774_v3, 0.0  ;;  %v3915_v11 = vrot.slane %v3914_v36, 1  ;;  %v3958_v40 = vrot.slane %v3943_v37, 5  ;;  %v3959_v2 = vrot.slane %v3944_v24, 4 }
 0x39d   : > { %v3846_v35 = vmul.f32 %v6204_v6, %v3797_v13  ;;  %v3916_v18 = vadd.f32 %v3915_v11, %v3914_v36 }
 0x39f   : > { %v3926_v9 = vadd.f32 %v3846_v35, %v3838_v30  ;;  %v3945_v10 = vadd.f32 %v3938_v44, %v3916_v18 }
 0x3a0   : > { %v3776_v21 = vpop.f32.mrf.mxu3 }
 0x3a1   : > { %v3777_v19 = vadd.f32 %v3776_v21, %v6188_v56  ;;  %v3960_v13 = vrot.slane %v3945_v10, 3 }
 0x3a3   : > { %v3805_v61 = vmax.f32 %v3777_v19, 0.0  ;;  %v3957_v19 = vrot.slane %v3942_v5, 6  ;;  %v3970_v20 = vsel %vm3969_vm9, %v3959_v2, %v3960_v13 }
 0x3a5   : > { %v3854_v41 = vmul.f32 %v6215_v29, %v3805_v61  ;;  %v3879_v29 = vrot.slane %v3878_v53, 1  ;;  %v3966_v61 = vsel %vm3965_vm8, %v3957_v19, %v3958_v40 }
 0x3a7   : > { %v3927_v6 = vadd.f32 %v3926_v9, %v3854_v41  ;;  %v3880_v52 = vadd.f32 %v3879_v29, %v3878_v53 }
 0x3a8   : > { %v3779_v56 = vpop.f32.mrf.mxu3 }
 0x3a9   : > { %v3780_v14 = vadd.f32 %v3779_v56, %v6190_v27  ;;  %v3924_v27 = vrot.slane %v3923_v49, 1  ;;  %v3941_v1 = vadd.f32 %v3938_v44, %v3880_v52 }
 0x3ab   : > { %v3813_v12 = vmax.f32 %v3780_v14, 0.0  ;;  %v3956_v60 = vrot.slane %v3941_v1, 7 }
 0x3ad   : > { %v3862_v32 = vmul.f32 %v6221_v16, %v3813_v12  ;;  %v3925_v16 = vadd.f32 %v3924_v27, %v3923_v49  ;;  %v3964_v23 = vsel %vm3963_vm15, %v3940_v17, %v3956_v60 }
 0x3ae   : > { %v3968_v26 = vsel %vm3967_vm14, %v3964_v23, %v3966_v61 }
 0x3af   : > { %v3928_v55 = vadd.f32 %v3927_v6, %v3862_v32  ;;  %v3946_v34 = vadd.f32 %v3938_v44, %v3925_v16 }
 0x3b1   : > { %v3929_v0 = vrot.slane %v3928_v55, 4  ;;  %v3961_v50 = vrot.slane %v3946_v34, 2 }
 0x3b3   : > { %v3930_v51 = vadd.f32 %v3929_v0, %v3928_v55 }
 0x3b5   : > { %v3931_v54 = vrot.slane %v3930_v51, 2 }
 0x3b7   : > { %v3932_v3 = vadd.f32 %v3931_v54, %v3930_v51 }
 0x3b9   : > { %v3933_v21 = vrot.slane %v3932_v3, 1 }
 0x3bb   : > { %v3934_v7 = vadd.f32 %v3933_v21, %v3932_v3 }
 0x3bd   : > { %v3947_v22 = vadd.f32 %v3938_v44, %v3934_v7 }
 0x3bf   : > { %v3962_v4 = vrot.slane %v3947_v22, 1 }
 0x3c1   : > { %v3972_v48 = vsel %vm3971_vm4, %v3961_v50, %v3962_v4 }
 0x3c2   : > { %v3974_v35 = vsel %vm3973_vm10, %v3970_v20, %v3972_v48 }
 0x3c3   : > { %v3976_v31 = vsel %vm3975_vm11, %v3968_v26, %v3974_v35 }
 0x3c4   : > { %3978 = vst [vmem:[%s178_s16] sm:$0xff] %v3976_v31 }
 0x3c5   : > { %4438 = shalt.err (!%p4435_p9)
}
 0x3c6   : > { %4265 = dma.vmem_to_hbm [thread:$0]  (%p4574_p13), %s3993_s15, 128, %s3995_s18, %s3980_s19  }
 0x3c7 PF: > { %s4006_s29 = sand.u32 1, %s4469_s9   ;;  %p6366_p10 = scmp.ge.s32.totalorder %s4481_s12, 2 }
 0x3c8   : > { %s4007_s5 = scalar_lea.sflag [#allocation5], %s4006_s29 }
 0x3c9   : > { %p4276_p11 = pnand %p6366_p10, %p4579_p4 }
 0x3cb   : > { %p4277_p0 = pneg %p4276_p11 }
 0x3cd   : > { %4464 = dma.done.wait (%p4277_p0), %s4007_s5, 128  }
 0x3ce   : > { %4466 = vsyncadd (%p4277_p0), %s4007_s5, 4294967168  ;;  %p16_p2 = scmp.ge.s32.totalorder %s4554_s23, 4   ;;  %s6367_s9 = smov %s4473_s10 }
 0x3cf   : > { %s6368_s10 = smov %s4477_s11  ;;  %s6369_s11 = smov %s4566_s26 }
 0x3d0   : > { %s6370_s12 = smov %s4554_s23  ;;  %18 = sbr.rel (!%p16_p2) target bundleno = 6 (0x6), region = 77 }
 0x3d5   :  { %4013 = vsyncpa [#allocation4], 1 }
 0x3d6   :  { %4015 = vsyncpa [#allocation4 + $0x1], 1 }
 0x3d7   :  { %4016 = vsyncpa [#allocation7], 1 }
 0x3d8   :  { %4017 = vsyncpa [#allocation5], 1 }
 0x3d9   :  { %4019 = vsyncpa [#allocation5 + $0x1], 1 }

</bundles_post_ra>
